<compile_context>
chip_gen: v5e
topology: v5e:2x2
jax: 0.10.0
libtpu: 0.0.40
codegen_flags: <defaults>
</compile_context>

<pallas_src>
import math

import jax
import jax.numpy as jnp
from jax.experimental import pallas as pl
from jax.experimental.pallas import tpu as pltpu

# Model hyper-parameters (ToyModel defaults).
DATA_DIM = 2
HIDDEN = 256
TIME_EMBED_DIM = 128
NUM_RES_BLOCKS = 3

K_PAD = 8      # x / wmap contraction dim padded to an f32 sublane (exact math)
OUT_PAD = 128  # output dim padded to a full lane width (unmasked stores)

INV_SQRT2 = 1.0 / math.sqrt(2.0)

# Indices into the stacked hidden x hidden weight array (11, 256, 256).
W_T2 = 0
W_O1 = 1
W_BLK0 = 2      # + blk*3 + layer
# Indices into the stacked bias array (13, 256).
B_T1 = 0
B_T2 = 1
B_MAP = 2
B_BLK0 = 3      # + blk*3 + layer
B_O1 = 12


def _silu(v):
    return v * jax.nn.sigmoid(v)


def toy_model_kernel(temb_ref, x_ref, w_hid_ref, b_hid_ref,
                     w_t1_ref, w_map_ref, w_o2_ref, b_o2_ref, o_ref):
    """Full ToyModel forward for the whole batch in one gridless step.

    temb_ref:  (B, 128)        f32 timestep embedding (cos/sin from wrapper)
    x_ref:     (B, 8)          f32 x zero-padded from data_dim=2 to 8
    w_hid_ref: (11, 256, 256)  bf16 stack: [wt2, wo1, 9 res-block layers]
    b_hid_ref: (13, 256)       f32 stack: [bt1, bt2, bmap, 9 blocks, bo1]
    w_t1_ref:  (128, 256)      bf16 t_module layer 1 weight
    w_map_ref: (8, 256)        bf16 ResNet_FC.map weight (K zero-padded)
    w_o2_ref:  (256, 128)      bf16 out_module layer 2 weight (N zero-padded)
    b_o2_ref:  (1, 128)        f32 out_module layer 2 bias (N zero-padded)
    o_ref:     (B, 128)        f32 output, only first 2 lanes meaningful
    """
    def matmul(v_f32, w_bf16):
        # bf16 operands on the MXU, f32 accumulate; all surrounding math f32.
        return jnp.dot(v_f32.astype(jnp.bfloat16), w_bf16,
                       preferred_element_type=jnp.float32)

    def bias(idx):
        return b_hid_ref[idx:idx + 1, :]   # static slice -> (1, 256) f32

    # ---- t_module: Linear(128,256) -> SiLU -> Linear(256,256)
    t_h = _silu(matmul(temb_ref[...], w_t1_ref[...]) + bias(B_T1))
    t_out = matmul(t_h, w_hid_ref[W_T2]) + bias(B_T2)

    # ---- x_module: ResNet_FC(data_dim, hidden, num_res_blocks=3)
    h = matmul(x_ref[...], w_map_ref[...]) + bias(B_MAP)
    inv_sqrt2 = jnp.float32(INV_SQRT2)
    for blk in range(NUM_RES_BLOCKS):
        t = h
        for layer in range(3):
            idx = blk * 3 + layer
            t = _silu(matmul(t, w_hid_ref[W_BLK0 + idx]) + bias(B_BLK0 + idx))
        h = (h + t) * inv_sqrt2

    # ---- out_module: Linear(256,256) -> SiLU -> Linear(256, data_dim[padded])
    z = _silu(matmul(h + t_out, w_hid_ref[W_O1]) + bias(B_O1))
    o_ref[...] = (matmul(z, w_o2_ref[...]) + b_o2_ref[...]).astype(o_ref.dtype)


def timestep_embedding(t, dim, max_period=1000):
    """Pure-JAX port of the PyTorch helper (cos/sin stay outside the kernel)."""
    half = dim // 2
    freqs = jnp.exp(-math.log(max_period)
                    * jnp.arange(half, dtype=jnp.float32) / half)
    args = t.astype(jnp.float32)[:, None] * freqs[None]
    emb = jnp.concatenate([jnp.cos(args), jnp.sin(args)], axis=-1)
    if dim % 2:
        emb = jnp.concatenate([emb, jnp.zeros_like(emb[:, :1])], axis=-1)
    return emb


def prepare_params(params):
    """One-time: stack / pad / bf16-cast weights (kept OUT of the per-call jit)."""
    (wt1, bt1, wt2, bt2, wmap, bmap, wblk, bblk, wo1, bo1, wo2, bo2) = params

    # All hidden x hidden weights in a single bf16 stack: [wt2, wo1, blocks...]
    w_hid = jnp.concatenate(
        [wt2[None], wo1[None], wblk.reshape(NUM_RES_BLOCKS * 3, HIDDEN, HIDDEN)],
        axis=0).astype(jnp.bfloat16)

    # All 256-wide biases in a single f32 stack: [bt1, bt2, bmap, blocks..., bo1]
    b_hid = jnp.concatenate(
        [bt1, bt2, bmap, bblk.reshape(NUM_RES_BLOCKS * 3, HIDDEN), bo1], axis=0)

    w_t1 = wt1.astype(jnp.bfloat16)                                   # (128, 256)
    w_map = jnp.pad(wmap, ((0, K_PAD - DATA_DIM), (0, 0))).astype(jnp.bfloat16)
    w_o2 = jnp.pad(wo2, ((0, 0), (0, OUT_PAD - DATA_DIM))).astype(jnp.bfloat16)
    b_o2 = jnp.pad(bo2, ((0, 0), (0, OUT_PAD - DATA_DIM)))            # f32

    return (w_hid, b_hid, w_t1, w_map, w_o2, b_o2)


@jax.jit
def toy_model_forward(t, x, prepped):
    """Per-call work: timestep embedding + x padding + one gridless pallas_call."""
    w_hid, b_hid, w_t1, w_map, w_o2, b_o2 = prepped
    b = x.shape[0]

    # Mirror ToyModel.forward's t.squeeze() / scalar-repeat handling.
    t = jnp.ravel(t)
    if t.shape[0] == 1 and b != 1:
        t = jnp.broadcast_to(t, (b,))
    assert t.shape[0] == b

    # TODO(synk): timestep_embedding's cos/sin is computed in the JAX wrapper
    # (no reliable sin/cos lowering in the TPU kernel); all matmul/SiLU work is in-kernel.
    temb = timestep_embedding(t, TIME_EMBED_DIM)

    # Zero-pad x's contraction dim 2 -> 8 (f32 sublane); mathematically exact.
    x_pad = jnp.pad(x.astype(jnp.float32), ((0, 0), (0, K_PAD - DATA_DIM)))

    vmem = pltpu.MemorySpace.VMEM
    out_pad = pl.pallas_call(
        toy_model_kernel,
        out_shape=jax.ShapeDtypeStruct((b, OUT_PAD), jnp.float32),
        in_specs=[pl.BlockSpec(memory_space=vmem) for _ in range(8)],
        out_specs=pl.BlockSpec(memory_space=vmem),
        compiler_params=pltpu.CompilerParams(vmem_limit_bytes=32 * 1024 * 1024),
    )(temb, x_pad, w_hid, b_hid, w_t1, w_map, w_o2, b_o2)

    return out_pad[:, :DATA_DIM]


def init_params(key):
    """Deterministic init mirroring nn.Linear's U(-1/sqrt(fan_in), 1/sqrt(fan_in))."""
    def linear_init(k, fan_in, fan_out):
        kw, kb = jax.random.split(k)
        bound = 1.0 / math.sqrt(fan_in)
        w = jax.random.uniform(kw, (fan_in, fan_out), jnp.float32, -bound, bound)
        b = jax.random.uniform(kb, (1, fan_out), jnp.float32, -bound, bound)
        return w, b

    keys = jax.random.split(key, 5 + NUM_RES_BLOCKS * 3)
    wt1, bt1 = linear_init(keys[0], TIME_EMBED_DIM, HIDDEN)
    wt2, bt2 = linear_init(keys[1], HIDDEN, HIDDEN)
    wmap, bmap = linear_init(keys[2], DATA_DIM, HIDDEN)
    wo1, bo1 = linear_init(keys[3], HIDDEN, HIDDEN)
    wo2, bo2 = linear_init(keys[4], HIDDEN, DATA_DIM)

    wblk_list, bblk_list = [], []
    for i in range(NUM_RES_BLOCKS * 3):
        w, bb = linear_init(keys[5 + i], HIDDEN, HIDDEN)
        wblk_list.append(w)
        bblk_list.append(bb)
    wblk = jnp.stack(wblk_list).reshape(NUM_RES_BLOCKS, 3, HIDDEN, HIDDEN)
    bblk = jnp.stack(bblk_list).reshape(NUM_RES_BLOCKS, 3, 1, HIDDEN)
    return (wt1, bt1, wt2, bt2, wmap, bmap, wblk, bblk, wo1, bo1, wo2, bo2)


def reference_forward(t, x, params):
    """Pure-JAX reference mirroring the kernel's math (bf16 dot operands, f32 acc)."""
    (wt1, bt1, wt2, bt2, wmap, bmap, wblk, bblk, wo1, bo1, wo2, bo2) = params

    def lin(v, w, b):
        return jnp.dot(v.astype(jnp.bfloat16), w.astype(jnp.bfloat16),
                       preferred_element_type=jnp.float32) + b

    temb = timestep_embedding(jnp.ravel(t), TIME_EMBED_DIM)
    t_out = lin(_silu(lin(temb, wt1, bt1)), wt2, bt2)
    h = lin(x.astype(jnp.float32), wmap, bmap)
    for blk in range(NUM_RES_BLOCKS):
        tt = h
        for layer in range(3):
            tt = _silu(lin(tt, wblk[blk, layer], bblk[blk, layer]))
        h = (h + tt) * jnp.float32(INV_SQRT2)
    z = _silu(lin(h + t_out, wo1, bo1))
    return lin(z, wo2, bo2)


if __name__ == "__main__":
    key = jax.random.PRNGKey(0)
    k_params, k_x, k_t = jax.random.split(key, 3)
    BATCH = 8

    params = init_params(k_params)
    prepped = prepare_params(params)   # one-time pad/stack/bf16 (not per call)
    x = jax.random.normal(k_x, (BATCH, DATA_DIM), jnp.float32)
    t = jax.random.uniform(k_t, (BATCH,), jnp.float32, minval=0.0, maxval=1.0)

    out = toy_model_forward(t, x, prepped)
    out = jax.block_until_ready(out)

    ref = reference_forward(t, x, params)
    assert out.shape == (BATCH, DATA_DIM)
    assert jnp.allclose(out, ref, atol=1e-3, rtol=1e-3), "mismatch vs reference"

    print("KERNEL_OK")
</pallas_src>

<mosaic_0001>
module attributes {stable_mosaic.version = 11 : i64} {
  func.func @toy_model_kernel(%arg0: memref<8x128xf32, #tpu.memory_space<vmem>>, %arg1: memref<8x8xf32, #tpu.memory_space<vmem>>, %arg2: memref<11x256x256xbf16, #tpu.memory_space<vmem>>, %arg3: memref<13x256xf32, #tpu.memory_space<vmem>>, %arg4: memref<128x256xbf16, #tpu.memory_space<vmem>>, %arg5: memref<8x256xbf16, #tpu.memory_space<vmem>>, %arg6: memref<256x128xbf16, #tpu.memory_space<vmem>>, %arg7: memref<1x128xf32, #tpu.memory_space<vmem>>, %arg8: memref<8x128xf32, #tpu.memory_space<vmem>>) attributes {dimension_semantics = [], scalar_prefetch = 0 : i64, scratch_operands = 0 : i64, tpu.core_type = #tpu.core_type<tc>} {
    %c0 = arith.constant 0 : index
    %c0_0 = arith.constant 0 : index
    %0 = vector.load %arg0[%c0, %c0_0] : memref<8x128xf32, #tpu.memory_space<vmem>>, vector<8x128xf32>
    %c0_1 = arith.constant 0 : index
    %c0_2 = arith.constant 0 : index
    %1 = vector.load %arg4[%c0_1, %c0_2] : memref<128x256xbf16, #tpu.memory_space<vmem>>, vector<128x256xbf16>
    %2 = arith.truncf %0 : vector<8x128xf32> to vector<8x128xbf16>
    %cst = arith.constant dense<0.000000e+00> : vector<8x256xf32>
    %3 = tpu.matmul %2, %1, %cst {dimension_numbers = #tpu.dot_dimension_numbers<[1], [0], [0], [1], [0, 0, 1, 1], [], []>} : vector<8x128xbf16>, vector<128x256xbf16>, vector<8x256xf32> -> vector<8x256xf32>
    %c0_3 = arith.constant 0 : index
    %c0_4 = arith.constant 0 : index
    %4 = vector.load %arg3[%c0_3, %c0_4] : memref<13x256xf32, #tpu.memory_space<vmem>>, vector<1x256xf32>
    %5 = vector.broadcast %4 : vector<1x256xf32> to vector<8x256xf32>
    %6 = arith.addf %3, %5 : vector<8x256xf32>
    %7 = arith.negf %6 : vector<8x256xf32>
    %8 = math.exp %7 : vector<8x256xf32>
    %cst_5 = arith.constant 1.000000e+00 : f32
    %9 = vector.broadcast %cst_5 : f32 to vector<8x256xf32>
    %10 = arith.addf %9, %8 : vector<8x256xf32>
    %11 = arith.divf %9, %10 : vector<8x256xf32>
    %12 = arith.mulf %6, %11 : vector<8x256xf32>
    %c0_6 = arith.constant 0 : index
    %c0_7 = arith.constant 0 : index
    %c0_8 = arith.constant 0 : index
    %13 = vector.load %arg2[%c0_6, %c0_7, %c0_8] : memref<11x256x256xbf16, #tpu.memory_space<vmem>>, vector<1x256x256xbf16>
    %14 = vector.shape_cast %13 : vector<1x256x256xbf16> to vector<256x256xbf16>
    %15 = arith.truncf %12 : vector<8x256xf32> to vector<8x256xbf16>
    %cst_9 = arith.constant dense<0.000000e+00> : vector<8x256xf32>
    %16 = tpu.matmul %15, %14, %cst_9 {dimension_numbers = #tpu.dot_dimension_numbers<[1], [0], [0], [1], [0, 0, 1, 1], [], []>} : vector<8x256xbf16>, vector<256x256xbf16>, vector<8x256xf32> -> vector<8x256xf32>
    %c1 = arith.constant 1 : index
    %c0_10 = arith.constant 0 : index
    %17 = vector.load %arg3[%c1, %c0_10] : memref<13x256xf32, #tpu.memory_space<vmem>>, vector<1x256xf32>
    %18 = vector.broadcast %17 : vector<1x256xf32> to vector<8x256xf32>
    %19 = arith.addf %16, %18 : vector<8x256xf32>
    %c0_11 = arith.constant 0 : index
    %c0_12 = arith.constant 0 : index
    %20 = vector.load %arg1[%c0_11, %c0_12] : memref<8x8xf32, #tpu.memory_space<vmem>>, vector<8x8xf32>
    %c0_13 = arith.constant 0 : index
    %c0_14 = arith.constant 0 : index
    %21 = vector.load %arg5[%c0_13, %c0_14] : memref<8x256xbf16, #tpu.memory_space<vmem>>, vector<8x256xbf16>
    %22 = arith.truncf %20 : vector<8x8xf32> to vector<8x8xbf16>
    %cst_15 = arith.constant dense<0.000000e+00> : vector<8x256xf32>
    %23 = tpu.matmul %22, %21, %cst_15 {dimension_numbers = #tpu.dot_dimension_numbers<[1], [0], [0], [1], [0, 0, 1, 1], [], []>} : vector<8x8xbf16>, vector<8x256xbf16>, vector<8x256xf32> -> vector<8x256xf32>
    %c2 = arith.constant 2 : index
    %c0_16 = arith.constant 0 : index
    %24 = vector.load %arg3[%c2, %c0_16] : memref<13x256xf32, #tpu.memory_space<vmem>>, vector<1x256xf32>
    %25 = vector.broadcast %24 : vector<1x256xf32> to vector<8x256xf32>
    %26 = arith.addf %23, %25 : vector<8x256xf32>
    %c2_17 = arith.constant 2 : index
    %c0_18 = arith.constant 0 : index
    %c0_19 = arith.constant 0 : index
    %27 = vector.load %arg2[%c2_17, %c0_18, %c0_19] : memref<11x256x256xbf16, #tpu.memory_space<vmem>>, vector<1x256x256xbf16>
    %28 = vector.shape_cast %27 : vector<1x256x256xbf16> to vector<256x256xbf16>
    %29 = arith.truncf %26 : vector<8x256xf32> to vector<8x256xbf16>
    %cst_20 = arith.constant dense<0.000000e+00> : vector<8x256xf32>
    %30 = tpu.matmul %29, %28, %cst_20 {dimension_numbers = #tpu.dot_dimension_numbers<[1], [0], [0], [1], [0, 0, 1, 1], [], []>} : vector<8x256xbf16>, vector<256x256xbf16>, vector<8x256xf32> -> vector<8x256xf32>
    %c3 = arith.constant 3 : index
    %c0_21 = arith.constant 0 : index
    %31 = vector.load %arg3[%c3, %c0_21] : memref<13x256xf32, #tpu.memory_space<vmem>>, vector<1x256xf32>
    %32 = vector.broadcast %31 : vector<1x256xf32> to vector<8x256xf32>
    %33 = arith.addf %30, %32 : vector<8x256xf32>
    %34 = arith.negf %33 : vector<8x256xf32>
    %35 = math.exp %34 : vector<8x256xf32>
    %cst_22 = arith.constant 1.000000e+00 : f32
    %36 = vector.broadcast %cst_22 : f32 to vector<8x256xf32>
    %37 = arith.addf %36, %35 : vector<8x256xf32>
    %38 = arith.divf %36, %37 : vector<8x256xf32>
    %39 = arith.mulf %33, %38 : vector<8x256xf32>
    %c3_23 = arith.constant 3 : index
    %c0_24 = arith.constant 0 : index
    %c0_25 = arith.constant 0 : index
    %40 = vector.load %arg2[%c3_23, %c0_24, %c0_25] : memref<11x256x256xbf16, #tpu.memory_space<vmem>>, vector<1x256x256xbf16>
    %41 = vector.shape_cast %40 : vector<1x256x256xbf16> to vector<256x256xbf16>
    %42 = arith.truncf %39 : vector<8x256xf32> to vector<8x256xbf16>
    %cst_26 = arith.constant dense<0.000000e+00> : vector<8x256xf32>
    %43 = tpu.matmul %42, %41, %cst_26 {dimension_numbers = #tpu.dot_dimension_numbers<[1], [0], [0], [1], [0, 0, 1, 1], [], []>} : vector<8x256xbf16>, vector<256x256xbf16>, vector<8x256xf32> -> vector<8x256xf32>
    %c4 = arith.constant 4 : index
    %c0_27 = arith.constant 0 : index
    %44 = vector.load %arg3[%c4, %c0_27] : memref<13x256xf32, #tpu.memory_space<vmem>>, vector<1x256xf32>
    %45 = vector.broadcast %44 : vector<1x256xf32> to vector<8x256xf32>
    %46 = arith.addf %43, %45 : vector<8x256xf32>
    %47 = arith.negf %46 : vector<8x256xf32>
    %48 = math.exp %47 : vector<8x256xf32>
    %cst_28 = arith.constant 1.000000e+00 : f32
    %49 = vector.broadcast %cst_28 : f32 to vector<8x256xf32>
    %50 = arith.addf %49, %48 : vector<8x256xf32>
    %51 = arith.divf %49, %50 : vector<8x256xf32>
    %52 = arith.mulf %46, %51 : vector<8x256xf32>
    %c4_29 = arith.constant 4 : index
    %c0_30 = arith.constant 0 : index
    %c0_31 = arith.constant 0 : index
    %53 = vector.load %arg2[%c4_29, %c0_30, %c0_31] : memref<11x256x256xbf16, #tpu.memory_space<vmem>>, vector<1x256x256xbf16>
    %54 = vector.shape_cast %53 : vector<1x256x256xbf16> to vector<256x256xbf16>
    %55 = arith.truncf %52 : vector<8x256xf32> to vector<8x256xbf16>
    %cst_32 = arith.constant dense<0.000000e+00> : vector<8x256xf32>
    %56 = tpu.matmul %55, %54, %cst_32 {dimension_numbers = #tpu.dot_dimension_numbers<[1], [0], [0], [1], [0, 0, 1, 1], [], []>} : vector<8x256xbf16>, vector<256x256xbf16>, vector<8x256xf32> -> vector<8x256xf32>
    %c5 = arith.constant 5 : index
    %c0_33 = arith.constant 0 : index
    %57 = vector.load %arg3[%c5, %c0_33] : memref<13x256xf32, #tpu.memory_space<vmem>>, vector<1x256xf32>
    %58 = vector.broadcast %57 : vector<1x256xf32> to vector<8x256xf32>
    %59 = arith.addf %56, %58 : vector<8x256xf32>
    %60 = arith.negf %59 : vector<8x256xf32>
    %61 = math.exp %60 : vector<8x256xf32>
    %cst_34 = arith.constant 1.000000e+00 : f32
    %62 = vector.broadcast %cst_34 : f32 to vector<8x256xf32>
    %63 = arith.addf %62, %61 : vector<8x256xf32>
    %64 = arith.divf %62, %63 : vector<8x256xf32>
    %65 = arith.mulf %59, %64 : vector<8x256xf32>
    %66 = arith.addf %26, %65 : vector<8x256xf32>
    %cst_35 = arith.constant 0.707106769 : f32
    %67 = vector.broadcast %cst_35 : f32 to vector<8x256xf32>
    %68 = arith.mulf %66, %67 : vector<8x256xf32>
    %c5_36 = arith.constant 5 : index
    %c0_37 = arith.constant 0 : index
    %c0_38 = arith.constant 0 : index
    %69 = vector.load %arg2[%c5_36, %c0_37, %c0_38] : memref<11x256x256xbf16, #tpu.memory_space<vmem>>, vector<1x256x256xbf16>
    %70 = vector.shape_cast %69 : vector<1x256x256xbf16> to vector<256x256xbf16>
    %71 = arith.truncf %68 : vector<8x256xf32> to vector<8x256xbf16>
    %cst_39 = arith.constant dense<0.000000e+00> : vector<8x256xf32>
    %72 = tpu.matmul %71, %70, %cst_39 {dimension_numbers = #tpu.dot_dimension_numbers<[1], [0], [0], [1], [0, 0, 1, 1], [], []>} : vector<8x256xbf16>, vector<256x256xbf16>, vector<8x256xf32> -> vector<8x256xf32>
    %c6 = arith.constant 6 : index
    %c0_40 = arith.constant 0 : index
    %73 = vector.load %arg3[%c6, %c0_40] : memref<13x256xf32, #tpu.memory_space<vmem>>, vector<1x256xf32>
    %74 = vector.broadcast %73 : vector<1x256xf32> to vector<8x256xf32>
    %75 = arith.addf %72, %74 : vector<8x256xf32>
    %76 = arith.negf %75 : vector<8x256xf32>
    %77 = math.exp %76 : vector<8x256xf32>
    %cst_41 = arith.constant 1.000000e+00 : f32
    %78 = vector.broadcast %cst_41 : f32 to vector<8x256xf32>
    %79 = arith.addf %78, %77 : vector<8x256xf32>
    %80 = arith.divf %78, %79 : vector<8x256xf32>
    %81 = arith.mulf %75, %80 : vector<8x256xf32>
    %c6_42 = arith.constant 6 : index
    %c0_43 = arith.constant 0 : index
    %c0_44 = arith.constant 0 : index
    %82 = vector.load %arg2[%c6_42, %c0_43, %c0_44] : memref<11x256x256xbf16, #tpu.memory_space<vmem>>, vector<1x256x256xbf16>
    %83 = vector.shape_cast %82 : vector<1x256x256xbf16> to vector<256x256xbf16>
    %84 = arith.truncf %81 : vector<8x256xf32> to vector<8x256xbf16>
    %cst_45 = arith.constant dense<0.000000e+00> : vector<8x256xf32>
    %85 = tpu.matmul %84, %83, %cst_45 {dimension_numbers = #tpu.dot_dimension_numbers<[1], [0], [0], [1], [0, 0, 1, 1], [], []>} : vector<8x256xbf16>, vector<256x256xbf16>, vector<8x256xf32> -> vector<8x256xf32>
    %c7 = arith.constant 7 : index
    %c0_46 = arith.constant 0 : index
    %86 = vector.load %arg3[%c7, %c0_46] : memref<13x256xf32, #tpu.memory_space<vmem>>, vector<1x256xf32>
    %87 = vector.broadcast %86 : vector<1x256xf32> to vector<8x256xf32>
    %88 = arith.addf %85, %87 : vector<8x256xf32>
    %89 = arith.negf %88 : vector<8x256xf32>
    %90 = math.exp %89 : vector<8x256xf32>
    %cst_47 = arith.constant 1.000000e+00 : f32
    %91 = vector.broadcast %cst_47 : f32 to vector<8x256xf32>
    %92 = arith.addf %91, %90 : vector<8x256xf32>
    %93 = arith.divf %91, %92 : vector<8x256xf32>
    %94 = arith.mulf %88, %93 : vector<8x256xf32>
    %c7_48 = arith.constant 7 : index
    %c0_49 = arith.constant 0 : index
    %c0_50 = arith.constant 0 : index
    %95 = vector.load %arg2[%c7_48, %c0_49, %c0_50] : memref<11x256x256xbf16, #tpu.memory_space<vmem>>, vector<1x256x256xbf16>
    %96 = vector.shape_cast %95 : vector<1x256x256xbf16> to vector<256x256xbf16>
    %97 = arith.truncf %94 : vector<8x256xf32> to vector<8x256xbf16>
    %cst_51 = arith.constant dense<0.000000e+00> : vector<8x256xf32>
    %98 = tpu.matmul %97, %96, %cst_51 {dimension_numbers = #tpu.dot_dimension_numbers<[1], [0], [0], [1], [0, 0, 1, 1], [], []>} : vector<8x256xbf16>, vector<256x256xbf16>, vector<8x256xf32> -> vector<8x256xf32>
    %c8 = arith.constant 8 : index
    %c0_52 = arith.constant 0 : index
    %99 = vector.load %arg3[%c8, %c0_52] : memref<13x256xf32, #tpu.memory_space<vmem>>, vector<1x256xf32>
    %100 = vector.broadcast %99 : vector<1x256xf32> to vector<8x256xf32>
    %101 = arith.addf %98, %100 : vector<8x256xf32>
    %102 = arith.negf %101 : vector<8x256xf32>
    %103 = math.exp %102 : vector<8x256xf32>
    %cst_53 = arith.constant 1.000000e+00 : f32
    %104 = vector.broadcast %cst_53 : f32 to vector<8x256xf32>
    %105 = arith.addf %104, %103 : vector<8x256xf32>
    %106 = arith.divf %104, %105 : vector<8x256xf32>
    %107 = arith.mulf %101, %106 : vector<8x256xf32>
    %108 = arith.addf %68, %107 : vector<8x256xf32>
    %cst_54 = arith.constant 0.707106769 : f32
    %109 = vector.broadcast %cst_54 : f32 to vector<8x256xf32>
    %110 = arith.mulf %108, %109 : vector<8x256xf32>
    %c8_55 = arith.constant 8 : index
    %c0_56 = arith.constant 0 : index
    %c0_57 = arith.constant 0 : index
    %111 = vector.load %arg2[%c8_55, %c0_56, %c0_57] : memref<11x256x256xbf16, #tpu.memory_space<vmem>>, vector<1x256x256xbf16>
    %112 = vector.shape_cast %111 : vector<1x256x256xbf16> to vector<256x256xbf16>
    %113 = arith.truncf %110 : vector<8x256xf32> to vector<8x256xbf16>
    %cst_58 = arith.constant dense<0.000000e+00> : vector<8x256xf32>
    %114 = tpu.matmul %113, %112, %cst_58 {dimension_numbers = #tpu.dot_dimension_numbers<[1], [0], [0], [1], [0, 0, 1, 1], [], []>} : vector<8x256xbf16>, vector<256x256xbf16>, vector<8x256xf32> -> vector<8x256xf32>
    %c9 = arith.constant 9 : index
    %c0_59 = arith.constant 0 : index
    %115 = vector.load %arg3[%c9, %c0_59] : memref<13x256xf32, #tpu.memory_space<vmem>>, vector<1x256xf32>
    %116 = vector.broadcast %115 : vector<1x256xf32> to vector<8x256xf32>
    %117 = arith.addf %114, %116 : vector<8x256xf32>
    %118 = arith.negf %117 : vector<8x256xf32>
    %119 = math.exp %118 : vector<8x256xf32>
    %cst_60 = arith.constant 1.000000e+00 : f32
    %120 = vector.broadcast %cst_60 : f32 to vector<8x256xf32>
    %121 = arith.addf %120, %119 : vector<8x256xf32>
    %122 = arith.divf %120, %121 : vector<8x256xf32>
    %123 = arith.mulf %117, %122 : vector<8x256xf32>
    %c9_61 = arith.constant 9 : index
    %c0_62 = arith.constant 0 : index
    %c0_63 = arith.constant 0 : index
    %124 = vector.load %arg2[%c9_61, %c0_62, %c0_63] : memref<11x256x256xbf16, #tpu.memory_space<vmem>>, vector<1x256x256xbf16>
    %125 = vector.shape_cast %124 : vector<1x256x256xbf16> to vector<256x256xbf16>
    %126 = arith.truncf %123 : vector<8x256xf32> to vector<8x256xbf16>
    %cst_64 = arith.constant dense<0.000000e+00> : vector<8x256xf32>
    %127 = tpu.matmul %126, %125, %cst_64 {dimension_numbers = #tpu.dot_dimension_numbers<[1], [0], [0], [1], [0, 0, 1, 1], [], []>} : vector<8x256xbf16>, vector<256x256xbf16>, vector<8x256xf32> -> vector<8x256xf32>
    %c10 = arith.constant 10 : index
    %c0_65 = arith.constant 0 : index
    %128 = vector.load %arg3[%c10, %c0_65] : memref<13x256xf32, #tpu.memory_space<vmem>>, vector<1x256xf32>
    %129 = vector.broadcast %128 : vector<1x256xf32> to vector<8x256xf32>
    %130 = arith.addf %127, %129 : vector<8x256xf32>
    %131 = arith.negf %130 : vector<8x256xf32>
    %132 = math.exp %131 : vector<8x256xf32>
    %cst_66 = arith.constant 1.000000e+00 : f32
    %133 = vector.broadcast %cst_66 : f32 to vector<8x256xf32>
    %134 = arith.addf %133, %132 : vector<8x256xf32>
    %135 = arith.divf %133, %134 : vector<8x256xf32>
    %136 = arith.mulf %130, %135 : vector<8x256xf32>
    %c10_67 = arith.constant 10 : index
    %c0_68 = arith.constant 0 : index
    %c0_69 = arith.constant 0 : index
    %137 = vector.load %arg2[%c10_67, %c0_68, %c0_69] : memref<11x256x256xbf16, #tpu.memory_space<vmem>>, vector<1x256x256xbf16>
    %138 = vector.shape_cast %137 : vector<1x256x256xbf16> to vector<256x256xbf16>
    %139 = arith.truncf %136 : vector<8x256xf32> to vector<8x256xbf16>
    %cst_70 = arith.constant dense<0.000000e+00> : vector<8x256xf32>
    %140 = tpu.matmul %139, %138, %cst_70 {dimension_numbers = #tpu.dot_dimension_numbers<[1], [0], [0], [1], [0, 0, 1, 1], [], []>} : vector<8x256xbf16>, vector<256x256xbf16>, vector<8x256xf32> -> vector<8x256xf32>
    %c11 = arith.constant 11 : index
    %c0_71 = arith.constant 0 : index
    %141 = vector.load %arg3[%c11, %c0_71] : memref<13x256xf32, #tpu.memory_space<vmem>>, vector<1x256xf32>
    %142 = vector.broadcast %141 : vector<1x256xf32> to vector<8x256xf32>
    %143 = arith.addf %140, %142 : vector<8x256xf32>
    %144 = arith.negf %143 : vector<8x256xf32>
    %145 = math.exp %144 : vector<8x256xf32>
    %cst_72 = arith.constant 1.000000e+00 : f32
    %146 = vector.broadcast %cst_72 : f32 to vector<8x256xf32>
    %147 = arith.addf %146, %145 : vector<8x256xf32>
    %148 = arith.divf %146, %147 : vector<8x256xf32>
    %149 = arith.mulf %143, %148 : vector<8x256xf32>
    %150 = arith.addf %110, %149 : vector<8x256xf32>
    %cst_73 = arith.constant 0.707106769 : f32
    %151 = vector.broadcast %cst_73 : f32 to vector<8x256xf32>
    %152 = arith.mulf %150, %151 : vector<8x256xf32>
    %153 = arith.addf %152, %19 : vector<8x256xf32>
    %c1_74 = arith.constant 1 : index
    %c0_75 = arith.constant 0 : index
    %c0_76 = arith.constant 0 : index
    %154 = vector.load %arg2[%c1_74, %c0_75, %c0_76] : memref<11x256x256xbf16, #tpu.memory_space<vmem>>, vector<1x256x256xbf16>
    %155 = vector.shape_cast %154 : vector<1x256x256xbf16> to vector<256x256xbf16>
    %156 = arith.truncf %153 : vector<8x256xf32> to vector<8x256xbf16>
    %cst_77 = arith.constant dense<0.000000e+00> : vector<8x256xf32>
    %157 = tpu.matmul %156, %155, %cst_77 {dimension_numbers = #tpu.dot_dimension_numbers<[1], [0], [0], [1], [0, 0, 1, 1], [], []>} : vector<8x256xbf16>, vector<256x256xbf16>, vector<8x256xf32> -> vector<8x256xf32>
    %c12 = arith.constant 12 : index
    %c0_78 = arith.constant 0 : index
    %158 = vector.load %arg3[%c12, %c0_78] : memref<13x256xf32, #tpu.memory_space<vmem>>, vector<1x256xf32>
    %159 = vector.broadcast %158 : vector<1x256xf32> to vector<8x256xf32>
    %160 = arith.addf %157, %159 : vector<8x256xf32>
    %161 = arith.negf %160 : vector<8x256xf32>
    %162 = math.exp %161 : vector<8x256xf32>
    %cst_79 = arith.constant 1.000000e+00 : f32
    %163 = vector.broadcast %cst_79 : f32 to vector<8x256xf32>
    %164 = arith.addf %163, %162 : vector<8x256xf32>
    %165 = arith.divf %163, %164 : vector<8x256xf32>
    %166 = arith.mulf %160, %165 : vector<8x256xf32>
    %c0_80 = arith.constant 0 : index
    %c0_81 = arith.constant 0 : index
    %167 = vector.load %arg6[%c0_80, %c0_81] : memref<256x128xbf16, #tpu.memory_space<vmem>>, vector<256x128xbf16>
    %168 = arith.truncf %166 : vector<8x256xf32> to vector<8x256xbf16>
    %cst_82 = arith.constant dense<0.000000e+00> : vector<8x128xf32>
    %169 = tpu.matmul %168, %167, %cst_82 {dimension_numbers = #tpu.dot_dimension_numbers<[1], [0], [0], [1], [0, 0, 1, 1], [], []>} : vector<8x256xbf16>, vector<256x128xbf16>, vector<8x128xf32> -> vector<8x128xf32>
    %c0_83 = arith.constant 0 : index
    %c0_84 = arith.constant 0 : index
    %170 = vector.load %arg7[%c0_83, %c0_84] : memref<1x128xf32, #tpu.memory_space<vmem>>, vector<1x128xf32>
    %171 = vector.broadcast %170 : vector<1x128xf32> to vector<8x128xf32>
    %172 = arith.addf %169, %171 : vector<8x128xf32>
    %c0_85 = arith.constant 0 : index
    %c0_86 = arith.constant 0 : index
    %173 = vector.load %arg8[%c0_85, %c0_86] : memref<8x128xf32, #tpu.memory_space<vmem>>, vector<8x128xf32>
    tpu.vector_store %arg8[%c0_85, %c0_86], %172 {strides = array<i32>} : memref<8x128xf32, #tpu.memory_space<vmem>>, vector<8x128xf32>,
    return
  }
}

</mosaic_0001>

<bundles_post_ra>
// kernel: toy_model_forward.1
= control target key start
LH: loop header
LB: loop body
LE: loop exit
PB: predicated region body
PF: predicated region fallthrough
CT: control target
= control target key end

     0   :  { %13 = vsyncpa [#allocation3], 0  ;;  %s6087_s0 = inlined_call_operand.vmem [shape: f32[8,128], index: 0, kind: input, shape index: {}]   ;;  %s6088_s1 = inlined_call_operand.vmem [shape: f32[8,8], index: 1, kind: input, shape index: {}]   ;;  %s6089_s2 = inlined_call_operand.hbm [shape: bf16[11,256,256], index: 2, kind: input, shape index: {}]   ;;  %s6090_s3 = inlined_call_operand.hbm [shape: f32[13,256], index: 3, kind: input, shape index: {}]   ;;  %s6091_s4 = inlined_call_operand.hbm [shape: bf16[128,256], index: 4, kind: input, shape index: {}]   ;;  %s6092_s5 = inlined_call_operand.hbm [shape: bf16[8,256], index: 5, kind: input, shape index: {}]   ;;  %s6093_s6 = inlined_call_operand.hbm [shape: bf16[256,128], index: 6, kind: input, shape index: {}]   ;;  %s6094_s7 = inlined_call_operand.hbm [shape: f32[1,128], index: 7, kind: input, shape index: {}]   ;;  %s6095_s8 = inlined_call_operand.vmem [shape: f32[8,128], index: 8, kind: output, shape index: {}]  }
   0x1   :  { %14 = vsyncpa [#allocation5], 0 }
   0x2   :  { %15 = vsyncpa [#allocation8], 0  ;;  %s38_s29 = sshll.u32 %s6090_s3, 4  ;;  %s39_s29 = int_to_ptr.hbm [resolvable:$true] %s38_s29 }
   0x3   :  { %16 = vsyncpa [#allocation11], 0  ;;  %s5915_s30 = smov [#allocation4]   ;;  %s65_s12 = sshll.u32 %s6092_s5, 4  ;;  %s66_s12 = int_to_ptr.hbm [resolvable:$true] %s65_s12 }
   0x4   :  { %s40_s9 = sshll.u32 %s5915_s30, 4  ;;  %s5916_s13 = smov 256   ;;  %s41_s9 = int_to_ptr.vmem [resolvable:$true] %s40_s9 }
   0x5   :  { %s5917_s14 = smov 16   ;;  %s5918_s15 = smov [#allocation7]  }
   0x6   :  { %46 = dma.hbm_to_vmem [thread:$0]  %s39_s29, 512, %s41_s9, [#allocation5], %s5916_s13, %s5916_s13, %s5917_s14  }
   0x7   :  { %s67_s16 = sshll.u32 %s5918_s15, 4  ;;  %s25_s19 = sshll.u32 %s6089_s2, 4  ;;  %s68_s16 = int_to_ptr.vmem [resolvable:$true] %s67_s16  ;;  %s26_s19 = int_to_ptr.hbm [resolvable:$true] %s25_s19 }
   0x8   :  { %70 = dma.hbm_to_vmem [thread:$0]  %s66_s12, 128, %s68_s16, [#allocation8]  }
   0x9   :  { %s5919_s3 = smov [#allocation2]   ;;  %s51_s5 = sshll.u32 %s6091_s4, 4  ;;  %s52_s5 = int_to_ptr.hbm [resolvable:$true] %s51_s5 }
   0xa   :  { %s27_s20 = sshll.u32 %s5919_s3, 4  ;;  %s5920_s23 = smov 128   ;;  %s28_s20 = int_to_ptr.vmem [resolvable:$true] %s27_s20 }
   0xb   :  { %s5921_s24 = smov 8   ;;  %s5922_s25 = smov [#allocation6]  }
   0xc   :  { %33 = dma.hbm_to_vmem [thread:$0]  %s26_s19, 45056, %s28_s20, [#allocation3], %s5920_s23, %s5920_s23, %s5921_s24  }
   0xd   :  { %s53_s26 = sshll.u32 %s5922_s25, 4  ;;  %s75_s2 = sshll.u32 %s6093_s6, 4  ;;  %s54_s26 = int_to_ptr.vmem [resolvable:$true] %s53_s26  ;;  %s76_s2 = int_to_ptr.hbm [resolvable:$true] %s75_s2 }
   0xe   :  { %59 = dma.hbm_to_vmem [thread:$0]  %s52_s5, 2048, %s54_s26, [#allocation5], %s5920_s23, %s5920_s23, %s5921_s24  }
   0xf   :  { %s5923_s29 = smov [#allocation9]   ;;  %s89_s4 = sshll.u32 %s6094_s7, 4  ;;  %s90_s4 = int_to_ptr.hbm [resolvable:$true] %s89_s4 }
  0x10   :  { %s77_s30 = sshll.u32 %s5923_s29, 4  ;;  %s5924_s11 = smov 64   ;;  %s78_s30 = int_to_ptr.vmem [resolvable:$true] %s77_s30 }
  0x11   :  { %s5925_s12 = smov 4   ;;  %s5926_s13 = smov [#allocation10]  }
  0x12   :  { %83 = dma.hbm_to_vmem [thread:$0]  %s76_s2, 2048, %s78_s30, [#allocation8], %s5924_s11, %s5924_s11, %s5925_s12  }
  0x13   :  { %s91_s14 = sshll.u32 %s5926_s13, 4  ;;  %s92_s14 = int_to_ptr.vmem [resolvable:$true] %s91_s14 }
  0x14   :  { %94 = dma.hbm_to_vmem [thread:$0]  %s90_s4, 16, %s92_s14, [#allocation11]  }
  0x15   :  { %5907 = dma.done.wait [#allocation3], 45056  }
  0x16   :  { %5908 = vsyncadd [#allocation3], 4294922240 }
  0x17   :  { %5909 = dma.done.wait [#allocation5], 2560  }
  0x18   :  { %5910 = vsyncadd [#allocation5], 4294964736 }
  0x19   :  { %5911 = dma.done.wait [#allocation8], 2176  }
  0x1a   :  { %5912 = vsyncadd [#allocation8], 4294965120 }
  0x1b   :  { %5913 = dma.done.wait [#allocation11], 16  }
  0x1c   :  { %5914 = vsyncadd [#allocation11], 4294967280  ;;  %v3776_v0 = vld [vmem:[#allocation6 + $0x70] sm:$0xf]  ;;  %v5293_v1 = vld [vmem:[#allocation6 + $0x74] sm:$0xf0] }
  0x1d   :  { %v5292_v2 = vld [vmem:[#allocation6 + $0x74] sm:$0xf]  ;;  %v3777_v3 = vor.u32 %v5293_v1, %v3776_v0  ;;  %v3778_v4 = vld [vmem:[#allocation6 + $0x78] sm:$0xf0]  ;;  %v3768_v5 = vld [vmem:[#allocation6 + $0x60] sm:$0xf] }
  0x1e   :  { %v5291_v6 = vld [vmem:[#allocation6 + $0x64] sm:$0xf0]  ;;  %v3781_v7 = vor.u32 %v5292_v2, %v3778_v4  ;;  %v5290_v8 = vld [vmem:[#allocation6 + $0x64] sm:$0xf]  ;;  %v3770_v9 = vld [vmem:[#allocation6 + $0x68] sm:$0xf0] }
  0x1f   :  { %224 = vmatpush.bf16.msra.mxu0 %v3777_v3  ;;  %v3769_v10 = vor.u32 %v5291_v6, %v3768_v5  ;;  %v3773_v11 = vor.u32 %v5290_v8, %v3770_v9  ;;  %v3760_v12 = vld [vmem:[#allocation6 + $0x50] sm:$0xf]  ;;  %v5289_v13 = vld [vmem:[#allocation6 + $0x54] sm:$0xf0]  ;;  %v5288_v14 = vld [vmem:[#allocation6 + $0x54] sm:$0xf] }
  0x20   :  { %237 = vmatpush.bf16.msra.mxu1 %v3781_v7  ;;  %v3762_v15 = vld [vmem:[#allocation6 + $0x58] sm:$0xf0]  ;;  %v3761_v16 = vor.u32 %v5289_v13, %v3760_v12  ;;  %v3752_v18 = vld [vmem:[#allocation6 + $0x40] sm:$0xf]  ;;  %v5287_v19 = vld [vmem:[#allocation6 + $0x44] sm:$0xf0] }
  0x21   :  { %v3765_v17 = vor.u32 %v5288_v14, %v3762_v15  ;;  %v5286_v20 = vld [vmem:[#allocation6 + $0x44] sm:$0xf]  ;;  %v3754_v21 = vld [vmem:[#allocation6 + $0x48] sm:$0xf0]  ;;  %v3753_v22 = vor.u32 %v5287_v19, %v3752_v18  ;;  %v3744_v24 = vld [vmem:[#allocation6 + $0x30] sm:$0xf] }
  0x22   :  { %v3757_v23 = vor.u32 %v5286_v20, %v3754_v21  ;;  %v5285_v25 = vld [vmem:[#allocation6 + $0x34] sm:$0xf0]  ;;  %v5284_v26 = vld [vmem:[#allocation6 + $0x34] sm:$0xf]  ;;  %v3746_v27 = vld [vmem:[#allocation6 + $0x38] sm:$0xf0] }
  0x23   :  { %225 = vmatpush.bf16.msra.mxu0 %v3769_v10  ;;  %v3745_v28 = vor.u32 %v5285_v25, %v3744_v24  ;;  %v3749_v29 = vor.u32 %v5284_v26, %v3746_v27  ;;  %v3736_v30 = vld [vmem:[#allocation6 + $0x20] sm:$0xf]  ;;  %v5283_v31 = vld [vmem:[#allocation6 + $0x24] sm:$0xf0]  ;;  %v5282_v32 = vld [vmem:[#allocation6 + $0x24] sm:$0xf] }
  0x24   :  { %238 = vmatpush.bf16.msra.mxu1 %v3773_v11  ;;  %v3738_v33 = vld [vmem:[#allocation6 + $0x28] sm:$0xf0]  ;;  %v3737_v34 = vor.u32 %v5283_v31, %v3736_v30  ;;  %v3728_v36 = vld [vmem:[#allocation6 + $0x10] sm:$0xf]  ;;  %v5281_v37 = vld [vmem:[#allocation6 + $0x14] sm:$0xf0] }
  0x25   :  { %v3741_v35 = vor.u32 %v5282_v32, %v3738_v33  ;;  %v5280_v38 = vld [vmem:[#allocation6 + $0x14] sm:$0xf]  ;;  %v3730_v39 = vld [vmem:[#allocation6 + $0x18] sm:$0xf0]  ;;  %v3729_v40 = vor.u32 %v5281_v37, %v3728_v36  ;;  %v3720_v42 = vld [vmem:[#allocation6] sm:$0xf] }
  0x26   :  { %v3733_v41 = vor.u32 %v5280_v38, %v3730_v39  ;;  %v5279_v43 = vld [vmem:[#allocation6 + $0x4] sm:$0xf0]  ;;  %v5278_v44 = vld [vmem:[#allocation6 + $0x4] sm:$0xf]  ;;  %v3722_v45 = vld [vmem:[#allocation6 + $0x8] sm:$0xf0] }
  0x27   :  { %226 = vmatpush.bf16.msra.mxu0 %v3761_v16  ;;  %v3721_v46 = vor.u32 %v5279_v43, %v3720_v42  ;;  %v120_v47 = vld [vmem:[%s6087_s0] sm:$0xff]  ;;  %v3725_v48 = vor.u32 %v5278_v44, %v3722_v45  ;;  %v3842_v50 = vld [vmem:[#allocation2 + $0x70] sm:$0xf]  ;;  %v5309_v51 = vld [vmem:[#allocation2 + $0x74] sm:$0xf0]  ;;  %vm562_vm0 = vcmask 1043456  }
  0x28   :  { %239 = vmatpush.bf16.msra.mxu1 %v3765_v17  ;;  %v137_v49 = vpack.c.bf16 %v120_v47, %v120_v47  ;;  %v3906_v52 = vld [vmem:[#allocation2 + $0xf0] sm:$0xf]  ;;  %v3843_v53 = vor.u32 %v5309_v51, %v3842_v50  ;;  %v5325_v54 = vld [vmem:[#allocation2 + $0xf4] sm:$0xf0]  ;;  %v5308_v55 = vld [vmem:[#allocation2 + $0x74] sm:$0xf] }
  0x29   :  { %v3844_v56 = vld [vmem:[#allocation2 + $0x78] sm:$0xf0]  ;;  %v3907_v57 = vor.u32 %v5325_v54, %v3906_v52  ;;  %v5324_v59 = vld [vmem:[#allocation2 + $0xf4] sm:$0xf]  ;;  %v3834_v62 = vld [vmem:[#allocation2 + $0x60] sm:$0xf] }
  0x2a   :  { %v3847_v58 = vor.u32 %v5308_v55, %v3844_v56  ;;  %v3908_v60 = vld [vmem:[#allocation2 + $0xf8] sm:$0xf0]  ;;  %491 = vmatpush.bf16.msra.mxu2 %v3843_v53  ;;  %v5307_v63 = vld [vmem:[#allocation2 + $0x64] sm:$0xf0]  ;;  %v3898_v0 = vld [vmem:[#allocation2 + $0xe0] sm:$0xf] }
  0x2b   :  { %227 = vmatpush.bf16.msra.mxu0 %v3753_v22  ;;  %v3911_v61 = vor.u32 %v5324_v59, %v3908_v60  ;;  %504 = vmatpush.bf16.msra.mxu3 %v3907_v57  ;;  %v3835_v1 = vor.u32 %v5307_v63, %v3834_v62  ;;  %v5323_v2 = vld [vmem:[#allocation2 + $0xe4] sm:$0xf0]  ;;  %v5306_v3 = vld [vmem:[#allocation2 + $0x64] sm:$0xf]  ;;  %v3836_v4 = vld [vmem:[#allocation2 + $0x68] sm:$0xf0] }
  0x2c   :  { %240 = vmatpush.bf16.msra.mxu1 %v3757_v23  ;;  %v3899_v5 = vor.u32 %v5323_v2, %v3898_v0  ;;  %v3839_v6 = vor.u32 %v5306_v3, %v3836_v4  ;;  %v5322_v7 = vld [vmem:[#allocation2 + $0xe4] sm:$0xf]  ;;  %v3900_v8 = vld [vmem:[#allocation2 + $0xe8] sm:$0xf0]  ;;  %v3826_v10 = vld [vmem:[#allocation2 + $0x50] sm:$0xf] }
  0x2d   :  { %v3903_v9 = vor.u32 %v5322_v7, %v3900_v8  ;;  %v5305_v11 = vld [vmem:[#allocation2 + $0x54] sm:$0xf0]  ;;  %v3890_v12 = vld [vmem:[#allocation2 + $0xd0] sm:$0xf]  ;;  %v5304_v15 = vld [vmem:[#allocation2 + $0x54] sm:$0xf] }
  0x2e   :  { %492 = vmatpush.bf16.msra.mxu2 %v3835_v1  ;;  %v3827_v13 = vor.u32 %v5305_v11, %v3826_v10  ;;  %v5321_v14 = vld [vmem:[#allocation2 + $0xd4] sm:$0xf0]  ;;  %v3828_v16 = vld [vmem:[#allocation2 + $0x58] sm:$0xf0]  ;;  %v5320_v19 = vld [vmem:[#allocation2 + $0xd4] sm:$0xf] }
  0x2f   :  { %228 = vmatpush.bf16.msra.mxu0 %v3745_v28  ;;  %505 = vmatpush.bf16.msra.mxu3 %v3899_v5  ;;  %v3891_v17 = vor.u32 %v5321_v14, %v3890_v12  ;;  %v3831_v18 = vor.u32 %v5304_v15, %v3828_v16  ;;  %v3892_v20 = vld [vmem:[#allocation2 + $0xd8] sm:$0xf0]  ;;  %v3818_v22 = vld [vmem:[#allocation2 + $0x40] sm:$0xf]  ;;  %v5303_v23 = vld [vmem:[#allocation2 + $0x44] sm:$0xf0] }
  0x30   :  { %241 = vmatpush.bf16.msra.mxu1 %v3749_v29  ;;  %v3895_v21 = vor.u32 %v5320_v19, %v3892_v20  ;;  %v3882_v24 = vld [vmem:[#allocation2 + $0xc0] sm:$0xf]  ;;  %v3819_v25 = vor.u32 %v5303_v23, %v3818_v22  ;;  %v5319_v26 = vld [vmem:[#allocation2 + $0xc4] sm:$0xf0]  ;;  %v5302_v27 = vld [vmem:[#allocation2 + $0x44] sm:$0xf] }
  0x31   :  { %v3820_v28 = vld [vmem:[#allocation2 + $0x48] sm:$0xf0]  ;;  %v3883_v29 = vor.u32 %v5319_v26, %v3882_v24  ;;  %v5318_v31 = vld [vmem:[#allocation2 + $0xc4] sm:$0xf]  ;;  %v3810_v33 = vld [vmem:[#allocation2 + $0x30] sm:$0xf] }
  0x32   :  { %493 = vmatpush.bf16.msra.mxu2 %v3827_v13  ;;  %v3823_v30 = vor.u32 %v5302_v27, %v3820_v28  ;;  %v3884_v32 = vld [vmem:[#allocation2 + $0xc8] sm:$0xf0]  ;;  %v3874_v36 = vld [vmem:[#allocation2 + $0xb0] sm:$0xf]  ;;  %v5317_v37 = vld [vmem:[#allocation2 + $0xb4] sm:$0xf0] }
  0x33   :  { %229 = vmatpush.bf16.msra.mxu0 %v3737_v34  ;;  %506 = vmatpush.bf16.msra.mxu3 %v3891_v17  ;;  %v3887_v34 = vor.u32 %v5318_v31, %v3884_v32  ;;  %v3875_v39 = vor.u32 %v5317_v37, %v3874_v36  ;;  %v5316_v42 = vld [vmem:[#allocation2 + $0xb4] sm:$0xf]  ;;  %v3876_v44 = vld [vmem:[#allocation2 + $0xb8] sm:$0xf0]  ;;  %v3802_v45 = vld [vmem:[#allocation2 + $0x20] sm:$0xf] }
  0x34   :  { %242 = vmatpush.bf16.msra.mxu1 %v3741_v35  ;;  %v5301_v35 = vld [vmem:[#allocation2 + $0x34] sm:$0xf0]  ;;  %v3879_v47 = vor.u32 %v5316_v42, %v3876_v44  ;;  %v5298_v50 = vld [vmem:[#allocation2 + $0x24] sm:$0xf]  ;;  %v3804_v52 = vld [vmem:[#allocation2 + $0x28] sm:$0xf0] }
  0x35   :  { %v3811_v38 = vor.u32 %v5301_v35, %v3810_v33  ;;  %v5314_v53 = vld [vmem:[#allocation2 + $0xa4] sm:$0xf]  ;;  %v3868_v54 = vld [vmem:[#allocation2 + $0xa8] sm:$0xf0]  ;;  %v3807_v56 = vor.u32 %v5298_v50, %v3804_v52  ;;  %v3794_v57 = vld [vmem:[#allocation2 + $0x10] sm:$0xf] }
  0x36   :  { %494 = vmatpush.bf16.msra.mxu2 %v3819_v25  ;;  %v3858_v59 = vld [vmem:[#allocation2 + $0x90] sm:$0xf]  ;;  %v3871_v60 = vor.u32 %v5314_v53, %v3868_v54  ;;  %v5296_v62 = vld [vmem:[#allocation2 + $0x14] sm:$0xf]  ;;  %v3796_v63 = vld [vmem:[#allocation2 + $0x18] sm:$0xf0] }
  0x37   :  { %230 = vmatpush.bf16.msra.mxu0 %v3729_v40  ;;  %507 = vmatpush.bf16.msra.mxu3 %v3883_v29  ;;  %v5300_v40 = vld [vmem:[#allocation2 + $0x34] sm:$0xf]  ;;  %v3860_v1 = vld [vmem:[#allocation2 + $0x98] sm:$0xf0]  ;;  %v3799_v5 = vor.u32 %v5296_v62, %v3796_v63  ;;  %v5295_v7 = vld [vmem:[#allocation2 + $0x4] sm:$0xf0] }
  0x38   :  { %243 = vmatpush.bf16.msra.mxu1 %v3733_v41  ;;  %v3812_v41 = vld [vmem:[#allocation2 + $0x38] sm:$0xf0]  ;;  %v5312_v0 = vld [vmem:[#allocation2 + $0x94] sm:$0xf]  ;;  %v3850_v8 = vld [vmem:[#allocation2 + $0x80] sm:$0xf] }
  0x39   :  { %v3815_v43 = vor.u32 %v5300_v40, %v3812_v41  ;;  %v138_v2 = vld [vmem:[#allocation4] ss:$8 sm:$0x3]  ;;  %v5294_v11 = vld [vmem:[#allocation2 + $0x4] sm:$0xf]  ;;  %vm558_vm9 = vcmask 64512  }
  0x3a   :  { %495 = vmatpush.bf16.msra.mxu2 %v3811_v38  ;;  %v5311_v10 = vld [vmem:[#allocation2 + $0x84] sm:$0xf0]  ;;  %v3788_v12 = vld [vmem:[#allocation2 + $0x8] sm:$0xf0]  ;;  %v5310_v13 = vld [vmem:[#allocation2 + $0x84] sm:$0xf] }
  0x3b   :  { %231 = vmatpush.bf16.msra.mxu0 %v3721_v46  ;;  %v5299_v46 = vld [vmem:[#allocation2 + $0x24] sm:$0xf0]  ;;  %508 = vmatpush.bf16.msra.mxu3 %v3875_v39  ;;  %v3852_v14 = vld [vmem:[#allocation2 + $0x88] sm:$0xf0]  ;;  %v140_v15 = vperm.slane %v138_v2, 0  ;;  %v141_v17 = vperm.slane %v138_v2, 1  ;;  %v3791_v19 = vor.u32 %v5294_v11, %v3788_v12 }
  0x3c   :  { %244 = vmatpush.bf16.msra.mxu1 %v3725_v48  ;;  %v3866_v48 = vld [vmem:[#allocation2 + $0xa0] sm:$0xf]  ;;  %v3803_v51 = vor.u32 %v5299_v46, %v3802_v45  ;;  %v3855_v20 = vor.u32 %v5310_v13, %v3852_v14  ;;  %v3974_v44 = vld [vmem:[#allocation2 + $0x278] sm:$0xf0]  ;;  %v3972_v63 = vld [vmem:[#allocation2 + $0x270] sm:$0xf] }
  0x3d   :  { %v544_v27 = vld [vmem:[#allocation7] sm:$0xff]  ;;  %v5341_v2 = vld [vmem:[#allocation2 + $0x274] sm:$0xf0] }
  0x3e   :  { %232 = vmatmul.bf16.vlgmr.msra.gmra.mxu0 %v137_v49  ;;  %496 = vmatpush.bf16.msra.mxu2 %v3803_v51  ;;  %v554_v28 = vunpack.c.l.b16 %v544_v27  ;;  %v555_v29 = vunpack.c.h.b16 %v544_v27  ;;  %v543_v12 = vld [vmem:[%s6088_s1] sm:$0xff]  ;;  %v5337_v27 = vld [vmem:[#allocation2 + $0x254] sm:$0xf0] }
  0x3f   :  { %245 = vmatmul.bf16.vlgmr.msra.gmra.mxu1 %v137_v49  ;;  %517 = vmatpush.bf16.msrb.mxu0 %v3847_v58  ;;  %v5315_v49 = vld [vmem:[#allocation2 + $0xa4] sm:$0xf0]  ;;  %v5297_v58 = vld [vmem:[#allocation2 + $0x14] sm:$0xf0]  ;;  %v545_v13 = vpack.c.bf16 %v543_v12, %v543_v12  ;;  %v3964_v14 = vld [vmem:[#allocation2 + $0x260] sm:$0xf] }
  0x40   :  { %530 = vmatpush.bf16.msrb.mxu1 %v3911_v61  ;;  %v3867_v55 = vor.u32 %v5315_v49, %v3866_v48  ;;  %v5313_v61 = vld [vmem:[#allocation2 + $0x94] sm:$0xf0]  ;;  %v3795_v3 = vor.u32 %v5297_v58, %v3794_v57  ;;  %v557_v31 = vpack.c.b16 %v555_v29, %v555_v29  ;;  %v4038_v48 = vld [vmem:[#allocation2 + $0x2f8] sm:$0xf0]  ;;  %v3988_v12 = vld [vmem:[#allocation2 + $0x290] sm:$0xf] }
  0x41   :  { %v3859_v4 = vor.u32 %v5313_v61, %v3858_v59 }
  0x42   :  { %509 = vmatpush.bf16.msra.mxu3 %v3867_v55  ;;  %497 = vmatpush.bf16.msra.mxu2 %v3795_v3  ;;  %v567_v35 = vsel %vm562_vm0, %v557_v31, 0  ;;  %v4036_v3 = vld [vmem:[#allocation2 + $0x2f0] sm:$0xf]  ;;  %v5336_v31 = vld [vmem:[#allocation2 + $0x254] sm:$0xf] }
  0x43   :  { %518 = vmatpush.bf16.msrb.mxu0 %v3839_v6  ;;  %v3786_v6 = vld [vmem:[#allocation2] sm:$0xf] }
  0x44   :  { %531 = vmatpush.bf16.msrb.mxu1 %v3903_v9  ;;  %v3863_v9 = vor.u32 %v5312_v0, %v3860_v1  ;;  %v3787_v16 = vor.u32 %v5295_v7, %v3786_v6 }
  0x46   :  { %510 = vmatpush.bf16.msra.mxu3 %v3859_v4  ;;  %498 = vmatpush.bf16.msra.mxu2 %v3787_v16  ;;  %v5357_v4 = vld [vmem:[#allocation2 + $0x2f4] sm:$0xf0]  ;;  %v4028_v16 = vld [vmem:[#allocation2 + $0x2e0] sm:$0xf] }
  0x47   :  { %519 = vmatpush.bf16.msrb.mxu0 %v3831_v18  ;;  %v3851_v18 = vor.u32 %v5311_v10, %v3850_v8  ;;  %v4037_v10 = vor.u32 %v5357_v4, %v4036_v3  ;;  %v5330_v3 = vld [vmem:[#allocation2 + $0x224] sm:$0xf]  ;;  %v3934_v4 = vld [vmem:[#allocation2 + $0x228] sm:$0xf0] }
  0x48   :  { %532 = vmatpush.bf16.msrb.mxu1 %v3895_v21 }
  0x4a   :  { %511 = vmatpush.bf16.msra.mxu3 %v3851_v18  ;;  %v5355_v18 = vld [vmem:[#allocation2 + $0x2e4] sm:$0xf0] }
  0x4b   :  { %520 = vmatpush.bf16.msrb.mxu0 %v3823_v30  ;;  %v556_v30 = vpack.c.b16 %v554_v28, %v554_v28  ;;  %v4020_v28 = vld [vmem:[#allocation2 + $0x2d0] sm:$0xf] }
  0x4c   :  { %533 = vmatpush.bf16.msrb.mxu1 %v3887_v34 }
  0x4d   :  { %v564_v34 = vsel %vm562_vm0, %v556_v30, 0  ;;  %v5353_v30 = vld [vmem:[#allocation2 + $0x2d4] sm:$0xf0] }
  0x4e   :  { %576 = vmatpush.bf16.msrb.mxu2 %v564_v34  ;;  %589 = vmatpush.bf16.msrb.mxu3 %v567_v35  ;;  %v5352_v35 = vld [vmem:[#allocation2 + $0x2d4] sm:$0xf] }
  0x4f   :  { %521 = vmatpush.bf16.msrb.mxu0 %v3815_v43  ;;  %v5340_v43 = vld [vmem:[#allocation2 + $0x274] sm:$0xf] }
  0x50   :  { %534 = vmatpush.bf16.msrb.mxu1 %v3879_v47  ;;  %v3977_v46 = vor.u32 %v5340_v43, %v3974_v44  ;;  %v5356_v47 = vld [vmem:[#allocation2 + $0x2f4] sm:$0xf]  ;;  %v5334_v43 = vld [vmem:[#allocation2 + $0x244] sm:$0xf]  ;;  %v3950_v44 = vld [vmem:[#allocation2 + $0x248] sm:$0xf0] }
  0x51   :  { %v4041_v50 = vor.u32 %v5356_v47, %v4038_v48  ;;  %v5350_v47 = vld [vmem:[#allocation2 + $0x2c4] sm:$0xf]  ;;  %v4014_v48 = vld [vmem:[#allocation2 + $0x2c8] sm:$0xf0] }
  0x53   :  { %522 = vmatpush.bf16.msrb.mxu0 %v3807_v56 }
  0x54   :  { %535 = vmatpush.bf16.msrb.mxu1 %v3871_v60 }
  0x57   :  { %523 = vmatpush.bf16.msrb.mxu0 %v3799_v5 }
  0x58   :  { %536 = vmatpush.bf16.msrb.mxu1 %v3863_v9  ;;  %v3973_v9 = vor.u32 %v5341_v2, %v3972_v63  ;;  %v5331_v63 = vld [vmem:[#allocation2 + $0x224] sm:$0xf0] }
  0x59   :  { %v5347_v2 = vld [vmem:[#allocation2 + $0x2a4] sm:$0xf0] }
  0x5b   :  { %524 = vmatpush.bf16.msrb.mxu0 %v3791_v19  ;;  %v5338_v19 = vld [vmem:[#allocation2 + $0x264] sm:$0xf] }
  0x5c   :  { %537 = vmatpush.bf16.msrb.mxu1 %v3855_v20  ;;  %v3966_v20 = vld [vmem:[#allocation2 + $0x268] sm:$0xf0] }
  0x5f   :  { %823 = vmatpush.bf16.msra.mxu0 %v3977_v46  ;;  %v3953_v46 = vor.u32 %v5334_v43, %v3950_v44 }
  0x60   :  { %836 = vmatpush.bf16.msra.mxu1 %v4041_v50  ;;  %v3940_v50 = vld [vmem:[#allocation2 + $0x230] sm:$0xf] }
  0xbb   :  { %v233_v21 = vpop.f32.mrf.mxu0 }
  0xbc   :  { %v5993_v22 = vadd.f32 %v233_v21, %v140_v15  ;;  %v246_v23 = vpop.f32.mrf.mxu1  ;;  %v5339_v15 = vld [vmem:[#allocation2 + $0x264] sm:$0xf0]  ;;  %v4029_v21 = vor.u32 %v5355_v18, %v4028_v16  ;;  %v5328_v16 = vld [vmem:[#allocation2 + $0x214] sm:$0xf] }
  0xbd   :  { %v5995_v24 = vadd.f32 %v246_v23, %v141_v17  ;;  %v3965_v17 = vor.u32 %v5339_v15, %v3964_v14  ;;  %v5354_v23 = vld [vmem:[#allocation2 + $0x2e4] sm:$0xf]  ;;  %v5344_v18 = vld [vmem:[#allocation2 + $0x294] sm:$0xf] }
  0xbe   :  { %v3782_v25 = vmul.f32 -1.442695, %v5993_v22 }
  0xbf   :  { %v3783_v26 = vmul.f32 -1.442695, %v5995_v24 }
  0xc0   :  { %5675 = vpow2.f32 %v3782_v25 }
  0xc1   :  { %5677 = vpow2.f32 %v3783_v26  ;;  %v3956_v26 = vld [vmem:[#allocation2 + $0x250] sm:$0xf] }
  0xc2   :  { %v3957_v29 = vor.u32 %v5337_v27, %v3956_v26  ;;  %v5343_v26 = vld [vmem:[#allocation2 + $0x284] sm:$0xf0]  ;;  %v5326_v27 = vld [vmem:[#allocation2 + $0x204] sm:$0xf] }
  0xc3   :  { %v235_v32 = vpop.f32.mrf.mxu0 }
  0xc4   :  { %v248_v33 = vpop.f32.mrf.mxu1  ;;  %v3958_v32 = vld [vmem:[#allocation2 + $0x258] sm:$0xf0] }
  0xc5   :  { %v4021_v33 = vor.u32 %v5353_v30, %v4020_v28  ;;  %v3961_v34 = vor.u32 %v5336_v31, %v3958_v32  ;;  %v5342_v30 = vld [vmem:[#allocation2 + $0x284] sm:$0xf]  ;;  %v3982_v31 = vld [vmem:[#allocation2 + $0x288] sm:$0xf0] }
  0xc6   :  { %v5676_v36 = vpop.eup %5675 }
  0xc7   :  { %v5678_v37 = vpop.eup %5677  ;;  %v256_v38 = vadd.f32 1.0, %v5676_v36  ;;  %v4022_v36 = vld [vmem:[#allocation2 + $0x2d8] sm:$0xf0] }
  0xc8   :  { %v257_v39 = vadd.f32 1.0, %v5678_v37  ;;  %v4025_v37 = vor.u32 %v5352_v35, %v4022_v36 }
  0xc9   :  { %5679 = vrcp.f32 %v256_v38  ;;  %v267_v51 = vand.u32 2147483647, %v256_v38  ;;  %v269_v52 = vand.u32 2147483648, %v256_v38  ;;  %vm263_vm3 = vweird.f32 %v256_v38 }
  0xca   :  { %5681 = vrcp.f32 %v257_v39  ;;  %v282_v55 = vand.u32 2147483647, %v257_v39  ;;  %v284_v56 = vand.u32 2147483648, %v257_v39  ;;  %vm278_vm5 = vweird.f32 %v257_v39 }
  0xcb   :  { %v270_v59 = vor.u32 1.1754944e-38, %v269_v52  ;;  %vm268_vm6 = vcmp.eq.f32.partialorder %v267_v51, 8.507059e+37  ;;  %v5333_v51 = vld [vmem:[#allocation2 + $0x234] sm:$0xf0]  ;;  %v4004_v52 = vld [vmem:[#allocation2 + $0x2b0] sm:$0xf] }
  0xcc   :  { %vm283_vm8 = vcmp.eq.f32.partialorder %v282_v55, 8.507059e+37  ;;  %v285_v62 = vor.u32 1.1754944e-38, %v284_v56  ;;  %v5332_v55 = vld [vmem:[#allocation2 + $0x234] sm:$0xf]  ;;  %v3942_v56 = vld [vmem:[#allocation2 + $0x238] sm:$0xf0] }
  0xcf   :  { %v5680_v40 = vpop.eup %5679 }
  0xd0   :  { %v5682_v41 = vpop.eup %5681  ;;  %v259_v42 = vmul.f32 %v5680_v40, %v256_v38  ;;  %vm264_vm1 = vweird.f32 %v5680_v40  ;;  %v3948_v38 = vld [vmem:[#allocation2 + $0x240] sm:$0xf] }
  0xd1   :  { %v274_v45 = vmul.f32 %v5682_v41, %v257_v39  ;;  %vm279_vm2 = vweird.f32 %v5682_v41  ;;  %vm265_vm4 = vmor %vm263_vm3, %vm264_vm1  ;;  %v5335_v39 = vld [vmem:[#allocation2 + $0x244] sm:$0xf0] }
  0xd2   :  { %v260_v49 = vsub.f32 1.0, %v259_v42  ;;  %vm280_vm7 = vmor %vm278_vm5, %vm279_vm2  ;;  %v5351_v42 = vld [vmem:[#allocation2 + $0x2c4] sm:$0xf0] }
  0xd3   :  { %v275_v53 = vsub.f32 1.0, %v274_v45 }
  0xd4   :  { %v261_v54 = vmul.f32 %v5680_v40, %v260_v49  ;;  %v4017_v49 = vor.u32 %v5350_v47, %v4014_v48 }
  0xd5   :  { %v276_v57 = vmul.f32 %v5682_v41, %v275_v53  ;;  %v3941_v53 = vor.u32 %v5333_v51, %v3940_v50 }
  0xd6   :  { %v262_v58 = vadd.f32 %v5680_v40, %v261_v54  ;;  %v5349_v54 = vld [vmem:[#allocation2 + $0x2b4] sm:$0xf0] }
  0xd7   :  { %v277_v60 = vadd.f32 %v5682_v41, %v276_v57  ;;  %v4005_v57 = vor.u32 %v5349_v54, %v4004_v52 }
  0xd8   :  { %v266_v61 = vsel %vm265_vm4, %v5680_v40, %v262_v58  ;;  %v4012_v40 = vld [vmem:[#allocation2 + $0x2c0] sm:$0xf]  ;;  %v3945_v58 = vor.u32 %v5332_v55, %v3942_v56 }
  0xd9   :  { %v271_v0 = vsel %vm268_vm6, %v270_v59, %v266_v61  ;;  %v281_v1 = vsel %vm280_vm7, %v5682_v41, %v277_v60  ;;  %v3949_v41 = vor.u32 %v5335_v39, %v3948_v38  ;;  %v4013_v45 = vor.u32 %v5351_v42, %v4012_v40  ;;  %v5348_v59 = vld [vmem:[#allocation2 + $0x2b4] sm:$0xf]  ;;  %v4006_v60 = vld [vmem:[#allocation2 + $0x2b8] sm:$0xf0] }
  0xda   :  { %v288_v5 = vmul.f32 %v271_v0, %v5993_v22  ;;  %v286_v6 = vsel %vm283_vm8, %v285_v62, %v281_v1  ;;  %v3969_v22 = vor.u32 %v5338_v19, %v3966_v20  ;;  %v4009_v61 = vor.u32 %v5348_v59, %v4006_v60  ;;  %v3932_v62 = vld [vmem:[#allocation2 + $0x220] sm:$0xf]  ;;  %v3990_v20 = vld [vmem:[#allocation2 + $0x298] sm:$0xf0]  ;;  %v4166_v60 = vld [vmem:[#allocation2 + $0x3f0] sm:$0xf] }
  0xdb   :  { %v289_v7 = vmul.f32 %v286_v6, %v5995_v24  ;;  %v4030_v24 = vld [vmem:[#allocation2 + $0x2e8] sm:$0xf0]  ;;  %v3996_v0 = vld [vmem:[#allocation2 + $0x2a0] sm:$0xf]  ;;  %v3933_v1 = vor.u32 %v5331_v63, %v3932_v62  ;;  %v3937_v6 = vor.u32 %v5330_v3, %v3934_v4  ;;  %v5388_v62 = vld [vmem:[#allocation2 + $0x3f4] sm:$0xf] }
  0xdc   :  { %v322_v8 = vpack.c.bf16 %v288_v5, %v288_v5  ;;  %v4033_v25 = vor.u32 %v5354_v23, %v4030_v24  ;;  %824 = vmatpush.bf16.msra.mxu0 %v3969_v22  ;;  %v3997_v5 = vor.u32 %v5347_v2, %v3996_v0  ;;  %v3916_v22 = vld [vmem:[#allocation2 + $0x200] sm:$0xf]  ;;  %v5327_v23 = vld [vmem:[#allocation2 + $0x204] sm:$0xf0]  ;;  %v4168_v0 = vld [vmem:[#allocation2 + $0x3f8] sm:$0xf0] }
  0xdd   :  { %v323_v11 = vpack.c.bf16 %v289_v7, %v289_v7  ;;  %v5346_v7 = vld [vmem:[#allocation2 + $0x2a4] sm:$0xf]  ;;  %v3917_v24 = vor.u32 %v5327_v23, %v3916_v22  ;;  %v4158_v2 = vld [vmem:[#allocation2 + $0x3e0] sm:$0xf]  ;;  %v5387_v3 = vld [vmem:[#allocation2 + $0x3e4] sm:$0xf0] }
  0xde   :  { %499 = vmatmul.bf16.vlgmr.msra.gmra.mxu2 %v322_v8  ;;  %525 = vmatmul.bf16.vlgmr.msrb.gmra.mxu0 %v322_v8  ;;  %v3998_v8 = vld [vmem:[#allocation2 + $0x2a8] sm:$0xf0]  ;;  %v5386_v4 = vld [vmem:[#allocation2 + $0x3e4] sm:$0xf] }
  0xdf   :  { %512 = vmatmul.bf16.vlgmr.msra.gmra.mxu3 %v323_v11  ;;  %538 = vmatmul.bf16.vlgmr.msrb.gmra.mxu1 %v323_v11  ;;  %v5329_v11 = vld [vmem:[#allocation2 + $0x214] sm:$0xf0]  ;;  %v5370_v22 = vld [vmem:[#allocation2 + $0x364] sm:$0xf] }
  0xe0   :  { %797 = vmatpush.bf16.msra.mxu2 %v3973_v9  ;;  %810 = vmatpush.bf16.msra.mxu3 %v4037_v10  ;;  %v3924_v9 = vld [vmem:[#allocation2 + $0x210] sm:$0xf]  ;;  %v4001_v10 = vor.u32 %v5346_v7, %v3998_v8 }
  0xe1   :  { %837 = vmatpush.bf16.msra.mxu1 %v4033_v25  ;;  %825 = vmatpush.bf16.msra.mxu0 %v3961_v34  ;;  %v3925_v14 = vor.u32 %v5329_v11, %v3924_v9  ;;  %v3980_v25 = vld [vmem:[#allocation2 + $0x280] sm:$0xf]  ;;  %v4102_v8 = vld [vmem:[#allocation2 + $0x370] sm:$0xf]  ;;  %v5373_v9 = vld [vmem:[#allocation2 + $0x374] sm:$0xf0] }
  0xe2   :  { %v3981_v28 = vor.u32 %v5343_v26, %v3980_v25  ;;  %v325_v34 = vld [vmem:[#allocation4 + $0x1] ss:$8 sm:$0x3]  ;;  %v4103_v11 = vor.u32 %v5373_v9, %v4102_v8  ;;  %v4120_v8 = vld [vmem:[#allocation2 + $0x398] sm:$0xf0] }
  0xe3   :  { %v328_v35 = vperm.slane %v325_v34, 1  ;;  %v327_v40 = vperm.slane %v325_v34, 0  ;;  %v4142_v26 = vld [vmem:[#allocation2 + $0x3c0] sm:$0xf]  ;;  %v5368_v34 = vld [vmem:[#allocation2 + $0x354] sm:$0xf] }
  0xe4   :  { %798 = vmatpush.bf16.msra.mxu2 %v3965_v17  ;;  %811 = vmatpush.bf16.msra.mxu3 %v4029_v21  ;;  %v3926_v17 = vld [vmem:[#allocation2 + $0x218] sm:$0xf0]  ;;  %v3993_v21 = vor.u32 %v5344_v18, %v3990_v20  ;;  %v4094_v20 = vld [vmem:[#allocation2 + $0x360] sm:$0xf] }
  0xe5   :  { %838 = vmatpush.bf16.msra.mxu1 %v4025_v37  ;;  %826 = vmatpush.bf16.msra.mxu0 %v3953_v46  ;;  %v3929_v19 = vor.u32 %v5328_v16, %v3926_v17  ;;  %v5384_v16 = vld [vmem:[#allocation2 + $0x3d4] sm:$0xf]  ;;  %v4152_v18 = vld [vmem:[#allocation2 + $0x3d8] sm:$0xf0] }
  0xe8   :  { %799 = vmatpush.bf16.msra.mxu2 %v3957_v29  ;;  %812 = vmatpush.bf16.msra.mxu3 %v4021_v33  ;;  %v3918_v29 = vld [vmem:[#allocation2 + $0x208] sm:$0xf0]  ;;  %v3985_v33 = vor.u32 %v5342_v30, %v3982_v31 }
  0xe9   :  { %839 = vmatpush.bf16.msra.mxu1 %v4017_v49  ;;  %827 = vmatpush.bf16.msra.mxu0 %v3945_v58  ;;  %v3921_v32 = vor.u32 %v5326_v27, %v3918_v29  ;;  %v547_v49 = vld [vmem:[#allocation4 + $0x2] ss:$8 sm:$0x3]  ;;  %v4144_v30 = vld [vmem:[#allocation2 + $0x3c8] sm:$0xf0] }
  0xea   :  { %v549_v50 = vperm.slane %v547_v49, 0  ;;  %v550_v51 = vperm.slane %v547_v49, 1  ;;  %v5383_v27 = vld [vmem:[#allocation2 + $0x3c4] sm:$0xf0] }
  0xeb   :  { %v4143_v29 = vor.u32 %v5383_v27, %v4142_v26  ;;  %v5361_v26 = vld [vmem:[#allocation2 + $0x314] sm:$0xf0]  ;;  %v5360_v27 = vld [vmem:[#allocation2 + $0x314] sm:$0xf] }
  0xec   :  { %800 = vmatpush.bf16.msra.mxu2 %v3949_v41  ;;  %813 = vmatpush.bf16.msra.mxu3 %v4013_v45 }
  0xed   :  { %840 = vmatpush.bf16.msra.mxu1 %v4009_v61  ;;  %828 = vmatpush.bf16.msra.mxu0 %v3937_v6  ;;  %v5389_v61 = vld [vmem:[#allocation2 + $0x3f4] sm:$0xf0]  ;;  %v4160_v6 = vld [vmem:[#allocation2 + $0x3e8] sm:$0xf0] }
  0xee   :  { %3912 = vmatmul.msk.bf16.vlgmr.msrb.gmra.mxu2 %vm558_vm9, %v545_v13  ;;  %v4167_v63 = vor.u32 %v5389_v61, %v4166_v60  ;;  %v4163_v7 = vor.u32 %v5386_v4, %v4160_v6  ;;  %v4070_v61 = vld [vmem:[#allocation2 + $0x330] sm:$0xf]  ;;  %v5377_v4 = vld [vmem:[#allocation2 + $0x394] sm:$0xf0] }
  0xef   :  { %3913 = vmatmul.msk.bf16.vlgmr.msrb.gmra.mxu3 %vm558_vm9, %v545_v13  ;;  %v5345_v13 = vld [vmem:[#allocation2 + $0x294] sm:$0xf0] }
  0xf0   :  { %801 = vmatpush.bf16.msra.mxu2 %v3941_v53  ;;  %814 = vmatpush.bf16.msra.mxu3 %v4005_v57  ;;  %v3989_v15 = vor.u32 %v5345_v13, %v3988_v12  ;;  %v4104_v12 = vld [vmem:[#allocation2 + $0x378] sm:$0xf0] }
  0xf1   :  { %841 = vmatpush.bf16.msra.mxu1 %v4001_v10  ;;  %829 = vmatpush.bf16.msra.mxu0 %v3929_v19  ;;  %v5372_v10 = vld [vmem:[#allocation2 + $0x374] sm:$0xf]  ;;  %v4155_v19 = vor.u32 %v5384_v16, %v4152_v18  ;;  %v5375_v18 = vld [vmem:[#allocation2 + $0x384] sm:$0xf0] }
  0xf2   :  { %v4107_v13 = vor.u32 %v5372_v10, %v4104_v12  ;;  %v4062_v10 = vld [vmem:[#allocation2 + $0x320] sm:$0xf]  ;;  %v5362_v12 = vld [vmem:[#allocation2 + $0x324] sm:$0xf] }
  0xf4   :  { %802 = vmatpush.bf16.msra.mxu2 %v3933_v1  ;;  %815 = vmatpush.bf16.msra.mxu3 %v3997_v5  ;;  %v4171_v1 = vor.u32 %v5388_v62, %v4168_v0  ;;  %v4159_v5 = vor.u32 %v5387_v3, %v4158_v2  ;;  %v5365_v62 = vld [vmem:[#allocation2 + $0x334] sm:$0xf0]  ;;  %v4118_v3 = vld [vmem:[#allocation2 + $0x390] sm:$0xf] }
  0xf5   :  { %842 = vmatpush.bf16.msra.mxu1 %v3993_v21  ;;  %830 = vmatpush.bf16.msra.mxu0 %v3921_v32  ;;  %v5371_v21 = vld [vmem:[#allocation2 + $0x364] sm:$0xf0]  ;;  %v4086_v32 = vld [vmem:[#allocation2 + $0x350] sm:$0xf]  ;;  %v4071_v0 = vor.u32 %v5365_v62, %v4070_v61 }
  0xf6   :  { %v4095_v23 = vor.u32 %v5371_v21, %v4094_v20 }
  0xf8   :  { %803 = vmatpush.bf16.msra.mxu2 %v3925_v14  ;;  %816 = vmatpush.bf16.msra.mxu3 %v3989_v15  ;;  %v4150_v14 = vld [vmem:[#allocation2 + $0x3d0] sm:$0xf]  ;;  %v5385_v15 = vld [vmem:[#allocation2 + $0x3d4] sm:$0xf0] }
  0xf9   :  { %843 = vmatpush.bf16.msra.mxu1 %v3985_v33  ;;  %v4151_v17 = vor.u32 %v5385_v15, %v4150_v14  ;;  %1117 = vmatpush.bf16.msrb.mxu0 %v4107_v13  ;;  %v5369_v33 = vld [vmem:[#allocation2 + $0x354] sm:$0xf0]  ;;  %v4064_v14 = vld [vmem:[#allocation2 + $0x328] sm:$0xf0] }
  0xfa   :  { %v4067_v16 = vor.u32 %v5362_v12, %v4064_v14 }
  0xfc   :  { %804 = vmatpush.bf16.msra.mxu2 %v3917_v24  ;;  %817 = vmatpush.bf16.msra.mxu3 %v3981_v28  ;;  %v4096_v24 = vld [vmem:[#allocation2 + $0x368] sm:$0xf0]  ;;  %v5382_v28 = vld [vmem:[#allocation2 + $0x3c4] sm:$0xf] }
  0xfd   :  { %1130 = vmatpush.bf16.msrb.mxu1 %v4171_v1  ;;  %v4099_v25 = vor.u32 %v5370_v22, %v4096_v24  ;;  %v4147_v31 = vor.u32 %v5382_v28, %v4144_v30  ;;  %v4072_v1 = vld [vmem:[#allocation2 + $0x338] sm:$0xf0] }
  0xff   :  { %1118 = vmatpush.bf16.msrb.mxu0 %v4099_v25  ;;  %v4054_v25 = vld [vmem:[#allocation2 + $0x310] sm:$0xf] }
 0x100   :  { %1104 = vmatpush.bf16.msrb.mxu3 %v4167_v63  ;;  %1091 = vmatpush.bf16.msrb.mxu2 %v4103_v11  ;;  %v5364_v63 = vld [vmem:[#allocation2 + $0x334] sm:$0xf]  ;;  %v5363_v11 = vld [vmem:[#allocation2 + $0x324] sm:$0xf0]  ;;  %v4055_v30 = vor.u32 %v5361_v26, %v4054_v25  ;;  %v5418_v25 = vld [vmem:[#allocation2 + $0x4e4] sm:$0xf] }
 0x101   :  { %1131 = vmatpush.bf16.msrb.mxu1 %v4163_v7  ;;  %v4075_v2 = vor.u32 %v5364_v63, %v4072_v1  ;;  %v4119_v7 = vor.u32 %v5377_v4, %v4118_v3  ;;  %v4063_v13 = vor.u32 %v5363_v11, %v4062_v10 }
 0x104   :  { %1105 = vmatpush.bf16.msrb.mxu3 %v4159_v5  ;;  %1092 = vmatpush.bf16.msrb.mxu2 %v4095_v23  ;;  %v5376_v5 = vld [vmem:[#allocation2 + $0x394] sm:$0xf]  ;;  %v4112_v23 = vld [vmem:[#allocation2 + $0x388] sm:$0xf0] }
 0x105   :  { %1132 = vmatpush.bf16.msrb.mxu1 %v4155_v19  ;;  %v4123_v9 = vor.u32 %v5376_v5, %v4120_v8  ;;  %v5374_v19 = vld [vmem:[#allocation2 + $0x384] sm:$0xf] }
 0x106   :  { %v4115_v24 = vor.u32 %v5374_v19, %v4112_v23  ;;  %v5420_v19 = vld [vmem:[#allocation2 + $0x4f4] sm:$0xf]  ;;  %v4288_v23 = vld [vmem:[#allocation2 + $0x4e0] sm:$0xf] }
 0x108   :  { %1106 = vmatpush.bf16.msrb.mxu3 %v4151_v17  ;;  %v4110_v17 = vld [vmem:[#allocation2 + $0x380] sm:$0xf] }
 0x109   :  { %1133 = vmatpush.bf16.msrb.mxu1 %v4147_v31  ;;  %v4111_v22 = vor.u32 %v5375_v18, %v4110_v17  ;;  %v4056_v31 = vld [vmem:[#allocation2 + $0x318] sm:$0xf0]  ;;  %v4296_v17 = vld [vmem:[#allocation2 + $0x4f0] sm:$0xf]  ;;  %v5421_v18 = vld [vmem:[#allocation2 + $0x4f4] sm:$0xf0] }
 0x10c   :  { %1107 = vmatpush.bf16.msrb.mxu3 %v4143_v29 }
 0x15b   :  { %v526_v36 = vpop.f32.mrf.mxu0 }
 0x15c   :  { %v527_v37 = vadd.f32 %v526_v36, %v328_v35  ;;  %v539_v38 = vpop.f32.mrf.mxu1  ;;  %v4087_v35 = vor.u32 %v5369_v33, %v4086_v32  ;;  %v4088_v36 = vld [vmem:[#allocation2 + $0x358] sm:$0xf0]  ;;  %v4059_v32 = vor.u32 %v5360_v27, %v4056_v31  ;;  %v4290_v27 = vld [vmem:[#allocation2 + $0x4e8] sm:$0xf0]  ;;  %v5404_v31 = vld [vmem:[#allocation2 + $0x474] sm:$0xf] }
 0x15e   :  { %v6004_v39 = vadd.f32 %v539_v38, %v527_v37  ;;  %v4091_v37 = vor.u32 %v5368_v34, %v4088_v36  ;;  %v4134_v38 = vld [vmem:[#allocation2 + $0x3b0] sm:$0xf]  ;;  %1093 = vmatpush.bf16.msrb.mxu2 %v4087_v35  ;;  %v4046_v35 = vld [vmem:[#allocation2 + $0x300] sm:$0xf]  ;;  %v5359_v36 = vld [vmem:[#allocation2 + $0x304] sm:$0xf0] }
 0x160   :  { %1119 = vmatpush.bf16.msrb.mxu0 %v4091_v37  ;;  %v5358_v37 = vld [vmem:[#allocation2 + $0x304] sm:$0xf] }
 0x161   :  { %v500_v41 = vpop.f32.mrf.mxu2 }
 0x162   :  { %v501_v42 = vadd.f32 %v500_v41, %v327_v40  ;;  %v513_v43 = vpop.f32.mrf.mxu3  ;;  %v5381_v40 = vld [vmem:[#allocation2 + $0x3b4] sm:$0xf0]  ;;  %v5380_v41 = vld [vmem:[#allocation2 + $0x3b4] sm:$0xf] }
 0x163   :  { %v528_v44 = vpop.f32.mrf.mxu0 }
 0x164   :  { %v6006_v45 = vadd.f32 %v513_v43, %v501_v42  ;;  %v541_v46 = vpop.f32.mrf.mxu1  ;;  %v4135_v42 = vor.u32 %v5381_v40, %v4134_v38  ;;  %v4136_v43 = vld [vmem:[#allocation2 + $0x3b8] sm:$0xf0] }
 0x165   :  { %v4139_v44 = vor.u32 %v5380_v41, %v4136_v43  ;;  %v4078_v46 = vld [vmem:[#allocation2 + $0x340] sm:$0xf]  ;;  %v4047_v41 = vor.u32 %v5359_v36, %v4046_v35  ;;  %v4280_v35 = vld [vmem:[#allocation2 + $0x4d0] sm:$0xf]  ;;  %v5417_v36 = vld [vmem:[#allocation2 + $0x4d4] sm:$0xf0] }
 0x166   :  { %1108 = vmatpush.bf16.msrb.mxu3 %v4135_v42  ;;  %v4048_v42 = vld [vmem:[#allocation2 + $0x308] sm:$0xf0] }
 0x167   :  { %1134 = vmatpush.bf16.msrb.mxu1 %v4139_v44  ;;  %v4051_v44 = vor.u32 %v5358_v37, %v4048_v42  ;;  %v5416_v37 = vld [vmem:[#allocation2 + $0x4d4] sm:$0xf]  ;;  %v4224_v42 = vld [vmem:[#allocation2 + $0x460] sm:$0xf] }
 0x169   :  { %v502_v47 = vpop.f32.mrf.mxu2 }
 0x16a   :  { %v515_v48 = vpop.f32.mrf.mxu3  ;;  %v5367_v47 = vld [vmem:[#allocation2 + $0x344] sm:$0xf0] }
 0x16b   :  { %v5366_v48 = vld [vmem:[#allocation2 + $0x344] sm:$0xf]  ;;  %v4079_v49 = vor.u32 %v5367_v47, %v4078_v46 }
 0x16d   :  { %1094 = vmatpush.bf16.msrb.mxu2 %v4079_v49 }
 0x171   :  { %v578_v52 = vpop.f32.mrf.mxu2  ;;  %1095 = vmatpush.bf16.msrb.mxu2 %v4071_v0 }
 0x172   :  { %v6008_v53 = vadd.f32 %v578_v52, %v549_v50  ;;  %v591_v54 = vpop.f32.mrf.mxu3  ;;  %v4080_v50 = vld [vmem:[#allocation2 + $0x348] sm:$0xf0]  ;;  %v4126_v52 = vld [vmem:[#allocation2 + $0x3a0] sm:$0xf] }
 0x173   :  { %v6010_v55 = vadd.f32 %v591_v54, %v550_v51  ;;  %v4083_v51 = vor.u32 %v5366_v48, %v4080_v50  ;;  %v5379_v54 = vld [vmem:[#allocation2 + $0x3a4] sm:$0xf0] }
 0x174   :  { %v628_v56 = vpack.c.bf16 %v6008_v53, %v6008_v53 }
 0x175   :  { %v629_v57 = vpack.c.bf16 %v6010_v55, %v6010_v55  ;;  %1120 = vmatpush.bf16.msrb.mxu0 %v4083_v51  ;;  %1096 = vmatpush.bf16.msrb.mxu2 %v4063_v13 }
 0x176   :  { %805 = vmatmul.bf16.vlgmr.msra.gmra.mxu2 %v628_v56  ;;  %831 = vmatmul.bf16.vlgmr.msra.gmra.mxu0 %v628_v56  ;;  %v5378_v56 = vld [vmem:[#allocation2 + $0x3a4] sm:$0xf] }
 0x177   :  { %818 = vmatmul.bf16.vlgmr.msra.gmra.mxu3 %v629_v57  ;;  %844 = vmatmul.bf16.vlgmr.msra.gmra.mxu1 %v629_v57  ;;  %v631_v57 = vld [vmem:[#allocation4 + $0x3] ss:$8 sm:$0x3] }
 0x178   :  { %v634_v6 = vperm.slane %v631_v57, 1  ;;  %v633_v29 = vperm.slane %v631_v57, 0 }
 0x179   :  { %v580_v58 = vpop.f32.mrf.mxu2  ;;  %1121 = vmatpush.bf16.msrb.mxu0 %v4075_v2  ;;  %1097 = vmatpush.bf16.msrb.mxu2 %v4055_v30  ;;  %v5405_v30 = vld [vmem:[#allocation2 + $0x474] sm:$0xf0] }
 0x17a   :  { %v593_v59 = vpop.f32.mrf.mxu3  ;;  %v4127_v58 = vor.u32 %v5379_v54, %v4126_v52 }
 0x17b   :  { %v4128_v59 = vld [vmem:[#allocation2 + $0x3a8] sm:$0xf0] }
 0x17c   :  { %v4131_v60 = vor.u32 %v5378_v56, %v4128_v59  ;;  %1109 = vmatpush.bf16.msrb.mxu3 %v4127_v58 }
 0x17d   :  { %1122 = vmatpush.bf16.msrb.mxu0 %v4067_v16  ;;  %1098 = vmatpush.bf16.msrb.mxu2 %v4047_v41 }
 0x17e   :  { %1135 = vmatpush.bf16.msrb.mxu1 %v4131_v60 }
 0x180   :  { %1110 = vmatpush.bf16.msrb.mxu3 %v4119_v7 }
 0x181   :  { %1123 = vmatpush.bf16.msrb.mxu0 %v4059_v32 }
 0x182   :  { %1136 = vmatpush.bf16.msrb.mxu1 %v4123_v9 }
 0x184   :  { %1111 = vmatpush.bf16.msrb.mxu3 %v4111_v22 }
 0x185   :  { %1124 = vmatpush.bf16.msrb.mxu0 %v4051_v44  ;;  %v5402_v44 = vld [vmem:[#allocation2 + $0x464] sm:$0xf] }
 0x186   :  { %1137 = vmatpush.bf16.msrb.mxu1 %v4115_v24  ;;  %v5419_v24 = vld [vmem:[#allocation2 + $0x4e4] sm:$0xf0] }
 0x187   :  { %v4289_v26 = vor.u32 %v5419_v24, %v4288_v23  ;;  %v4202_v23 = vld [vmem:[#allocation2 + $0x438] sm:$0xf0] }
 0x1f3   :  { %v832_v15 = vpop.f32.mrf.mxu0 }
 0x1f4   :  { %v833_v20 = vadd.f32 %v832_v15, %v634_v6  ;;  %v845_v21 = vpop.f32.mrf.mxu1 }
 0x1f6   :  { %v846_v28 = vadd.f32 %v845_v21, %v833_v20  ;;  %v4297_v20 = vor.u32 %v5421_v18, %v4296_v17  ;;  %v4298_v21 = vld [vmem:[#allocation2 + $0x4f8] sm:$0xf0] }
 0x1f7   :  { %v4301_v22 = vor.u32 %v5420_v19, %v4298_v21  ;;  %v4200_v19 = vld [vmem:[#allocation2 + $0x430] sm:$0xf]  ;;  %v5396_v21 = vld [vmem:[#allocation2 + $0x434] sm:$0xf] }
 0x1f8   :  { %v4043_v33 = vmul.f32 -1.442695, %v846_v28  ;;  %1398 = vmatpush.bf16.msra.mxu3 %v4297_v20  ;;  %v5397_v20 = vld [vmem:[#allocation2 + $0x434] sm:$0xf0]  ;;  %v4205_v24 = vor.u32 %v5396_v21, %v4202_v23 }
 0x1f9   :  { %v806_v34 = vpop.f32.mrf.mxu2  ;;  %1424 = vmatpush.bf16.msra.mxu1 %v4301_v22  ;;  %v4201_v22 = vor.u32 %v5397_v20, %v4200_v19 }
 0x1fa   :  { %5683 = vpow2.f32 %v4043_v33  ;;  %v807_v38 = vadd.f32 %v806_v34, %v633_v29  ;;  %v819_v40 = vpop.f32.mrf.mxu3  ;;  %v4232_v29 = vld [vmem:[#allocation2 + $0x470] sm:$0xf]  ;;  %v4234_v33 = vld [vmem:[#allocation2 + $0x478] sm:$0xf0] }
 0x1fb   :  { %v834_v43 = vpop.f32.mrf.mxu0  ;;  %v4233_v32 = vor.u32 %v5405_v30, %v4232_v29  ;;  %v4237_v34 = vor.u32 %v5404_v31, %v4234_v33  ;;  %v4250_v30 = vld [vmem:[#allocation2 + $0x498] sm:$0xf0]  ;;  %v5395_v33 = vld [vmem:[#allocation2 + $0x424] sm:$0xf0] }
 0x1fc   :  { %v820_v46 = vadd.f32 %v819_v40, %v807_v38  ;;  %v847_v47 = vpop.f32.mrf.mxu1  ;;  %1399 = vmatpush.bf16.msra.mxu3 %v4289_v26  ;;  %v4281_v38 = vor.u32 %v5417_v36, %v4280_v35  ;;  %v4282_v40 = vld [vmem:[#allocation2 + $0x4d8] sm:$0xf0]  ;;  %v5403_v43 = vld [vmem:[#allocation2 + $0x464] sm:$0xf0]  ;;  %v5409_v26 = vld [vmem:[#allocation2 + $0x494] sm:$0xf0] }
 0x1fd   :  { %1385 = vmatpush.bf16.msra.mxu2 %v4233_v32  ;;  %1411 = vmatpush.bf16.msra.mxu0 %v4237_v34  ;;  %v4285_v41 = vor.u32 %v5416_v37, %v4282_v40  ;;  %v4226_v47 = vld [vmem:[#allocation2 + $0x468] sm:$0xf0]  ;;  %v4192_v32 = vld [vmem:[#allocation2 + $0x420] sm:$0xf]  ;;  %v5394_v34 = vld [vmem:[#allocation2 + $0x424] sm:$0xf] }
 0x1fe   :  { %v4042_v48 = vmul.f32 -1.442695, %v820_v46  ;;  %v4193_v35 = vor.u32 %v5395_v33, %v4192_v32  ;;  %v4194_v36 = vld [vmem:[#allocation2 + $0x428] sm:$0xf0] }
 0x1ff   :  { %v4197_v40 = vor.u32 %v5394_v34, %v4194_v36 }
 0x200   :  { %v5684_v49 = vpop.eup %5683  ;;  %5685 = vpow2.f32 %v4042_v48  ;;  %1400 = vmatpush.bf16.msra.mxu3 %v4281_v38  ;;  %v4229_v48 = vor.u32 %v5402_v44, %v4226_v47  ;;  %v4242_v47 = vld [vmem:[#allocation2 + $0x488] sm:$0xf0] }
 0x201   :  { %v856_v50 = vadd.f32 1.0, %v5684_v49  ;;  %v808_v51 = vpop.f32.mrf.mxu2  ;;  %v4272_v49 = vld [vmem:[#allocation2 + $0x4c0] sm:$0xf] }
 0x202   :  { %v821_v52 = vpop.f32.mrf.mxu3  ;;  %v5414_v51 = vld [vmem:[#allocation2 + $0x4c4] sm:$0xf]  ;;  %1412 = vmatpush.bf16.msra.mxu0 %v4229_v48 }
 0x203   :  { %5687 = vrcp.f32 %v856_v50  ;;  %v883_v60 = vand.u32 2147483648, %v856_v50  ;;  %v881_v62 = vand.u32 2147483647, %v856_v50  ;;  %vm877_vm11 = vweird.f32 %v856_v50 }
 0x205   :  { %v884_v2 = vor.u32 1.1754944e-38, %v883_v60  ;;  %vm882_vm13 = vcmp.eq.f32.partialorder %v881_v62, 8.507059e+37 }
 0x206   :  { %v5686_v54 = vpop.eup %5685 }
 0x207   :  { %v855_v56 = vadd.f32 1.0, %v5686_v54  ;;  %v4274_v54 = vld [vmem:[#allocation2 + $0x4c8] sm:$0xf0] }
 0x209   :  { %v5688_v57 = vpop.eup %5687  ;;  %5689 = vrcp.f32 %v855_v56  ;;  %v868_v6 = vand.u32 2147483648, %v855_v56  ;;  %v866_v9 = vand.u32 2147483647, %v855_v56  ;;  %vm862_vm15 = vweird.f32 %v855_v56 }
 0x20a   :  { %v873_v58 = vmul.f32 %v5688_v57, %v856_v50  ;;  %vm878_vm10 = vweird.f32 %v5688_v57  ;;  %v5415_v50 = vld [vmem:[#allocation2 + $0x4c4] sm:$0xf0] }
 0x20b   :  { %vm879_vm12 = vmor %vm877_vm11, %vm878_vm10  ;;  %v869_v12 = vor.u32 1.1754944e-38, %v868_v6  ;;  %vm867_vm1 = vcmp.eq.f32.partialorder %v866_v9, 8.507059e+37  ;;  %v4273_v52 = vor.u32 %v5415_v50, %v4272_v49  ;;  %v5399_v6 = vld [vmem:[#allocation2 + $0x444] sm:$0xf0]  ;;  %v4210_v9 = vld [vmem:[#allocation2 + $0x448] sm:$0xf0] }
 0x20c   :  { %v874_v59 = vsub.f32 1.0, %v873_v58  ;;  %v5401_v58 = vld [vmem:[#allocation2 + $0x454] sm:$0xf0]  ;;  %v4184_v50 = vld [vmem:[#allocation2 + $0x410] sm:$0xf] }
 0x20d   :  { %1401 = vmatpush.bf16.msra.mxu3 %v4273_v52  ;;  %v5392_v52 = vld [vmem:[#allocation2 + $0x414] sm:$0xf] }
 0x20e   :  { %v875_v61 = vmul.f32 %v5688_v57, %v874_v59  ;;  %v5400_v59 = vld [vmem:[#allocation2 + $0x454] sm:$0xf] }
 0x20f   :  { %v5690_v63 = vpop.eup %5689 }
 0x210   :  { %v876_v0 = vadd.f32 %v5688_v57, %v875_v61  ;;  %v858_v1 = vmul.f32 %v5690_v63, %v855_v56  ;;  %vm863_vm14 = vweird.f32 %v5690_v63  ;;  %v4277_v56 = vor.u32 %v5414_v51, %v4274_v54  ;;  %v4218_v61 = vld [vmem:[#allocation2 + $0x458] sm:$0xf0]  ;;  %v5393_v51 = vld [vmem:[#allocation2 + $0x414] sm:$0xf0] }
 0x211   :  { %vm864_vm0 = vmor %vm862_vm15, %vm863_vm14  ;;  %v4221_v62 = vor.u32 %v5400_v59, %v4218_v61 }
 0x212   :  { %v880_v3 = vsel %vm879_vm12, %v5688_v57, %v876_v0  ;;  %v859_v4 = vsub.f32 1.0, %v858_v1  ;;  %v4216_v57 = vld [vmem:[#allocation2 + $0x450] sm:$0xf]  ;;  %v5413_v0 = vld [vmem:[#allocation2 + $0x4b4] sm:$0xf0] }
 0x213   :  { %v885_v5 = vsel %vm882_vm13, %v884_v2, %v880_v3  ;;  %v4217_v60 = vor.u32 %v5401_v58, %v4216_v57  ;;  %v5412_v1 = vld [vmem:[#allocation2 + $0x4b4] sm:$0xf]  ;;  %v4266_v3 = vld [vmem:[#allocation2 + $0x4b8] sm:$0xf0]  ;;  %1413 = vmatpush.bf16.msra.mxu0 %v4221_v62  ;;  %v4185_v57 = vor.u32 %v5393_v51, %v4184_v50  ;;  %v4176_v62 = vld [vmem:[#allocation2 + $0x400] sm:$0xf] }
 0x214   :  { %v888_v7 = vmul.f32 %v885_v5, %v846_v28  ;;  %v860_v8 = vmul.f32 %v5690_v63, %v859_v4  ;;  %v4293_v28 = vor.u32 %v5418_v25, %v4290_v27  ;;  %v4269_v4 = vor.u32 %v5412_v1, %v4266_v3  ;;  %v4208_v5 = vld [vmem:[#allocation2 + $0x440] sm:$0xf]  ;;  %v4248_v25 = vld [vmem:[#allocation2 + $0x490] sm:$0xf]  ;;  %v5408_v27 = vld [vmem:[#allocation2 + $0x494] sm:$0xf] }
 0x215   :  { %v4249_v29 = vor.u32 %v5409_v26, %v4248_v25  ;;  %v4253_v31 = vor.u32 %v5408_v27, %v4250_v30  ;;  %v4186_v58 = vld [vmem:[#allocation2 + $0x418] sm:$0xf0]  ;;  %v4178_v3 = vld [vmem:[#allocation2 + $0x408] sm:$0xf0] }
 0x216   :  { %v923_v10 = vpack.c.bf16 %v888_v7, %v888_v7  ;;  %v861_v11 = vadd.f32 %v5690_v63, %v860_v8  ;;  %1425 = vmatpush.bf16.msra.mxu1 %v4293_v28  ;;  %v5398_v7 = vld [vmem:[#allocation2 + $0x444] sm:$0xf]  ;;  %v4209_v8 = vor.u32 %v5399_v6, %v4208_v5  ;;  %v4189_v59 = vor.u32 %v5392_v52, %v4186_v58  ;;  %v4420_v50 = vld [vmem:[#allocation2 + $0x5e8] sm:$0xf0]  ;;  %v4362_v52 = vld [vmem:[#allocation2 + $0x570] sm:$0xf] }
 0x217   :  { %v4364_v58 = vld [vmem:[#allocation2 + $0x578] sm:$0xf0] }
 0x218   :  { %v865_v13 = vsel %vm864_vm0, %v5690_v63, %v861_v11  ;;  %1112 = vmatmul.bf16.vlgmr.msrb.gmra.mxu3 %v923_v10  ;;  %1138 = vmatmul.bf16.vlgmr.msrb.gmra.mxu1 %v923_v10  ;;  %v4264_v63 = vld [vmem:[#allocation2 + $0x4b0] sm:$0xf]  ;;  %v4213_v10 = vor.u32 %v5398_v7, %v4210_v9  ;;  %v4256_v11 = vld [vmem:[#allocation2 + $0x4a0] sm:$0xf] }
 0x219   :  { %v870_v14 = vsel %vm867_vm1, %v869_v12, %v865_v13  ;;  %v4265_v2 = vor.u32 %v5413_v0, %v4264_v63  ;;  %v5411_v12 = vld [vmem:[#allocation2 + $0x4a4] sm:$0xf0]  ;;  %v5410_v13 = vld [vmem:[#allocation2 + $0x4a4] sm:$0xf] }
 0x21a   :  { %v887_v15 = vmul.f32 %v870_v14, %v820_v46  ;;  %v4225_v46 = vor.u32 %v5403_v43, %v4224_v42  ;;  %1426 = vmatpush.bf16.msra.mxu1 %v4285_v41  ;;  %v6016_v14 = vld [vmem:[#allocation4 + $0x4] ss:$8 sm:$0x3]  ;;  %1414 = vmatpush.bf16.msra.mxu0 %v4213_v10  ;;  %v4240_v41 = vld [vmem:[#allocation2 + $0x480] sm:$0xf] }
 0x21b   :  { %1402 = vmatpush.bf16.msra.mxu3 %v4265_v2  ;;  %v928_v28 = vperm.slane %v6016_v14, 1  ;;  %v5407_v42 = vld [vmem:[#allocation2 + $0x484] sm:$0xf0]  ;;  %v5406_v43 = vld [vmem:[#allocation2 + $0x484] sm:$0xf] }
 0x21c   :  { %v922_v16 = vpack.c.bf16 %v887_v15, %v887_v15  ;;  %1386 = vmatpush.bf16.msra.mxu2 %v4225_v46  ;;  %v4257_v15 = vor.u32 %v5411_v12, %v4256_v11  ;;  %v4241_v46 = vor.u32 %v5407_v42, %v4240_v41  ;;  %v4245_v49 = vor.u32 %v5406_v43, %v4242_v47  ;;  %v5391_v63 = vld [vmem:[#allocation2 + $0x404] sm:$0xf0]  ;;  %v5390_v0 = vld [vmem:[#allocation2 + $0x404] sm:$0xf]  ;;  %v5452_v41 = vld [vmem:[#allocation2 + $0x5f4] sm:$0xf] }
 0x21d   :  { %v4177_v2 = vor.u32 %v5391_v63, %v4176_v62  ;;  %v4181_v6 = vor.u32 %v5390_v0, %v4178_v3  ;;  %v4428_v43 = vld [vmem:[#allocation2 + $0x5f8] sm:$0xf0]  ;;  %v5451_v47 = vld [vmem:[#allocation2 + $0x5e4] sm:$0xf0]  ;;  %v5448_v62 = vld [vmem:[#allocation2 + $0x5d4] sm:$0xf] }
 0x21e   :  { %1099 = vmatmul.bf16.vlgmr.msrb.gmra.mxu2 %v922_v16  ;;  %1125 = vmatmul.bf16.vlgmr.msrb.gmra.mxu0 %v922_v16  ;;  %v4258_v16 = vld [vmem:[#allocation2 + $0x4a8] sm:$0xf0]  ;;  %v4412_v0 = vld [vmem:[#allocation2 + $0x5d8] sm:$0xf0]  ;;  %v5435_v3 = vld [vmem:[#allocation2 + $0x564] sm:$0xf0] }
 0x21f   :  { %1427 = vmatpush.bf16.msra.mxu1 %v4277_v56  ;;  %v4261_v18 = vor.u32 %v5410_v13, %v4258_v16  ;;  %1403 = vmatpush.bf16.msra.mxu3 %v4257_v15  ;;  %v927_v56 = vperm.slane %v6016_v14, 0 }
 0x220   :  { %1387 = vmatpush.bf16.msra.mxu2 %v4217_v60  ;;  %1415 = vmatpush.bf16.msra.mxu0 %v4205_v24 }
 0x223   :  { %1428 = vmatpush.bf16.msra.mxu1 %v4269_v4  ;;  %1404 = vmatpush.bf16.msra.mxu3 %v4249_v29 }
 0x224   :  { %1388 = vmatpush.bf16.msra.mxu2 %v4209_v8  ;;  %1416 = vmatpush.bf16.msra.mxu0 %v4197_v40  ;;  %v5453_v40 = vld [vmem:[#allocation2 + $0x5f4] sm:$0xf0] }
 0x227   :  { %1429 = vmatpush.bf16.msra.mxu1 %v4261_v18  ;;  %1405 = vmatpush.bf16.msra.mxu3 %v4241_v46  ;;  %v4418_v46 = vld [vmem:[#allocation2 + $0x5e0] sm:$0xf] }
 0x228   :  { %1389 = vmatpush.bf16.msra.mxu2 %v4201_v22  ;;  %1417 = vmatpush.bf16.msra.mxu0 %v4189_v59 }
 0x22b   :  { %1430 = vmatpush.bf16.msra.mxu1 %v4253_v31 }
 0x22c   :  { %1390 = vmatpush.bf16.msra.mxu2 %v4193_v35  ;;  %1418 = vmatpush.bf16.msra.mxu0 %v4181_v6  ;;  %v4356_v6 = vld [vmem:[#allocation2 + $0x568] sm:$0xf0] }
 0x22f   :  { %1431 = vmatpush.bf16.msra.mxu1 %v4245_v49  ;;  %v4419_v49 = vor.u32 %v5451_v47, %v4418_v46  ;;  %v4332_v47 = vld [vmem:[#allocation2 + $0x538] sm:$0xf0] }
 0x230   :  { %1391 = vmatpush.bf16.msra.mxu2 %v4185_v57 }
 0x234   :  { %1392 = vmatpush.bf16.msra.mxu2 %v4177_v2  ;;  %v4354_v2 = vld [vmem:[#allocation2 + $0x560] sm:$0xf] }
 0x295   :  { %v1139_v17 = vpop.f32.mrf.mxu1 }
 0x29b   :  { %v1113_v37 = vpop.f32.mrf.mxu3  ;;  %v1126_v38 = vpop.f32.mrf.mxu0 }
 0x29c   :  { %v1127_v44 = vadd.f32 %v1126_v38, %v928_v28  ;;  %v4426_v38 = vld [vmem:[#allocation2 + $0x5f0] sm:$0xf] }
 0x29d   :  { %v1141_v48 = vpop.f32.mrf.mxu1  ;;  %v4427_v42 = vor.u32 %v5453_v40, %v4426_v38  ;;  %v4388_v40 = vld [vmem:[#allocation2 + $0x5a8] sm:$0xf0] }
 0x29e   :  { %v1140_v54 = vadd.f32 %v1139_v17, %v1127_v44  ;;  %v4431_v44 = vor.u32 %v5452_v41, %v4428_v43  ;;  %v5450_v48 = vld [vmem:[#allocation2 + $0x5e4] sm:$0xf]  ;;  %v5429_v43 = vld [vmem:[#allocation2 + $0x534] sm:$0xf0] }
 0x29f   :  { %1696 = vmatpush.bf16.msrb.mxu3 %v4427_v42  ;;  %v4423_v51 = vor.u32 %v5450_v48, %v4420_v50  ;;  %v4330_v42 = vld [vmem:[#allocation2 + $0x530] sm:$0xf] }
 0x2a0   :  { %v4173_v60 = vmul.f32 -1.442695, %v1140_v54  ;;  %1722 = vmatpush.bf16.msrb.mxu1 %v4431_v44  ;;  %v5428_v44 = vld [vmem:[#allocation2 + $0x534] sm:$0xf]  ;;  %v4331_v46 = vor.u32 %v5429_v43, %v4330_v42 }
 0x2a1   :  { %v1100_v61 = vpop.f32.mrf.mxu2  ;;  %v4335_v50 = vor.u32 %v5428_v44, %v4332_v47 }
 0x2a2   :  { %5691 = vpow2.f32 %v4173_v60  ;;  %v1101_v1 = vadd.f32 %v1100_v61, %v927_v56  ;;  %v5436_v56 = vld [vmem:[#allocation2 + $0x574] sm:$0xf]  ;;  %v4410_v60 = vld [vmem:[#allocation2 + $0x5d0] sm:$0xf]  ;;  %v5449_v61 = vld [vmem:[#allocation2 + $0x5d4] sm:$0xf0] }
 0x2a3   :  { %v1115_v4 = vpop.f32.mrf.mxu3  ;;  %v1128_v5 = vpop.f32.mrf.mxu0  ;;  %1697 = vmatpush.bf16.msrb.mxu3 %v4419_v49  ;;  %v4367_v59 = vor.u32 %v5436_v56, %v4364_v58  ;;  %v4411_v63 = vor.u32 %v5449_v61, %v4410_v60  ;;  %v4380_v58 = vld [vmem:[#allocation2 + $0x598] sm:$0xf0]  ;;  %v4322_v61 = vld [vmem:[#allocation2 + $0x520] sm:$0xf] }
 0x2a4   :  { %v1114_v7 = vadd.f32 %v1113_v37, %v1101_v1  ;;  %1723 = vmatpush.bf16.msrb.mxu1 %v4423_v51  ;;  %v4415_v1 = vor.u32 %v5448_v62, %v4412_v0  ;;  %v5434_v4 = vld [vmem:[#allocation2 + $0x564] sm:$0xf]  ;;  %v4355_v5 = vor.u32 %v5435_v3, %v4354_v2  ;;  %v4378_v51 = vld [vmem:[#allocation2 + $0x590] sm:$0xf]  ;;  %v5427_v62 = vld [vmem:[#allocation2 + $0x524] sm:$0xf0] }
 0x2a5   :  { %1709 = vmatpush.bf16.msrb.mxu0 %v4367_v59  ;;  %v4323_v2 = vor.u32 %v5427_v62, %v4322_v61  ;;  %v4324_v3 = vld [vmem:[#allocation2 + $0x528] sm:$0xf0] }
 0x2a6   :  { %v4172_v8 = vmul.f32 -1.442695, %v1114_v7 }
 0x2a7   :  { %1698 = vmatpush.bf16.msrb.mxu3 %v4411_v63  ;;  %v5426_v63 = vld [vmem:[#allocation2 + $0x524] sm:$0xf] }
 0x2a8   :  { %v5692_v9 = vpop.eup %5691  ;;  %5693 = vpow2.f32 %v4172_v8  ;;  %1724 = vmatpush.bf16.msrb.mxu1 %v4415_v1  ;;  %v4402_v8 = vld [vmem:[#allocation2 + $0x5c0] sm:$0xf] }
 0x2a9   :  { %v1150_v10 = vadd.f32 1.0, %v5692_v9  ;;  %v1102_v11 = vpop.f32.mrf.mxu2  ;;  %v5447_v9 = vld [vmem:[#allocation2 + $0x5c4] sm:$0xf0] }
 0x2aa   :  { %v4403_v11 = vor.u32 %v5447_v9, %v4402_v8 }
 0x2ab   :  { %5695 = vrcp.f32 %v1150_v10  ;;  %v1177_v17 = vand.u32 2147483648, %v1150_v10  ;;  %v1175_v19 = vand.u32 2147483647, %v1150_v10  ;;  %vm1171_vm3 = vweird.f32 %v1150_v10 }
 0x2ac   :  { %1699 = vmatpush.bf16.msrb.mxu3 %v4403_v11 }
 0x2ad   :  { %v1178_v23 = vor.u32 1.1754944e-38, %v1177_v17  ;;  %vm1176_vm5 = vcmp.eq.f32.partialorder %v1175_v19, 8.507059e+37 }
 0x2ae   :  { %v5694_v12 = vpop.eup %5693 }
 0x2af   :  { %v1149_v13 = vadd.f32 1.0, %v5694_v12  ;;  %v4404_v12 = vld [vmem:[#allocation2 + $0x5c8] sm:$0xf0] }
 0x2b1   :  { %v5696_v14 = vpop.eup %5695  ;;  %5697 = vrcp.f32 %v1149_v13  ;;  %v1162_v27 = vand.u32 2147483648, %v1149_v13  ;;  %v1160_v30 = vand.u32 2147483647, %v1149_v13  ;;  %vm1156_vm7 = vweird.f32 %v1149_v13 }
 0x2b2   :  { %v1167_v15 = vmul.f32 %v5696_v14, %v1150_v10  ;;  %vm1172_vm2 = vweird.f32 %v5696_v14  ;;  %v5446_v10 = vld [vmem:[#allocation2 + $0x5c4] sm:$0xf] }
 0x2b3   :  { %vm1173_vm4 = vmor %vm1171_vm3, %vm1172_vm2  ;;  %v1163_v33 = vor.u32 1.1754944e-38, %v1162_v27  ;;  %vm1161_vm9 = vcmp.eq.f32.partialorder %v1160_v30, 8.507059e+37  ;;  %v5430_v30 = vld [vmem:[#allocation2 + $0x544] sm:$0xf] }
 0x2b4   :  { %v1168_v16 = vsub.f32 1.0, %v1167_v15  ;;  %v5433_v15 = vld [vmem:[#allocation2 + $0x554] sm:$0xf0] }
 0x2b6   :  { %v1169_v18 = vmul.f32 %v5696_v14, %v1168_v16  ;;  %v5432_v16 = vld [vmem:[#allocation2 + $0x554] sm:$0xf] }
 0x2b7   :  { %v5698_v20 = vpop.eup %5697 }
 0x2b8   :  { %v1170_v21 = vadd.f32 %v5696_v14, %v1169_v18  ;;  %v1152_v22 = vmul.f32 %v5698_v20, %v1149_v13  ;;  %vm1157_vm6 = vweird.f32 %v5698_v20  ;;  %v4407_v13 = vor.u32 %v5446_v10, %v4404_v12  ;;  %v4348_v18 = vld [vmem:[#allocation2 + $0x558] sm:$0xf0]  ;;  %v4372_v10 = vld [vmem:[#allocation2 + $0x588] sm:$0xf0] }
 0x2b9   :  { %vm1158_vm8 = vmor %vm1156_vm7, %vm1157_vm6  ;;  %v4351_v19 = vor.u32 %v5432_v16, %v4348_v18  ;;  %v4316_v18 = vld [vmem:[#allocation2 + $0x518] sm:$0xf0] }
 0x2ba   :  { %v1174_v24 = vsel %vm1173_vm4, %v5696_v14, %v1170_v21  ;;  %v1153_v25 = vsub.f32 1.0, %v1152_v22  ;;  %v4346_v14 = vld [vmem:[#allocation2 + $0x550] sm:$0xf]  ;;  %1725 = vmatpush.bf16.msrb.mxu1 %v4407_v13  ;;  %v5445_v21 = vld [vmem:[#allocation2 + $0x5b4] sm:$0xf0] }
 0x2bb   :  { %v1179_v26 = vsel %vm1176_vm5, %v1178_v23, %v1174_v24  ;;  %v4347_v17 = vor.u32 %v5433_v15, %v4346_v14  ;;  %v5444_v22 = vld [vmem:[#allocation2 + $0x5b4] sm:$0xf]  ;;  %v6020_v23 = vld [vmem:[#allocation4 + $0x5] ss:$8 sm:$0x3] }
 0x2bc   :  { %v1182_v28 = vmul.f32 %v1179_v26, %v1140_v54  ;;  %v1154_v29 = vmul.f32 %v5698_v20, %v1153_v25  ;;  %v5437_v54 = vld [vmem:[#allocation2 + $0x574] sm:$0xf0]  ;;  %v4396_v25 = vld [vmem:[#allocation2 + $0x5b8] sm:$0xf0]  ;;  %v1221_v1 = vperm.slane %v6020_v23, 0 }
 0x2bd   :  { %v4363_v57 = vor.u32 %v5437_v54, %v4362_v52  ;;  %v4399_v27 = vor.u32 %v5444_v22, %v4396_v25  ;;  %v5441_v52 = vld [vmem:[#allocation2 + $0x594] sm:$0xf0]  ;;  %v5440_v54 = vld [vmem:[#allocation2 + $0x594] sm:$0xf]  ;;  %v4314_v13 = vld [vmem:[#allocation2 + $0x510] sm:$0xf] }
 0x2be   :  { %v1217_v31 = vpack.c.bf16 %v1182_v28, %v1182_v28  ;;  %v1155_v32 = vadd.f32 %v5698_v20, %v1154_v29  ;;  %v4338_v28 = vld [vmem:[#allocation2 + $0x540] sm:$0xf]  ;;  %v5431_v29 = vld [vmem:[#allocation2 + $0x544] sm:$0xf0]  ;;  %v4383_v60 = vor.u32 %v5440_v54, %v4380_v58  ;;  %v5425_v14 = vld [vmem:[#allocation2 + $0x514] sm:$0xf0] }
 0x2bf   :  { %1683 = vmatpush.bf16.msrb.mxu2 %v4363_v57  ;;  %1726 = vmatpush.bf16.msrb.mxu1 %v4399_v27  ;;  %v4379_v57 = vor.u32 %v5441_v52, %v4378_v51  ;;  %v5424_v15 = vld [vmem:[#allocation2 + $0x514] sm:$0xf]  ;;  %v5422_v25 = vld [vmem:[#allocation2 + $0x504] sm:$0xf] }
 0x2c0   :  { %v1159_v34 = vsel %vm1158_vm8, %v5698_v20, %v1155_v32  ;;  %1406 = vmatmul.bf16.vlgmr.msra.gmra.mxu3 %v1217_v31  ;;  %1432 = vmatmul.bf16.vlgmr.msra.gmra.mxu1 %v1217_v31  ;;  %v4394_v20 = vld [vmem:[#allocation2 + $0x5b0] sm:$0xf]  ;;  %v4339_v31 = vor.u32 %v5431_v29, %v4338_v28  ;;  %v4340_v32 = vld [vmem:[#allocation2 + $0x548] sm:$0xf0] }
 0x2c1   :  { %v1164_v35 = vsel %vm1161_vm9, %v1163_v33, %v1159_v34  ;;  %v4395_v24 = vor.u32 %v5445_v21, %v4394_v20  ;;  %v4343_v33 = vor.u32 %v5430_v30, %v4340_v32  ;;  %v4386_v34 = vld [vmem:[#allocation2 + $0x5a0] sm:$0xf]  ;;  %v4319_v21 = vor.u32 %v5424_v15, %v4316_v18  ;;  %v4308_v28 = vld [vmem:[#allocation2 + $0x508] sm:$0xf0]  ;;  %v5468_v15 = vld [vmem:[#allocation2 + $0x674] sm:$0xf] }
 0x2c2   :  { %v1181_v36 = vmul.f32 %v1164_v35, %v1114_v7  ;;  %v4359_v7 = vor.u32 %v5434_v4, %v4356_v6  ;;  %v5443_v35 = vld [vmem:[#allocation2 + $0x5a4] sm:$0xf0]  ;;  %v4327_v4 = vor.u32 %v5426_v63, %v4324_v3  ;;  %v4311_v29 = vor.u32 %v5422_v25, %v4308_v28  ;;  %v5485_v3 = vld [vmem:[#allocation2 + $0x6f4] sm:$0xf0]  ;;  %v4484_v25 = vld [vmem:[#allocation2 + $0x660] sm:$0xf] }
 0x2c3   :  { %1684 = vmatpush.bf16.msrb.mxu2 %v4355_v5  ;;  %1700 = vmatpush.bf16.msrb.mxu3 %v4395_v24  ;;  %v4387_v38 = vor.u32 %v5443_v35, %v4386_v34  ;;  %v4370_v5 = vld [vmem:[#allocation2 + $0x580] sm:$0xf]  ;;  %v5439_v6 = vld [vmem:[#allocation2 + $0x584] sm:$0xf0] }
 0x2c4   :  { %v1216_v37 = vpack.c.bf16 %v1181_v36, %v1181_v36  ;;  %1710 = vmatpush.bf16.msrb.mxu0 %v4359_v7  ;;  %v5442_v36 = vld [vmem:[#allocation2 + $0x5a4] sm:$0xf]  ;;  %v4371_v9 = vor.u32 %v5439_v6, %v4370_v5  ;;  %v5423_v24 = vld [vmem:[#allocation2 + $0x504] sm:$0xf0]  ;;  %v4558_v6 = vld [vmem:[#allocation2 + $0x6f8] sm:$0xf0] }
 0x2c5   :  { %v4391_v41 = vor.u32 %v5442_v36, %v4388_v40  ;;  %v5438_v7 = vld [vmem:[#allocation2 + $0x584] sm:$0xf] }
 0x2c6   :  { %1393 = vmatmul.bf16.vlgmr.msra.gmra.mxu2 %v1216_v37  ;;  %1419 = vmatmul.bf16.vlgmr.msra.gmra.mxu0 %v1216_v37  ;;  %v1222_v37 = vperm.slane %v6020_v23, 1  ;;  %v4375_v12 = vor.u32 %v5438_v7, %v4372_v10  ;;  %v4306_v23 = vld [vmem:[#allocation2 + $0x500] sm:$0xf] }
 0x2c7   :  { %1685 = vmatpush.bf16.msrb.mxu2 %v4347_v17  ;;  %1701 = vmatpush.bf16.msrb.mxu3 %v4387_v38  ;;  %v4315_v17 = vor.u32 %v5425_v14, %v4314_v13  ;;  %v4307_v27 = vor.u32 %v5423_v24, %v4306_v23  ;;  %v4492_v13 = vld [vmem:[#allocation2 + $0x670] sm:$0xf]  ;;  %v5469_v14 = vld [vmem:[#allocation2 + $0x674] sm:$0xf0]  ;;  %v4542_v23 = vld [vmem:[#allocation2 + $0x6d8] sm:$0xf0] }
 0x2c8   :  { %1711 = vmatpush.bf16.msrb.mxu0 %v4351_v19  ;;  %1727 = vmatpush.bf16.msrb.mxu1 %v4391_v41 }
 0x2cb   :  { %1686 = vmatpush.bf16.msrb.mxu2 %v4339_v31  ;;  %1702 = vmatpush.bf16.msrb.mxu3 %v4379_v57 }
 0x2cc   :  { %1712 = vmatpush.bf16.msrb.mxu0 %v4343_v33  ;;  %1728 = vmatpush.bf16.msrb.mxu1 %v4383_v60 }
 0x2cf   :  { %1687 = vmatpush.bf16.msrb.mxu2 %v4331_v46  ;;  %1703 = vmatpush.bf16.msrb.mxu3 %v4371_v9  ;;  %v5483_v9 = vld [vmem:[#allocation2 + $0x6e4] sm:$0xf0] }
 0x2d0   :  { %1713 = vmatpush.bf16.msrb.mxu0 %v4335_v50  ;;  %1729 = vmatpush.bf16.msrb.mxu1 %v4375_v12 }
 0x2d3   :  { %1688 = vmatpush.bf16.msrb.mxu2 %v4323_v2  ;;  %v4556_v2 = vld [vmem:[#allocation2 + $0x6f0] sm:$0xf] }
 0x2d4   :  { %1714 = vmatpush.bf16.msrb.mxu0 %v4327_v4  ;;  %v5484_v4 = vld [vmem:[#allocation2 + $0x6f4] sm:$0xf]  ;;  %v4557_v5 = vor.u32 %v5485_v3, %v4556_v2 }
 0x2d5   :  { %v4561_v7 = vor.u32 %v5484_v4, %v4558_v6  ;;  %v4460_v4 = vld [vmem:[#allocation2 + $0x630] sm:$0xf]  ;;  %v5460_v6 = vld [vmem:[#allocation2 + $0x634] sm:$0xf] }
 0x2d6   :  { %1990 = vmatpush.bf16.msra.mxu3 %v4557_v5  ;;  %v5461_v5 = vld [vmem:[#allocation2 + $0x634] sm:$0xf0] }
 0x2d7   :  { %1689 = vmatpush.bf16.msrb.mxu2 %v4315_v17  ;;  %2016 = vmatpush.bf16.msra.mxu1 %v4561_v7  ;;  %v4494_v17 = vld [vmem:[#allocation2 + $0x678] sm:$0xf0]  ;;  %v4461_v7 = vor.u32 %v5461_v5, %v4460_v4 }
 0x2d8   :  { %1715 = vmatpush.bf16.msrb.mxu0 %v4319_v21  ;;  %v4497_v18 = vor.u32 %v5468_v15, %v4494_v17  ;;  %v5480_v21 = vld [vmem:[#allocation2 + $0x6d4] sm:$0xf]  ;;  %v5459_v17 = vld [vmem:[#allocation2 + $0x624] sm:$0xf0] }
 0x2d9   :  { %v4545_v24 = vor.u32 %v5480_v21, %v4542_v23 }
 0x2db   :  { %1690 = vmatpush.bf16.msrb.mxu2 %v4307_v27  ;;  %v5466_v27 = vld [vmem:[#allocation2 + $0x664] sm:$0xf] }
 0x2dc   :  { %1716 = vmatpush.bf16.msrb.mxu0 %v4311_v29  ;;  %v4486_v29 = vld [vmem:[#allocation2 + $0x668] sm:$0xf0] }
 0x2e0   :  { %2003 = vmatpush.bf16.msra.mxu0 %v4497_v18  ;;  %v5458_v18 = vld [vmem:[#allocation2 + $0x624] sm:$0xf] }
 0x33d   :  { %v1433_v26 = vpop.f32.mrf.mxu1 }
 0x343   :  { %v1407_v48 = vpop.f32.mrf.mxu3  ;;  %v1420_v49 = vpop.f32.mrf.mxu0 }
 0x344   :  { %v1421_v56 = vadd.f32 %v1420_v49, %v1222_v37 }
 0x345   :  { %v1435_v59 = vpop.f32.mrf.mxu1 }
 0x346   :  { %v6023_v0 = vadd.f32 %v1433_v26, %v1421_v56 }
 0x348   :  { %v4303_v8 = vmul.f32 -1.442695, %v6023_v0 }
 0x349   :  { %v1394_v11 = vpop.f32.mrf.mxu2 }
 0x34a   :  { %5699 = vpow2.f32 %v4303_v8  ;;  %v1395_v16 = vadd.f32 %v1394_v11, %v1221_v1  ;;  %v4548_v8 = vld [vmem:[#allocation2 + $0x6e0] sm:$0xf]  ;;  %v4550_v11 = vld [vmem:[#allocation2 + $0x6e8] sm:$0xf0] }
 0x34b   :  { %v1409_v19 = vpop.f32.mrf.mxu3  ;;  %v1422_v20 = vpop.f32.mrf.mxu0  ;;  %v4549_v10 = vor.u32 %v5483_v9, %v4548_v8  ;;  %v4462_v8 = vld [vmem:[#allocation2 + $0x638] sm:$0xf0] }
 0x34c   :  { %v1408_v22 = vadd.f32 %v1407_v48, %v1395_v16  ;;  %v4493_v16 = vor.u32 %v5469_v14, %v4492_v13  ;;  %v4540_v19 = vld [vmem:[#allocation2 + $0x6d0] sm:$0xf]  ;;  %v5481_v20 = vld [vmem:[#allocation2 + $0x6d4] sm:$0xf0]  ;;  %v4465_v9 = vor.u32 %v5460_v6, %v4462_v8  ;;  %v4510_v14 = vld [vmem:[#allocation2 + $0x698] sm:$0xf0] }
 0x34d   :  { %1991 = vmatpush.bf16.msra.mxu3 %v4549_v10  ;;  %v5473_v10 = vld [vmem:[#allocation2 + $0x694] sm:$0xf0] }
 0x34e   :  { %v4302_v26 = vmul.f32 -1.442695, %v1408_v22  ;;  %1977 = vmatpush.bf16.msra.mxu2 %v4493_v16  ;;  %v4452_v16 = vld [vmem:[#allocation2 + $0x620] sm:$0xf] }
 0x350   :  { %v5700_v30 = vpop.eup %5699  ;;  %5701 = vpow2.f32 %v4302_v26  ;;  %v5467_v26 = vld [vmem:[#allocation2 + $0x664] sm:$0xf0] }
 0x351   :  { %v1444_v31 = vadd.f32 1.0, %v5700_v30  ;;  %v1396_v32 = vpop.f32.mrf.mxu2  ;;  %v4485_v28 = vor.u32 %v5467_v26, %v4484_v25  ;;  %v4489_v30 = vor.u32 %v5466_v27, %v4486_v29  ;;  %v5471_v25 = vld [vmem:[#allocation2 + $0x684] sm:$0xf0]  ;;  %v5470_v26 = vld [vmem:[#allocation2 + $0x684] sm:$0xf] }
 0x352   :  { %v5479_v32 = vld [vmem:[#allocation2 + $0x6c4] sm:$0xf0]  ;;  %v4502_v29 = vld [vmem:[#allocation2 + $0x688] sm:$0xf0] }
 0x353   :  { %5703 = vrcp.f32 %v1444_v31  ;;  %v1471_v38 = vand.u32 2147483648, %v1444_v31  ;;  %v1469_v41 = vand.u32 2147483647, %v1444_v31  ;;  %vm1465_vm11 = vweird.f32 %v1444_v31  ;;  %1978 = vmatpush.bf16.msra.mxu2 %v4485_v28  ;;  %2004 = vmatpush.bf16.msra.mxu0 %v4489_v30 }
 0x355   :  { %v1472_v46 = vor.u32 1.1754944e-38, %v1471_v38  ;;  %vm1470_vm13 = vcmp.eq.f32.partialorder %v1469_v41, 8.507059e+37  ;;  %v5465_v38 = vld [vmem:[#allocation2 + $0x654] sm:$0xf0] }
 0x356   :  { %v5702_v33 = vpop.eup %5701 }
 0x357   :  { %v1443_v34 = vadd.f32 1.0, %v5702_v33  ;;  %v5478_v33 = vld [vmem:[#allocation2 + $0x6c4] sm:$0xf] }
 0x359   :  { %v5704_v35 = vpop.eup %5703  ;;  %5705 = vrcp.f32 %v1443_v34  ;;  %v1456_v50 = vand.u32 2147483648, %v1443_v34  ;;  %v1454_v54 = vand.u32 2147483647, %v1443_v34  ;;  %vm1450_vm15 = vweird.f32 %v1443_v34 }
 0x35a   :  { %v1461_v36 = vmul.f32 %v5704_v35, %v1444_v31  ;;  %vm1466_vm10 = vweird.f32 %v5704_v35  ;;  %v4532_v31 = vld [vmem:[#allocation2 + $0x6c0] sm:$0xf] }
 0x35b   :  { %vm1467_vm12 = vmor %vm1465_vm11, %vm1466_vm10  ;;  %v1457_v58 = vor.u32 1.1754944e-38, %v1456_v50  ;;  %vm1455_vm1 = vcmp.eq.f32.partialorder %v1454_v54, 8.507059e+37  ;;  %v5462_v54 = vld [vmem:[#allocation2 + $0x644] sm:$0xf] }
 0x35c   :  { %v1462_v37 = vsub.f32 1.0, %v1461_v36 }
 0x35e   :  { %v1463_v40 = vmul.f32 %v5704_v35, %v1462_v37  ;;  %v4476_v37 = vld [vmem:[#allocation2 + $0x650] sm:$0xf] }
 0x35f   :  { %v5706_v42 = vpop.eup %5705  ;;  %v4477_v41 = vor.u32 %v5465_v38, %v4476_v37  ;;  %v4446_v38 = vld [vmem:[#allocation2 + $0x618] sm:$0xf0] }
 0x360   :  { %v1464_v43 = vadd.f32 %v5704_v35, %v1463_v40  ;;  %v1446_v44 = vmul.f32 %v5706_v42, %v1443_v34  ;;  %vm1451_vm14 = vweird.f32 %v5706_v42  ;;  %v4533_v34 = vor.u32 %v5479_v32, %v4532_v31  ;;  %v5464_v40 = vld [vmem:[#allocation2 + $0x654] sm:$0xf]  ;;  %v4444_v32 = vld [vmem:[#allocation2 + $0x610] sm:$0xf] }
 0x361   :  { %vm1452_vm0 = vmor %vm1450_vm15, %vm1451_vm14  ;;  %1979 = vmatpush.bf16.msra.mxu2 %v4477_v41  ;;  %v4505_v31 = vor.u32 %v5470_v26, %v4502_v29  ;;  %v4688_v26 = vld [vmem:[#allocation2 + $0x7f8] sm:$0xf0]  ;;  %v5515_v29 = vld [vmem:[#allocation2 + $0x7e4] sm:$0xf0] }
 0x362   :  { %v1468_v47 = vsel %vm1467_vm12, %v5704_v35, %v1464_v43  ;;  %v1447_v48 = vsub.f32 1.0, %v1446_v44  ;;  %v4534_v35 = vld [vmem:[#allocation2 + $0x6c8] sm:$0xf0]  ;;  %v4524_v44 = vld [vmem:[#allocation2 + $0x6b0] sm:$0xf] }
 0x363   :  { %v1473_v49 = vsel %vm1470_vm13, %v1472_v46, %v1468_v47  ;;  %v4537_v36 = vor.u32 %v5478_v33, %v4534_v35  ;;  %v5477_v46 = vld [vmem:[#allocation2 + $0x6b4] sm:$0xf0]  ;;  %v5476_v47 = vld [vmem:[#allocation2 + $0x6b4] sm:$0xf] }
 0x364   :  { %v1476_v51 = vmul.f32 %v1473_v49, %v6023_v0  ;;  %v1448_v52 = vmul.f32 %v5706_v42, %v1447_v48  ;;  %v4525_v48 = vor.u32 %v5477_v46, %v4524_v44  ;;  %v4526_v49 = vld [vmem:[#allocation2 + $0x6b8] sm:$0xf0]  ;;  %v5457_v33 = vld [vmem:[#allocation2 + $0x614] sm:$0xf0]  ;;  %v5455_v44 = vld [vmem:[#allocation2 + $0x604] sm:$0xf0] }
 0x365   :  { %v4529_v50 = vor.u32 %v5476_v47, %v4526_v49  ;;  %v4445_v37 = vor.u32 %v5457_v33, %v4444_v32  ;;  %v5454_v46 = vld [vmem:[#allocation2 + $0x604] sm:$0xf]  ;;  %v4438_v49 = vld [vmem:[#allocation2 + $0x608] sm:$0xf0] }
 0x366   :  { %v1478_v56 = vadd.f32 %v1476_v51, %v6010_v55  ;;  %v1449_v57 = vadd.f32 %v5706_v42, %v1448_v52  ;;  %v4468_v51 = vld [vmem:[#allocation2 + $0x640] sm:$0xf]  ;;  %v5463_v52 = vld [vmem:[#allocation2 + $0x644] sm:$0xf0]  ;;  %v4680_v32 = vld [vmem:[#allocation2 + $0x7e8] sm:$0xf0] }
 0x368   :  { %v6029_v59 = vmul.f32 0.70710677, %v1478_v56  ;;  %v1453_v60 = vsel %vm1452_vm0, %v5706_v42, %v1449_v57  ;;  %v4478_v42 = vld [vmem:[#allocation2 + $0x658] sm:$0xf0]  ;;  %v4469_v56 = vor.u32 %v5463_v52, %v4468_v51  ;;  %v4470_v57 = vld [vmem:[#allocation2 + $0x648] sm:$0xf0]  ;;  %v4441_v52 = vor.u32 %v5454_v46, %v4438_v49 }
 0x369   :  { %v1458_v61 = vsel %vm1455_vm1, %v1457_v58, %v1453_v60  ;;  %v4481_v43 = vor.u32 %v5464_v40, %v4478_v42  ;;  %v4473_v58 = vor.u32 %v5462_v54, %v4470_v57  ;;  %v4516_v60 = vld [vmem:[#allocation2 + $0x6a0] sm:$0xf]  ;;  %v4672_v46 = vld [vmem:[#allocation2 + $0x7d8] sm:$0xf0]  ;;  %v5499_v49 = vld [vmem:[#allocation2 + $0x764] sm:$0xf0] }
 0x36a   :  { %v1475_v62 = vmul.f32 %v1458_v61, %v1408_v22  ;;  %v1515_v63 = vpack.c.bf16 %v6029_v59, %v6029_v59  ;;  %v4541_v22 = vor.u32 %v5481_v20, %v4540_v19  ;;  %v5475_v61 = vld [vmem:[#allocation2 + $0x6a4] sm:$0xf0]  ;;  %1980 = vmatpush.bf16.msra.mxu2 %v4469_v56  ;;  %v4453_v19 = vor.u32 %v5459_v17, %v4452_v16  ;;  %v4454_v20 = vld [vmem:[#allocation2 + $0x628] sm:$0xf0] }
 0x36b   :  { %2005 = vmatpush.bf16.msra.mxu0 %v4481_v43  ;;  %v4457_v23 = vor.u32 %v5458_v18, %v4454_v20  ;;  %v4436_v43 = vld [vmem:[#allocation2 + $0x600] sm:$0xf] }
 0x36c   :  { %v1477_v0 = vadd.f32 %v1475_v62, %v6008_v53  ;;  %1704 = vmatmul.bf16.vlgmr.msrb.gmra.mxu3 %v1515_v63  ;;  %1730 = vmatmul.bf16.vlgmr.msrb.gmra.mxu1 %v1515_v63  ;;  %v5482_v53 = vld [vmem:[#allocation2 + $0x6e4] sm:$0xf] }
 0x36d   :  { %v4553_v12 = vor.u32 %v5482_v53, %v4550_v11  ;;  %1992 = vmatpush.bf16.msra.mxu3 %v4541_v22  ;;  %v5474_v62 = vld [vmem:[#allocation2 + $0x6a4] sm:$0xf]  ;;  %v4508_v53 = vld [vmem:[#allocation2 + $0x690] sm:$0xf]  ;;  %v5472_v11 = vld [vmem:[#allocation2 + $0x694] sm:$0xf] }
 0x36e   :  { %v6034_v1 = vmul.f32 0.70710677, %v1477_v0  ;;  %v6038_v63 = vld [vmem:[#allocation4 + $0x6] ss:$8 sm:$0x3]  ;;  %v4517_v0 = vor.u32 %v5475_v61, %v4516_v60  ;;  %1981 = vmatpush.bf16.msra.mxu2 %v4461_v7  ;;  %v4509_v13 = vor.u32 %v5473_v10, %v4508_v53  ;;  %v4513_v15 = vor.u32 %v5472_v11, %v4510_v14 }
 0x36f   :  { %2017 = vmatpush.bf16.msra.mxu1 %v4553_v12  ;;  %2006 = vmatpush.bf16.msra.mxu0 %v4473_v58  ;;  %v1520_v12 = vperm.slane %v6038_v63, 1 }
 0x370   :  { %v1514_v55 = vpack.c.bf16 %v6034_v1, %v6034_v1 }
 0x371   :  { %1993 = vmatpush.bf16.msra.mxu3 %v4533_v34  ;;  %v5456_v34 = vld [vmem:[#allocation2 + $0x614] sm:$0xf] }
 0x372   :  { %1691 = vmatmul.bf16.vlgmr.msrb.gmra.mxu2 %v1514_v55  ;;  %1717 = vmatmul.bf16.vlgmr.msrb.gmra.mxu0 %v1514_v55  ;;  %v4518_v55 = vld [vmem:[#allocation2 + $0x6a8] sm:$0xf0]  ;;  %v4449_v40 = vor.u32 %v5456_v34, %v4446_v38  ;;  %v4622_v34 = vld [vmem:[#allocation2 + $0x770] sm:$0xf]  ;;  %v4624_v38 = vld [vmem:[#allocation2 + $0x778] sm:$0xf0] }
 0x373   :  { %2018 = vmatpush.bf16.msra.mxu1 %v4545_v24  ;;  %v4521_v3 = vor.u32 %v5474_v62, %v4518_v55  ;;  %2007 = vmatpush.bf16.msra.mxu0 %v4465_v9  ;;  %v4500_v24 = vld [vmem:[#allocation2 + $0x680] sm:$0xf] }
 0x374   :  { %1982 = vmatpush.bf16.msra.mxu2 %v4453_v19  ;;  %v4501_v28 = vor.u32 %v5471_v25, %v4500_v24  ;;  %v5516_v24 = vld [vmem:[#allocation2 + $0x7f4] sm:$0xf] }
 0x375   :  { %1994 = vmatpush.bf16.msra.mxu3 %v4525_v48  ;;  %v4437_v48 = vor.u32 %v5455_v44, %v4436_v43  ;;  %v5512_v43 = vld [vmem:[#allocation2 + $0x7d4] sm:$0xf] }
 0x377   :  { %2019 = vmatpush.bf16.msra.mxu1 %v4537_v36  ;;  %2008 = vmatpush.bf16.msra.mxu0 %v4457_v23  ;;  %v1519_v36 = vperm.slane %v6038_v63, 0  ;;  %v5517_v23 = vld [vmem:[#allocation2 + $0x7f4] sm:$0xf0] }
 0x378   :  { %1983 = vmatpush.bf16.msra.mxu2 %v4445_v37 }
 0x379   :  { %1995 = vmatpush.bf16.msra.mxu3 %v4517_v0 }
 0x37b   :  { %2020 = vmatpush.bf16.msra.mxu1 %v4529_v50  ;;  %2009 = vmatpush.bf16.msra.mxu0 %v4449_v40 }
 0x37c   :  { %1984 = vmatpush.bf16.msra.mxu2 %v4437_v48  ;;  %v4614_v48 = vld [vmem:[#allocation2 + $0x760] sm:$0xf] }
 0x37d   :  { %1996 = vmatpush.bf16.msra.mxu3 %v4509_v13 }
 0x37f   :  { %2021 = vmatpush.bf16.msra.mxu1 %v4521_v3  ;;  %2010 = vmatpush.bf16.msra.mxu0 %v4441_v52  ;;  %v4616_v52 = vld [vmem:[#allocation2 + $0x768] sm:$0xf0] }
 0x381   :  { %1997 = vmatpush.bf16.msra.mxu3 %v4501_v28  ;;  %v4678_v28 = vld [vmem:[#allocation2 + $0x7e0] sm:$0xf] }
 0x383   :  { %2022 = vmatpush.bf16.msra.mxu1 %v4513_v15 }
 0x387   :  { %2023 = vmatpush.bf16.msra.mxu1 %v4505_v31  ;;  %v4679_v31 = vor.u32 %v5515_v29, %v4678_v28  ;;  %v4592_v28 = vld [vmem:[#allocation2 + $0x738] sm:$0xf0] }
 0x3e9   :  { %v1731_v2 = vpop.f32.mrf.mxu1 }
 0x3ef   :  { %v1705_v21 = vpop.f32.mrf.mxu3  ;;  %v1718_v22 = vpop.f32.mrf.mxu0 }
 0x3f0   :  { %v1719_v27 = vadd.f32 %v1718_v22, %v1520_v12  ;;  %v4686_v22 = vld [vmem:[#allocation2 + $0x7f0] sm:$0xf] }
 0x3f1   :  { %v1733_v30 = vpop.f32.mrf.mxu1  ;;  %v4687_v25 = vor.u32 %v5517_v23, %v4686_v22 }
 0x3f2   :  { %v1732_v35 = vadd.f32 %v1731_v2, %v1719_v27  ;;  %v4691_v27 = vor.u32 %v5516_v24, %v4688_v26  ;;  %v5514_v30 = vld [vmem:[#allocation2 + $0x7e4] sm:$0xf]  ;;  %v4590_v24 = vld [vmem:[#allocation2 + $0x730] sm:$0xf]  ;;  %v5492_v26 = vld [vmem:[#allocation2 + $0x734] sm:$0xf] }
 0x3f3   :  { %2284 = vmatpush.bf16.msrb.mxu3 %v4687_v25  ;;  %v4683_v33 = vor.u32 %v5514_v30, %v4680_v32  ;;  %v5493_v25 = vld [vmem:[#allocation2 + $0x734] sm:$0xf0]  ;;  %v4595_v29 = vor.u32 %v5492_v26, %v4592_v28  ;;  %v4638_v30 = vld [vmem:[#allocation2 + $0x790] sm:$0xf]  ;;  %v5504_v32 = vld [vmem:[#allocation2 + $0x794] sm:$0xf] }
 0x3f4   :  { %v4433_v41 = vmul.f32 -1.442695, %v1732_v35  ;;  %2310 = vmatpush.bf16.msrb.mxu1 %v4691_v27  ;;  %v4591_v27 = vor.u32 %v5493_v25, %v4590_v24 }
 0x3f5   :  { %v1692_v42 = vpop.f32.mrf.mxu2 }
 0x3f6   :  { %5707 = vpow2.f32 %v4433_v41  ;;  %v1693_v47 = vadd.f32 %v1692_v42, %v1519_v36  ;;  %v5500_v36 = vld [vmem:[#allocation2 + $0x774] sm:$0xf]  ;;  %v4670_v41 = vld [vmem:[#allocation2 + $0x7d0] sm:$0xf]  ;;  %v5513_v42 = vld [vmem:[#allocation2 + $0x7d4] sm:$0xf0] }
 0x3f7   :  { %v1707_v50 = vpop.f32.mrf.mxu3  ;;  %v1720_v51 = vpop.f32.mrf.mxu0  ;;  %2285 = vmatpush.bf16.msrb.mxu3 %v4679_v31  ;;  %v4627_v40 = vor.u32 %v5500_v36, %v4624_v38  ;;  %v4671_v44 = vor.u32 %v5513_v42, %v4670_v41  ;;  %v5505_v31 = vld [vmem:[#allocation2 + $0x794] sm:$0xf0]  ;;  %v5491_v38 = vld [vmem:[#allocation2 + $0x724] sm:$0xf0]  ;;  %v4584_v42 = vld [vmem:[#allocation2 + $0x728] sm:$0xf0] }
 0x3f8   :  { %v1706_v54 = vadd.f32 %v1705_v21, %v1693_v47  ;;  %2311 = vmatpush.bf16.msrb.mxu1 %v4683_v33  ;;  %v4675_v47 = vor.u32 %v5512_v43, %v4672_v46  ;;  %v5498_v50 = vld [vmem:[#allocation2 + $0x764] sm:$0xf]  ;;  %v4615_v51 = vor.u32 %v5499_v49, %v4614_v48  ;;  %v5503_v48 = vld [vmem:[#allocation2 + $0x784] sm:$0xf0] }
 0x3f9   :  { %2297 = vmatpush.bf16.msrb.mxu0 %v4627_v40  ;;  %v5490_v40 = vld [vmem:[#allocation2 + $0x724] sm:$0xf] }
 0x3fa   :  { %v4432_v56 = vmul.f32 -1.442695, %v1706_v54  ;;  %v4587_v46 = vor.u32 %v5490_v40, %v4584_v42  ;;  %v5502_v49 = vld [vmem:[#allocation2 + $0x784] sm:$0xf] }
 0x3fb   :  { %2286 = vmatpush.bf16.msrb.mxu3 %v4671_v44 }
 0x3fc   :  { %v5708_v57 = vpop.eup %5707  ;;  %5709 = vpow2.f32 %v4432_v56  ;;  %2312 = vmatpush.bf16.msrb.mxu1 %v4675_v47  ;;  %v4662_v56 = vld [vmem:[#allocation2 + $0x7c0] sm:$0xf] }
 0x3fd   :  { %v1742_v58 = vadd.f32 1.0, %v5708_v57  ;;  %v1694_v60 = vpop.f32.mrf.mxu2  ;;  %v5511_v57 = vld [vmem:[#allocation2 + $0x7c4] sm:$0xf0]  ;;  %v4630_v47 = vld [vmem:[#allocation2 + $0x780] sm:$0xf] }
 0x3fe   :  { %v4663_v60 = vor.u32 %v5511_v57, %v4662_v56  ;;  %v4574_v57 = vld [vmem:[#allocation2 + $0x710] sm:$0xf] }
 0x3ff   :  { %5711 = vrcp.f32 %v1742_v58  ;;  %v1769_v2 = vand.u32 2147483648, %v1742_v58  ;;  %v1767_v4 = vand.u32 2147483647, %v1742_v58  ;;  %vm1763_vm3 = vweird.f32 %v1742_v58 }
 0x400   :  { %2287 = vmatpush.bf16.msrb.mxu3 %v4663_v60  ;;  %v5488_v60 = vld [vmem:[#allocation2 + $0x714] sm:$0xf] }
 0x401   :  { %v1770_v8 = vor.u32 1.1754944e-38, %v1769_v2  ;;  %vm1768_vm5 = vcmp.eq.f32.partialorder %v1767_v4, 8.507059e+37 }
 0x402   :  { %v5710_v61 = vpop.eup %5709 }
 0x403   :  { %v1741_v62 = vadd.f32 1.0, %v5710_v61  ;;  %v4664_v61 = vld [vmem:[#allocation2 + $0x7c8] sm:$0xf0] }
 0x405   :  { %v5712_v63 = vpop.eup %5711  ;;  %5713 = vrcp.f32 %v1741_v62  ;;  %v1754_v11 = vand.u32 2147483648, %v1741_v62  ;;  %v1752_v14 = vand.u32 2147483647, %v1741_v62  ;;  %vm1748_vm7 = vweird.f32 %v1741_v62 }
 0x406   :  { %v1759_v0 = vmul.f32 %v5712_v63, %v1742_v58  ;;  %vm1764_vm2 = vweird.f32 %v5712_v63  ;;  %v5510_v58 = vld [vmem:[#allocation2 + $0x7c4] sm:$0xf] }
 0x407   :  { %vm1765_vm4 = vmor %vm1763_vm3, %vm1764_vm2  ;;  %v1755_v17 = vor.u32 1.1754944e-38, %v1754_v11  ;;  %vm1753_vm9 = vcmp.eq.f32.partialorder %v1752_v14, 8.507059e+37  ;;  %v5495_v11 = vld [vmem:[#allocation2 + $0x744] sm:$0xf0]  ;;  %v4600_v14 = vld [vmem:[#allocation2 + $0x748] sm:$0xf0] }
 0x408   :  { %v1760_v55 = vsub.f32 1.0, %v1759_v0  ;;  %v5497_v0 = vld [vmem:[#allocation2 + $0x754] sm:$0xf0] }
 0x40a   :  { %v1761_v3 = vmul.f32 %v5712_v63, %v1760_v55  ;;  %v5496_v55 = vld [vmem:[#allocation2 + $0x754] sm:$0xf] }
 0x40b   :  { %v5714_v5 = vpop.eup %5713 }
 0x40c   :  { %v1762_v6 = vadd.f32 %v5712_v63, %v1761_v3  ;;  %v1744_v7 = vmul.f32 %v5714_v5, %v1741_v62  ;;  %vm1749_vm6 = vweird.f32 %v5714_v5  ;;  %v4667_v62 = vor.u32 %v5510_v58, %v4664_v61  ;;  %v4608_v3 = vld [vmem:[#allocation2 + $0x758] sm:$0xf0]  ;;  %v5489_v58 = vld [vmem:[#allocation2 + $0x714] sm:$0xf0] }
 0x40d   :  { %vm1750_vm8 = vmor %vm1748_vm7, %vm1749_vm6  ;;  %v4611_v4 = vor.u32 %v5496_v55, %v4608_v3 }
 0x40e   :  { %v1766_v9 = vsel %vm1765_vm4, %v5712_v63, %v1762_v6  ;;  %v1745_v53 = vsub.f32 1.0, %v1744_v7  ;;  %v4606_v63 = vld [vmem:[#allocation2 + $0x750] sm:$0xf]  ;;  %2313 = vmatpush.bf16.msrb.mxu1 %v4667_v62  ;;  %v5509_v6 = vld [vmem:[#allocation2 + $0x7b4] sm:$0xf0] }
 0x40f   :  { %v1771_v10 = vsel %vm1768_vm5, %v1770_v8, %v1766_v9  ;;  %v4607_v2 = vor.u32 %v5497_v0, %v4606_v63  ;;  %v5508_v7 = vld [vmem:[#allocation2 + $0x7b4] sm:$0xf]  ;;  %v4656_v9 = vld [vmem:[#allocation2 + $0x7b8] sm:$0xf0]  ;;  %v4575_v63 = vor.u32 %v5489_v58, %v4574_v57  ;;  %v4810_v57 = vld [vmem:[#allocation2 + $0x8e8] sm:$0xf0] }
 0x410   :  { %v1774_v12 = vmul.f32 %v1771_v10, %v1732_v35  ;;  %v1746_v13 = vmul.f32 %v5714_v5, %v1745_v53  ;;  %v5501_v35 = vld [vmem:[#allocation2 + $0x774] sm:$0xf0]  ;;  %v4659_v53 = vor.u32 %v5508_v7, %v4656_v9  ;;  %v4598_v10 = vld [vmem:[#allocation2 + $0x740] sm:$0xf]  ;;  %v4576_v0 = vld [vmem:[#allocation2 + $0x718] sm:$0xf0] }
 0x411   :  { %v4623_v37 = vor.u32 %v5501_v35, %v4622_v34  ;;  %v4639_v34 = vor.u32 %v5505_v31, %v4638_v30  ;;  %v4640_v35 = vld [vmem:[#allocation2 + $0x798] sm:$0xf0]  ;;  %v4579_v55 = vor.u32 %v5488_v60, %v4576_v0  ;;  %v4568_v9 = vld [vmem:[#allocation2 + $0x708] sm:$0xf0]  ;;  %v4752_v60 = vld [vmem:[#allocation2 + $0x870] sm:$0xf] }
 0x412   :  { %v1809_v15 = vpack.c.bf16 %v1774_v12, %v1774_v12  ;;  %v1747_v16 = vadd.f32 %v5714_v5, %v1746_v13  ;;  %v5494_v12 = vld [vmem:[#allocation2 + $0x744] sm:$0xf]  ;;  %v4599_v13 = vor.u32 %v5495_v11, %v4598_v10  ;;  %2314 = vmatpush.bf16.msrb.mxu1 %v4659_v53  ;;  %v4643_v36 = vor.u32 %v5504_v32, %v4640_v35  ;;  %v4754_v0 = vld [vmem:[#allocation2 + $0x878] sm:$0xf0] }
 0x413   :  { %2271 = vmatpush.bf16.msrb.mxu2 %v4623_v37  ;;  %v4582_v37 = vld [vmem:[#allocation2 + $0x720] sm:$0xf] }
 0x414   :  { %v1751_v18 = vsel %vm1750_vm8, %v5714_v5, %v1747_v16  ;;  %1998 = vmatmul.bf16.vlgmr.msra.gmra.mxu3 %v1809_v15  ;;  %2024 = vmatmul.bf16.vlgmr.msra.gmra.mxu1 %v1809_v15  ;;  %v4654_v5 = vld [vmem:[#allocation2 + $0x7b0] sm:$0xf]  ;;  %v4603_v15 = vor.u32 %v5494_v12, %v4600_v14  ;;  %v4646_v16 = vld [vmem:[#allocation2 + $0x7a0] sm:$0xf]  ;;  %v4583_v41 = vor.u32 %v5491_v38, %v4582_v37 }
 0x415   :  { %v1756_v19 = vsel %vm1753_vm9, %v1755_v17, %v1751_v18  ;;  %v4655_v8 = vor.u32 %v5509_v6, %v4654_v5  ;;  %v5507_v17 = vld [vmem:[#allocation2 + $0x7a4] sm:$0xf0]  ;;  %v5506_v18 = vld [vmem:[#allocation2 + $0x7a4] sm:$0xf] }
 0x416   :  { %v1773_v20 = vmul.f32 %v1756_v19, %v1706_v54  ;;  %v4619_v54 = vor.u32 %v5498_v50, %v4616_v52  ;;  %v6042_v19 = vld [vmem:[#allocation4 + $0x7] ss:$8 sm:$0x3]  ;;  %v5487_v5 = vld [vmem:[#allocation2 + $0x704] sm:$0xf0] }
 0x417   :  { %2272 = vmatpush.bf16.msrb.mxu2 %v4615_v51  ;;  %2288 = vmatpush.bf16.msrb.mxu3 %v4655_v8  ;;  %v1814_v33 = vperm.slane %v6042_v19, 1  ;;  %v4631_v51 = vor.u32 %v5503_v48, %v4630_v47  ;;  %v4632_v52 = vld [vmem:[#allocation2 + $0x788] sm:$0xf0]  ;;  %v1813_v62 = vperm.slane %v6042_v19, 0  ;;  %v5486_v6 = vld [vmem:[#allocation2 + $0x704] sm:$0xf] }
 0x418   :  { %v1808_v21 = vpack.c.bf16 %v1773_v20, %v1773_v20  ;;  %2298 = vmatpush.bf16.msrb.mxu0 %v4619_v54  ;;  %v4647_v20 = vor.u32 %v5507_v17, %v4646_v16  ;;  %v4635_v56 = vor.u32 %v5502_v49, %v4632_v52  ;;  %v4571_v11 = vor.u32 %v5486_v6, %v4568_v9  ;;  %v5548_v47 = vld [vmem:[#allocation2 + $0x8f4] sm:$0xf]  ;;  %v4818_v49 = vld [vmem:[#allocation2 + $0x8f8] sm:$0xf0]  ;;  %v5547_v52 = vld [vmem:[#allocation2 + $0x8e4] sm:$0xf0] }
 0x419   :  { %v4802_v6 = vld [vmem:[#allocation2 + $0x8d8] sm:$0xf0]  ;;  %v5531_v9 = vld [vmem:[#allocation2 + $0x864] sm:$0xf0] }
 0x41a   :  { %1985 = vmatmul.bf16.vlgmr.msra.gmra.mxu2 %v1808_v21  ;;  %2011 = vmatmul.bf16.vlgmr.msra.gmra.mxu0 %v1808_v21  ;;  %v4648_v21 = vld [vmem:[#allocation2 + $0x7a8] sm:$0xf0] }
 0x41b   :  { %2273 = vmatpush.bf16.msrb.mxu2 %v4607_v2  ;;  %v4651_v23 = vor.u32 %v5506_v18, %v4648_v21  ;;  %2289 = vmatpush.bf16.msrb.mxu3 %v4647_v20 }
 0x41c   :  { %2299 = vmatpush.bf16.msrb.mxu0 %v4611_v4  ;;  %v4566_v4 = vld [vmem:[#allocation2 + $0x700] sm:$0xf] }
 0x41d   :  { %2315 = vmatpush.bf16.msrb.mxu1 %v4651_v23  ;;  %v4567_v8 = vor.u32 %v5487_v5, %v4566_v4  ;;  %v5544_v4 = vld [vmem:[#allocation2 + $0x8d4] sm:$0xf] }
 0x41f   :  { %2274 = vmatpush.bf16.msrb.mxu2 %v4599_v13  ;;  %2290 = vmatpush.bf16.msrb.mxu3 %v4639_v34 }
 0x420   :  { %2300 = vmatpush.bf16.msrb.mxu0 %v4603_v15 }
 0x421   :  { %2316 = vmatpush.bf16.msrb.mxu1 %v4643_v36 }
 0x423   :  { %2275 = vmatpush.bf16.msrb.mxu2 %v4591_v27  ;;  %2291 = vmatpush.bf16.msrb.mxu3 %v4631_v51  ;;  %v4808_v51 = vld [vmem:[#allocation2 + $0x8e0] sm:$0xf] }
 0x424   :  { %2301 = vmatpush.bf16.msrb.mxu0 %v4595_v29 }
 0x425   :  { %2317 = vmatpush.bf16.msrb.mxu1 %v4635_v56  ;;  %v4809_v56 = vor.u32 %v5547_v52, %v4808_v51  ;;  %v4722_v52 = vld [vmem:[#allocation2 + $0x838] sm:$0xf0] }
 0x427   :  { %2276 = vmatpush.bf16.msrb.mxu2 %v4583_v41 }
 0x428   :  { %2302 = vmatpush.bf16.msrb.mxu0 %v4587_v46  ;;  %v5549_v46 = vld [vmem:[#allocation2 + $0x8f4] sm:$0xf0] }
 0x42b   :  { %2277 = vmatpush.bf16.msrb.mxu2 %v4575_v63 }
 0x42c   :  { %2303 = vmatpush.bf16.msrb.mxu0 %v4579_v55 }
 0x42f   :  { %2278 = vmatpush.bf16.msrb.mxu2 %v4567_v8  ;;  %v4744_v8 = vld [vmem:[#allocation2 + $0x860] sm:$0xf] }
 0x430   :  { %2304 = vmatpush.bf16.msrb.mxu0 %v4571_v11  ;;  %v4746_v11 = vld [vmem:[#allocation2 + $0x868] sm:$0xf0] }
 0x491   :  { %v2025_v22 = vpop.f32.mrf.mxu1 }
 0x497   :  { %v1999_v43 = vpop.f32.mrf.mxu3  ;;  %v2012_v44 = vpop.f32.mrf.mxu0 }
 0x498   :  { %v2013_v50 = vadd.f32 %v2012_v44, %v1814_v33  ;;  %v4816_v44 = vld [vmem:[#allocation2 + $0x8f0] sm:$0xf] }
 0x499   :  { %v2027_v54 = vpop.f32.mrf.mxu1  ;;  %v4817_v48 = vor.u32 %v5549_v46, %v4816_v44  ;;  %v4778_v46 = vld [vmem:[#allocation2 + $0x8a8] sm:$0xf0] }
 0x49a   :  { %v2026_v61 = vadd.f32 %v2025_v22, %v2013_v50  ;;  %v4821_v50 = vor.u32 %v5548_v47, %v4818_v49  ;;  %v5546_v54 = vld [vmem:[#allocation2 + $0x8e4] sm:$0xf]  ;;  %v5525_v49 = vld [vmem:[#allocation2 + $0x834] sm:$0xf0] }
 0x49b   :  { %2582 = vmatpush.bf16.msra.mxu3 %v4817_v48  ;;  %v4813_v58 = vor.u32 %v5546_v54, %v4810_v57  ;;  %v4720_v48 = vld [vmem:[#allocation2 + $0x830] sm:$0xf] }
 0x49c   :  { %v4563_v2 = vmul.f32 -1.442695, %v2026_v61  ;;  %2608 = vmatpush.bf16.msra.mxu1 %v4821_v50  ;;  %v5524_v50 = vld [vmem:[#allocation2 + $0x834] sm:$0xf]  ;;  %v4721_v51 = vor.u32 %v5525_v49, %v4720_v48 }
 0x49d   :  { %v1986_v3 = vpop.f32.mrf.mxu2  ;;  %v4725_v57 = vor.u32 %v5524_v50, %v4722_v52 }
 0x49e   :  { %5715 = vpow2.f32 %v4563_v2  ;;  %v1987_v7 = vadd.f32 %v1986_v3, %v1813_v62  ;;  %v5532_v62 = vld [vmem:[#allocation2 + $0x874] sm:$0xf]  ;;  %v4800_v2 = vld [vmem:[#allocation2 + $0x8d0] sm:$0xf]  ;;  %v5545_v3 = vld [vmem:[#allocation2 + $0x8d4] sm:$0xf0] }
 0x49f   :  { %v2001_v53 = vpop.f32.mrf.mxu3  ;;  %v2014_v10 = vpop.f32.mrf.mxu0  ;;  %2583 = vmatpush.bf16.msra.mxu3 %v4809_v56  ;;  %v4757_v55 = vor.u32 %v5532_v62, %v4754_v0  ;;  %v4801_v5 = vor.u32 %v5545_v3, %v4800_v2  ;;  %v4770_v0 = vld [vmem:[#allocation2 + $0x898] sm:$0xf0]  ;;  %v4712_v3 = vld [vmem:[#allocation2 + $0x820] sm:$0xf] }
 0x4a0   :  { %v2000_v12 = vadd.f32 %v1999_v43, %v1987_v7  ;;  %2609 = vmatpush.bf16.msra.mxu1 %v4813_v58  ;;  %v4805_v7 = vor.u32 %v5544_v4, %v4802_v6  ;;  %v5530_v53 = vld [vmem:[#allocation2 + $0x864] sm:$0xf]  ;;  %v4745_v10 = vor.u32 %v5531_v9, %v4744_v8  ;;  %v4768_v58 = vld [vmem:[#allocation2 + $0x890] sm:$0xf]  ;;  %v5523_v4 = vld [vmem:[#allocation2 + $0x824] sm:$0xf0] }
 0x4a1   :  { %2595 = vmatpush.bf16.msra.mxu0 %v4757_v55  ;;  %v4713_v8 = vor.u32 %v5523_v4, %v4712_v3  ;;  %v4714_v9 = vld [vmem:[#allocation2 + $0x828] sm:$0xf0] }
 0x4a2   :  { %v4562_v13 = vmul.f32 -1.442695, %v2000_v12 }
 0x4a3   :  { %2584 = vmatpush.bf16.msra.mxu3 %v4801_v5  ;;  %v5522_v5 = vld [vmem:[#allocation2 + $0x824] sm:$0xf] }
 0x4a4   :  { %v5716_v14 = vpop.eup %5715  ;;  %5717 = vpow2.f32 %v4562_v13  ;;  %2610 = vmatpush.bf16.msra.mxu1 %v4805_v7  ;;  %v4792_v13 = vld [vmem:[#allocation2 + $0x8c0] sm:$0xf] }
 0x4a5   :  { %v2036_v15 = vadd.f32 1.0, %v5716_v14  ;;  %v1988_v16 = vpop.f32.mrf.mxu2  ;;  %v5543_v14 = vld [vmem:[#allocation2 + $0x8c4] sm:$0xf0] }
 0x4a6   :  { %v4793_v16 = vor.u32 %v5543_v14, %v4792_v13 }
 0x4a7   :  { %5719 = vrcp.f32 %v2036_v15  ;;  %v2063_v22 = vand.u32 2147483648, %v2036_v15  ;;  %v2061_v24 = vand.u32 2147483647, %v2036_v15  ;;  %vm2057_vm11 = vweird.f32 %v2036_v15 }
 0x4a8   :  { %2585 = vmatpush.bf16.msra.mxu3 %v4793_v16 }
 0x4a9   :  { %v2064_v28 = vor.u32 1.1754944e-38, %v2063_v22  ;;  %vm2062_vm13 = vcmp.eq.f32.partialorder %v2061_v24, 8.507059e+37 }
 0x4aa   :  { %v5718_v17 = vpop.eup %5717 }
 0x4ab   :  { %v2035_v18 = vadd.f32 1.0, %v5718_v17  ;;  %v4794_v17 = vld [vmem:[#allocation2 + $0x8c8] sm:$0xf0] }
 0x4ad   :  { %v5720_v19 = vpop.eup %5719  ;;  %5721 = vrcp.f32 %v2035_v18  ;;  %v2048_v32 = vand.u32 2147483648, %v2035_v18  ;;  %v2046_v35 = vand.u32 2147483647, %v2035_v18  ;;  %vm2042_vm15 = vweird.f32 %v2035_v18 }
 0x4ae   :  { %v2053_v20 = vmul.f32 %v5720_v19, %v2036_v15  ;;  %vm2058_vm10 = vweird.f32 %v5720_v19  ;;  %v5542_v15 = vld [vmem:[#allocation2 + $0x8c4] sm:$0xf] }
 0x4af   :  { %vm2059_vm12 = vmor %vm2057_vm11, %vm2058_vm10  ;;  %v2049_v38 = vor.u32 1.1754944e-38, %v2048_v32  ;;  %vm2047_vm1 = vcmp.eq.f32.partialorder %v2046_v35, 8.507059e+37  ;;  %v5526_v35 = vld [vmem:[#allocation2 + $0x844] sm:$0xf] }
 0x4b0   :  { %v2054_v21 = vsub.f32 1.0, %v2053_v20  ;;  %v5529_v20 = vld [vmem:[#allocation2 + $0x854] sm:$0xf0] }
 0x4b2   :  { %v2055_v23 = vmul.f32 %v5720_v19, %v2054_v21  ;;  %v5528_v21 = vld [vmem:[#allocation2 + $0x854] sm:$0xf] }
 0x4b3   :  { %v5722_v25 = vpop.eup %5721 }
 0x4b4   :  { %v2056_v26 = vadd.f32 %v5720_v19, %v2055_v23  ;;  %v2038_v27 = vmul.f32 %v5722_v25, %v2035_v18  ;;  %vm2043_vm14 = vweird.f32 %v5722_v25  ;;  %v4797_v18 = vor.u32 %v5542_v15, %v4794_v17  ;;  %v4738_v23 = vld [vmem:[#allocation2 + $0x858] sm:$0xf0]  ;;  %v4762_v15 = vld [vmem:[#allocation2 + $0x888] sm:$0xf0] }
 0x4b5   :  { %vm2044_vm0 = vmor %vm2042_vm15, %vm2043_vm14  ;;  %v4741_v24 = vor.u32 %v5528_v21, %v4738_v23  ;;  %v4706_v23 = vld [vmem:[#allocation2 + $0x818] sm:$0xf0] }
 0x4b6   :  { %v2060_v29 = vsel %vm2059_vm12, %v5720_v19, %v2056_v26  ;;  %v2039_v30 = vsub.f32 1.0, %v2038_v27  ;;  %v4736_v19 = vld [vmem:[#allocation2 + $0x850] sm:$0xf]  ;;  %2611 = vmatpush.bf16.msra.mxu1 %v4797_v18  ;;  %v5541_v26 = vld [vmem:[#allocation2 + $0x8b4] sm:$0xf0] }
 0x4b7   :  { %v2065_v31 = vsel %vm2062_vm13, %v2064_v28, %v2060_v29  ;;  %v4737_v22 = vor.u32 %v5529_v20, %v4736_v19  ;;  %v5540_v27 = vld [vmem:[#allocation2 + $0x8b4] sm:$0xf]  ;;  %v6046_v28 = vld [vmem:[#allocation4 + $0x10] ss:$8 sm:$0x3] }
 0x4b8   :  { %v2068_v33 = vmul.f32 %v2065_v31, %v2026_v61  ;;  %v2040_v34 = vmul.f32 %v5722_v25, %v2039_v30  ;;  %v5533_v61 = vld [vmem:[#allocation2 + $0x874] sm:$0xf0]  ;;  %v4786_v30 = vld [vmem:[#allocation2 + $0x8b8] sm:$0xf0]  ;;  %v2107_v7 = vperm.slane %v6046_v28, 0 }
 0x4b9   :  { %v4753_v63 = vor.u32 %v5533_v61, %v4752_v60  ;;  %v4789_v32 = vor.u32 %v5540_v27, %v4786_v30  ;;  %v5537_v60 = vld [vmem:[#allocation2 + $0x894] sm:$0xf0]  ;;  %v5536_v61 = vld [vmem:[#allocation2 + $0x894] sm:$0xf]  ;;  %v4704_v18 = vld [vmem:[#allocation2 + $0x810] sm:$0xf] }
 0x4ba   :  { %v2103_v36 = vpack.c.bf16 %v2068_v33, %v2068_v33  ;;  %v2041_v37 = vadd.f32 %v5722_v25, %v2040_v34  ;;  %v4728_v33 = vld [vmem:[#allocation2 + $0x840] sm:$0xf]  ;;  %v5527_v34 = vld [vmem:[#allocation2 + $0x844] sm:$0xf0]  ;;  %v4773_v2 = vor.u32 %v5536_v61, %v4770_v0  ;;  %v5521_v19 = vld [vmem:[#allocation2 + $0x814] sm:$0xf0] }
 0x4bb   :  { %2569 = vmatpush.bf16.msra.mxu2 %v4753_v63  ;;  %2612 = vmatpush.bf16.msra.mxu1 %v4789_v32  ;;  %v4769_v63 = vor.u32 %v5537_v60, %v4768_v58  ;;  %v5520_v20 = vld [vmem:[#allocation2 + $0x814] sm:$0xf]  ;;  %v5518_v30 = vld [vmem:[#allocation2 + $0x804] sm:$0xf] }
 0x4bc   :  { %v2045_v40 = vsel %vm2044_vm0, %v5722_v25, %v2041_v37  ;;  %2292 = vmatmul.bf16.vlgmr.msrb.gmra.mxu3 %v2103_v36  ;;  %2318 = vmatmul.bf16.vlgmr.msrb.gmra.mxu1 %v2103_v36  ;;  %v4784_v25 = vld [vmem:[#allocation2 + $0x8b0] sm:$0xf]  ;;  %v4729_v36 = vor.u32 %v5527_v34, %v4728_v33  ;;  %v4730_v37 = vld [vmem:[#allocation2 + $0x848] sm:$0xf0] }
 0x4bd   :  { %v2050_v41 = vsel %vm2047_vm1, %v2049_v38, %v2045_v40  ;;  %v4785_v29 = vor.u32 %v5541_v26, %v4784_v25  ;;  %v4733_v38 = vor.u32 %v5526_v35, %v4730_v37  ;;  %v4776_v40 = vld [vmem:[#allocation2 + $0x8a0] sm:$0xf]  ;;  %v4709_v26 = vor.u32 %v5520_v20, %v4706_v23  ;;  %v4698_v33 = vld [vmem:[#allocation2 + $0x808] sm:$0xf0]  ;;  %v5564_v20 = vld [vmem:[#allocation2 + $0x974] sm:$0xf] }
 0x4be   :  { %v2067_v42 = vmul.f32 %v2050_v41, %v2000_v12  ;;  %v4749_v12 = vor.u32 %v5530_v53, %v4746_v11  ;;  %v5539_v41 = vld [vmem:[#allocation2 + $0x8a4] sm:$0xf0]  ;;  %v4717_v53 = vor.u32 %v5522_v5, %v4714_v9  ;;  %v4701_v34 = vor.u32 %v5518_v30, %v4698_v33  ;;  %v5581_v9 = vld [vmem:[#allocation2 + $0x9f4] sm:$0xf0]  ;;  %v4874_v30 = vld [vmem:[#allocation2 + $0x960] sm:$0xf] }
 0x4bf   :  { %2570 = vmatpush.bf16.msra.mxu2 %v4745_v10  ;;  %2586 = vmatpush.bf16.msra.mxu3 %v4785_v29  ;;  %v4777_v44 = vor.u32 %v5539_v41, %v4776_v40  ;;  %v4760_v10 = vld [vmem:[#allocation2 + $0x880] sm:$0xf]  ;;  %v5535_v11 = vld [vmem:[#allocation2 + $0x884] sm:$0xf0] }
 0x4c0   :  { %v2102_v43 = vpack.c.bf16 %v2067_v42, %v2067_v42  ;;  %2596 = vmatpush.bf16.msra.mxu0 %v4749_v12  ;;  %v5538_v42 = vld [vmem:[#allocation2 + $0x8a4] sm:$0xf]  ;;  %v4761_v14 = vor.u32 %v5535_v11, %v4760_v10  ;;  %v5519_v29 = vld [vmem:[#allocation2 + $0x804] sm:$0xf0]  ;;  %v4948_v11 = vld [vmem:[#allocation2 + $0x9f8] sm:$0xf0] }
 0x4c1   :  { %v4781_v47 = vor.u32 %v5538_v42, %v4778_v46  ;;  %v5534_v12 = vld [vmem:[#allocation2 + $0x884] sm:$0xf] }
 0x4c2   :  { %2279 = vmatmul.bf16.vlgmr.msrb.gmra.mxu2 %v2102_v43  ;;  %2305 = vmatmul.bf16.vlgmr.msrb.gmra.mxu0 %v2102_v43  ;;  %v2108_v43 = vperm.slane %v6046_v28, 1  ;;  %v4765_v17 = vor.u32 %v5534_v12, %v4762_v15  ;;  %v4696_v28 = vld [vmem:[#allocation2 + $0x800] sm:$0xf] }
 0x4c3   :  { %2571 = vmatpush.bf16.msra.mxu2 %v4737_v22  ;;  %2587 = vmatpush.bf16.msra.mxu3 %v4777_v44  ;;  %v4705_v22 = vor.u32 %v5521_v19, %v4704_v18  ;;  %v4697_v32 = vor.u32 %v5519_v29, %v4696_v28  ;;  %v4882_v18 = vld [vmem:[#allocation2 + $0x970] sm:$0xf]  ;;  %v5565_v19 = vld [vmem:[#allocation2 + $0x974] sm:$0xf0]  ;;  %v4932_v28 = vld [vmem:[#allocation2 + $0x9d8] sm:$0xf0] }
 0x4c4   :  { %2597 = vmatpush.bf16.msra.mxu0 %v4741_v24  ;;  %2613 = vmatpush.bf16.msra.mxu1 %v4781_v47 }
 0x4c7   :  { %2572 = vmatpush.bf16.msra.mxu2 %v4729_v36  ;;  %2588 = vmatpush.bf16.msra.mxu3 %v4769_v63 }
 0x4c8   :  { %2598 = vmatpush.bf16.msra.mxu0 %v4733_v38  ;;  %2614 = vmatpush.bf16.msra.mxu1 %v4773_v2 }
 0x4cb   :  { %2573 = vmatpush.bf16.msra.mxu2 %v4721_v51  ;;  %2589 = vmatpush.bf16.msra.mxu3 %v4761_v14  ;;  %v5579_v14 = vld [vmem:[#allocation2 + $0x9e4] sm:$0xf0] }
 0x4cc   :  { %2599 = vmatpush.bf16.msra.mxu0 %v4725_v57  ;;  %2615 = vmatpush.bf16.msra.mxu1 %v4765_v17 }
 0x4cf   :  { %2574 = vmatpush.bf16.msra.mxu2 %v4713_v8  ;;  %v4946_v8 = vld [vmem:[#allocation2 + $0x9f0] sm:$0xf] }
 0x4d0   :  { %2600 = vmatpush.bf16.msra.mxu0 %v4717_v53  ;;  %v5580_v53 = vld [vmem:[#allocation2 + $0x9f4] sm:$0xf]  ;;  %v4947_v10 = vor.u32 %v5581_v9, %v4946_v8 }
 0x4d1   :  { %v4951_v12 = vor.u32 %v5580_v53, %v4948_v11  ;;  %v4850_v53 = vld [vmem:[#allocation2 + $0x930] sm:$0xf]  ;;  %v5556_v11 = vld [vmem:[#allocation2 + $0x934] sm:$0xf] }
 0x4d2   :  { %2876 = vmatpush.bf16.msrb.mxu3 %v4947_v10  ;;  %v5557_v10 = vld [vmem:[#allocation2 + $0x934] sm:$0xf0] }
 0x4d3   :  { %2575 = vmatpush.bf16.msra.mxu2 %v4705_v22  ;;  %2902 = vmatpush.bf16.msrb.mxu1 %v4951_v12  ;;  %v4884_v22 = vld [vmem:[#allocation2 + $0x978] sm:$0xf0]  ;;  %v4851_v12 = vor.u32 %v5557_v10, %v4850_v53 }
 0x4d4   :  { %2601 = vmatpush.bf16.msra.mxu0 %v4709_v26  ;;  %v4887_v23 = vor.u32 %v5564_v20, %v4884_v22  ;;  %v5576_v26 = vld [vmem:[#allocation2 + $0x9d4] sm:$0xf]  ;;  %v5555_v22 = vld [vmem:[#allocation2 + $0x924] sm:$0xf0] }
 0x4d5   :  { %v4935_v29 = vor.u32 %v5576_v26, %v4932_v28 }
 0x4d7   :  { %2576 = vmatpush.bf16.msra.mxu2 %v4697_v32  ;;  %v5562_v32 = vld [vmem:[#allocation2 + $0x964] sm:$0xf] }
 0x4d8   :  { %2602 = vmatpush.bf16.msra.mxu0 %v4701_v34  ;;  %v4876_v34 = vld [vmem:[#allocation2 + $0x968] sm:$0xf0] }
 0x4dc   :  { %2889 = vmatpush.bf16.msrb.mxu0 %v4887_v23  ;;  %v5554_v23 = vld [vmem:[#allocation2 + $0x924] sm:$0xf] }
 0x539   :  { %v2319_v31 = vpop.f32.mrf.mxu1 }
 0x53f   :  { %v2293_v54 = vpop.f32.mrf.mxu3  ;;  %v2306_v56 = vpop.f32.mrf.mxu0 }
 0x540   :  { %v2307_v62 = vadd.f32 %v2306_v56, %v2108_v43 }
 0x541   :  { %v2321_v55 = vpop.f32.mrf.mxu1 }
 0x542   :  { %v6049_v6 = vadd.f32 %v2319_v31, %v2307_v62 }
 0x544   :  { %v4693_v13 = vmul.f32 -1.442695, %v6049_v6 }
 0x545   :  { %v2280_v16 = vpop.f32.mrf.mxu2 }
 0x546   :  { %5723 = vpow2.f32 %v4693_v13  ;;  %v2281_v21 = vadd.f32 %v2280_v16, %v2107_v7  ;;  %v4938_v13 = vld [vmem:[#allocation2 + $0x9e0] sm:$0xf]  ;;  %v4940_v16 = vld [vmem:[#allocation2 + $0x9e8] sm:$0xf0] }
 0x547   :  { %v2295_v24 = vpop.f32.mrf.mxu3  ;;  %v2308_v25 = vpop.f32.mrf.mxu0  ;;  %v4939_v15 = vor.u32 %v5579_v14, %v4938_v13  ;;  %v4852_v13 = vld [vmem:[#allocation2 + $0x938] sm:$0xf0] }
 0x548   :  { %v2294_v27 = vadd.f32 %v2293_v54, %v2281_v21  ;;  %v4883_v21 = vor.u32 %v5565_v19, %v4882_v18  ;;  %v4930_v24 = vld [vmem:[#allocation2 + $0x9d0] sm:$0xf]  ;;  %v5577_v25 = vld [vmem:[#allocation2 + $0x9d4] sm:$0xf0]  ;;  %v4855_v14 = vor.u32 %v5556_v11, %v4852_v13  ;;  %v4900_v19 = vld [vmem:[#allocation2 + $0x998] sm:$0xf0] }
 0x549   :  { %2877 = vmatpush.bf16.msrb.mxu3 %v4939_v15  ;;  %v5569_v15 = vld [vmem:[#allocation2 + $0x994] sm:$0xf0] }
 0x54a   :  { %v4692_v31 = vmul.f32 -1.442695, %v2294_v27  ;;  %2863 = vmatpush.bf16.msrb.mxu2 %v4883_v21  ;;  %v4842_v21 = vld [vmem:[#allocation2 + $0x920] sm:$0xf] }
 0x54c   :  { %v5724_v35 = vpop.eup %5723  ;;  %5725 = vpow2.f32 %v4692_v31  ;;  %v5563_v31 = vld [vmem:[#allocation2 + $0x964] sm:$0xf0] }
 0x54d   :  { %v2330_v36 = vadd.f32 1.0, %v5724_v35  ;;  %v2282_v37 = vpop.f32.mrf.mxu2  ;;  %v4875_v33 = vor.u32 %v5563_v31, %v4874_v30  ;;  %v4879_v35 = vor.u32 %v5562_v32, %v4876_v34  ;;  %v5567_v30 = vld [vmem:[#allocation2 + $0x984] sm:$0xf0]  ;;  %v5566_v31 = vld [vmem:[#allocation2 + $0x984] sm:$0xf] }
 0x54e   :  { %v5575_v37 = vld [vmem:[#allocation2 + $0x9c4] sm:$0xf0]  ;;  %v4892_v34 = vld [vmem:[#allocation2 + $0x988] sm:$0xf0] }
 0x54f   :  { %5727 = vrcp.f32 %v2330_v36  ;;  %v2357_v44 = vand.u32 2147483648, %v2330_v36  ;;  %v2355_v47 = vand.u32 2147483647, %v2330_v36  ;;  %vm2351_vm3 = vweird.f32 %v2330_v36  ;;  %2864 = vmatpush.bf16.msrb.mxu2 %v4875_v33  ;;  %2890 = vmatpush.bf16.msrb.mxu0 %v4879_v35 }
 0x551   :  { %v2358_v51 = vor.u32 1.1754944e-38, %v2357_v44  ;;  %vm2356_vm5 = vcmp.eq.f32.partialorder %v2355_v47, 8.507059e+37  ;;  %v5561_v44 = vld [vmem:[#allocation2 + $0x954] sm:$0xf0] }
 0x552   :  { %v5726_v38 = vpop.eup %5725 }
 0x553   :  { %v2329_v40 = vadd.f32 1.0, %v5726_v38  ;;  %v5574_v38 = vld [vmem:[#allocation2 + $0x9c4] sm:$0xf] }
 0x555   :  { %v5728_v41 = vpop.eup %5727  ;;  %5729 = vrcp.f32 %v2329_v40  ;;  %v2342_v57 = vand.u32 2147483648, %v2329_v40  ;;  %v2340_v61 = vand.u32 2147483647, %v2329_v40  ;;  %vm2336_vm7 = vweird.f32 %v2329_v40 }
 0x556   :  { %v2347_v42 = vmul.f32 %v5728_v41, %v2330_v36  ;;  %vm2352_vm2 = vweird.f32 %v5728_v41  ;;  %v4922_v36 = vld [vmem:[#allocation2 + $0x9c0] sm:$0xf] }
 0x557   :  { %vm2353_vm4 = vmor %vm2351_vm3, %vm2352_vm2  ;;  %v2343_v0 = vor.u32 1.1754944e-38, %v2342_v57  ;;  %vm2341_vm9 = vcmp.eq.f32.partialorder %v2340_v61, 8.507059e+37  ;;  %v5558_v61 = vld [vmem:[#allocation2 + $0x944] sm:$0xf] }
 0x558   :  { %v2348_v43 = vsub.f32 1.0, %v2347_v42 }
 0x55a   :  { %v2349_v46 = vmul.f32 %v5728_v41, %v2348_v43  ;;  %v4866_v43 = vld [vmem:[#allocation2 + $0x950] sm:$0xf] }
 0x55b   :  { %v5730_v48 = vpop.eup %5729  ;;  %v4867_v47 = vor.u32 %v5561_v44, %v4866_v43  ;;  %v4836_v44 = vld [vmem:[#allocation2 + $0x918] sm:$0xf0] }
 0x55c   :  { %v2350_v49 = vadd.f32 %v5728_v41, %v2349_v46  ;;  %v2332_v50 = vmul.f32 %v5730_v48, %v2329_v40  ;;  %vm2337_vm6 = vweird.f32 %v5730_v48  ;;  %v4923_v40 = vor.u32 %v5575_v37, %v4922_v36  ;;  %v5560_v46 = vld [vmem:[#allocation2 + $0x954] sm:$0xf]  ;;  %v4834_v37 = vld [vmem:[#allocation2 + $0x910] sm:$0xf] }
 0x55d   :  { %vm2338_vm8 = vmor %vm2336_vm7, %vm2337_vm6  ;;  %2865 = vmatpush.bf16.msrb.mxu2 %v4867_v47  ;;  %v4895_v36 = vor.u32 %v5566_v31, %v4892_v34  ;;  %v5078_v31 = vld [vmem:[#allocation2 + $0xaf8] sm:$0xf0]  ;;  %v5611_v34 = vld [vmem:[#allocation2 + $0xae4] sm:$0xf0] }
 0x55e   :  { %v2354_v52 = vsel %vm2353_vm4, %v5728_v41, %v2350_v49  ;;  %v2333_v54 = vsub.f32 1.0, %v2332_v50  ;;  %v4924_v41 = vld [vmem:[#allocation2 + $0x9c8] sm:$0xf0]  ;;  %v4914_v50 = vld [vmem:[#allocation2 + $0x9b0] sm:$0xf] }
 0x55f   :  { %v2359_v56 = vsel %vm2356_vm5, %v2358_v51, %v2354_v52  ;;  %v4927_v42 = vor.u32 %v5574_v38, %v4924_v41  ;;  %v5573_v51 = vld [vmem:[#allocation2 + $0x9b4] sm:$0xf0]  ;;  %v5572_v52 = vld [vmem:[#allocation2 + $0x9b4] sm:$0xf] }
 0x560   :  { %v2362_v58 = vmul.f32 %v2359_v56, %v6049_v6  ;;  %v2334_v60 = vmul.f32 %v5730_v48, %v2333_v54  ;;  %v4915_v54 = vor.u32 %v5573_v51, %v4914_v50  ;;  %v4916_v56 = vld [vmem:[#allocation2 + $0x9b8] sm:$0xf0]  ;;  %v5553_v38 = vld [vmem:[#allocation2 + $0x914] sm:$0xf0]  ;;  %v5551_v50 = vld [vmem:[#allocation2 + $0x904] sm:$0xf0] }
 0x561   :  { %v4919_v57 = vor.u32 %v5572_v52, %v4916_v56  ;;  %v4835_v43 = vor.u32 %v5553_v38, %v4834_v37  ;;  %v5550_v51 = vld [vmem:[#allocation2 + $0x904] sm:$0xf]  ;;  %v4828_v56 = vld [vmem:[#allocation2 + $0x908] sm:$0xf0] }
 0x562   :  { %v2364_v62 = vadd.f32 %v2362_v58, %v6029_v59  ;;  %v2335_v63 = vadd.f32 %v5730_v48, %v2334_v60  ;;  %v4858_v58 = vld [vmem:[#allocation2 + $0x940] sm:$0xf]  ;;  %v5559_v60 = vld [vmem:[#allocation2 + $0x944] sm:$0xf0]  ;;  %v5070_v37 = vld [vmem:[#allocation2 + $0xae8] sm:$0xf0] }
 0x564   :  { %v6055_v55 = vmul.f32 0.70710677, %v2364_v62  ;;  %v2339_v2 = vsel %vm2338_vm8, %v5730_v48, %v2335_v63  ;;  %v4868_v48 = vld [vmem:[#allocation2 + $0x958] sm:$0xf0]  ;;  %v4859_v62 = vor.u32 %v5559_v60, %v4858_v58  ;;  %v4860_v63 = vld [vmem:[#allocation2 + $0x948] sm:$0xf0]  ;;  %v4831_v60 = vor.u32 %v5550_v51, %v4828_v56 }
 0x565   :  { %v2344_v3 = vsel %vm2341_vm9, %v2343_v0, %v2339_v2  ;;  %v4871_v49 = vor.u32 %v5560_v46, %v4868_v48  ;;  %v4863_v0 = vor.u32 %v5558_v61, %v4860_v63  ;;  %v4906_v2 = vld [vmem:[#allocation2 + $0x9a0] sm:$0xf]  ;;  %v5062_v51 = vld [vmem:[#allocation2 + $0xad8] sm:$0xf0]  ;;  %v5595_v56 = vld [vmem:[#allocation2 + $0xa64] sm:$0xf0] }
 0x566   :  { %v2361_v4 = vmul.f32 %v2344_v3, %v2294_v27  ;;  %v2401_v5 = vpack.c.bf16 %v6055_v55, %v6055_v55  ;;  %v4931_v27 = vor.u32 %v5577_v25, %v4930_v24  ;;  %v5571_v3 = vld [vmem:[#allocation2 + $0x9a4] sm:$0xf0]  ;;  %2866 = vmatpush.bf16.msrb.mxu2 %v4859_v62  ;;  %v4843_v24 = vor.u32 %v5555_v22, %v4842_v21  ;;  %v4844_v25 = vld [vmem:[#allocation2 + $0x928] sm:$0xf0] }
 0x567   :  { %2891 = vmatpush.bf16.msrb.mxu0 %v4871_v49  ;;  %v4847_v28 = vor.u32 %v5554_v23, %v4844_v25  ;;  %v4826_v49 = vld [vmem:[#allocation2 + $0x900] sm:$0xf] }
 0x568   :  { %v2363_v6 = vadd.f32 %v2361_v4, %v6034_v1  ;;  %2590 = vmatmul.bf16.vlgmr.msra.gmra.mxu3 %v2401_v5  ;;  %2616 = vmatmul.bf16.vlgmr.msra.gmra.mxu1 %v2401_v5  ;;  %v5578_v1 = vld [vmem:[#allocation2 + $0x9e4] sm:$0xf]  ;;  %v6064_v5 = vld [vmem:[#allocation4 + $0x11] ss:$8 sm:$0x3] }
 0x569   :  { %v4943_v17 = vor.u32 %v5578_v1, %v4940_v16  ;;  %2878 = vmatpush.bf16.msrb.mxu3 %v4931_v27  ;;  %v5570_v4 = vld [vmem:[#allocation2 + $0x9a4] sm:$0xf]  ;;  %v4898_v1 = vld [vmem:[#allocation2 + $0x990] sm:$0xf]  ;;  %v5568_v16 = vld [vmem:[#allocation2 + $0x994] sm:$0xf] }
 0x56a   :  { %v6060_v7 = vmul.f32 0.70710677, %v2363_v6  ;;  %v4907_v6 = vor.u32 %v5571_v3, %v4906_v2  ;;  %2867 = vmatpush.bf16.msrb.mxu2 %v4851_v12  ;;  %v4899_v18 = vor.u32 %v5569_v15, %v4898_v1  ;;  %v4903_v20 = vor.u32 %v5568_v16, %v4900_v19 }
 0x56b   :  { %2903 = vmatpush.bf16.msrb.mxu1 %v4943_v17  ;;  %2892 = vmatpush.bf16.msrb.mxu0 %v4863_v0  ;;  %v2406_v17 = vperm.slane %v6064_v5, 1 }
 0x56c   :  { %v2400_v59 = vpack.c.bf16 %v6060_v7, %v6060_v7 }
 0x56d   :  { %2879 = vmatpush.bf16.msrb.mxu3 %v4923_v40  ;;  %v5552_v40 = vld [vmem:[#allocation2 + $0x914] sm:$0xf] }
 0x56e   :  { %2577 = vmatmul.bf16.vlgmr.msra.gmra.mxu2 %v2400_v59  ;;  %2603 = vmatmul.bf16.vlgmr.msra.gmra.mxu0 %v2400_v59  ;;  %v4908_v59 = vld [vmem:[#allocation2 + $0x9a8] sm:$0xf0]  ;;  %v4839_v46 = vor.u32 %v5552_v40, %v4836_v44  ;;  %v5012_v40 = vld [vmem:[#allocation2 + $0xa70] sm:$0xf]  ;;  %v5014_v44 = vld [vmem:[#allocation2 + $0xa78] sm:$0xf0] }
 0x56f   :  { %2904 = vmatpush.bf16.msrb.mxu1 %v4935_v29  ;;  %v4911_v9 = vor.u32 %v5570_v4, %v4908_v59  ;;  %2893 = vmatpush.bf16.msrb.mxu0 %v4855_v14  ;;  %v4890_v29 = vld [vmem:[#allocation2 + $0x980] sm:$0xf] }
 0x570   :  { %2868 = vmatpush.bf16.msrb.mxu2 %v4843_v24  ;;  %v4891_v33 = vor.u32 %v5567_v30, %v4890_v29  ;;  %v5612_v29 = vld [vmem:[#allocation2 + $0xaf4] sm:$0xf] }
 0x571   :  { %2880 = vmatpush.bf16.msrb.mxu3 %v4915_v54  ;;  %v4827_v54 = vor.u32 %v5551_v50, %v4826_v49  ;;  %v5608_v49 = vld [vmem:[#allocation2 + $0xad4] sm:$0xf] }
 0x573   :  { %2905 = vmatpush.bf16.msrb.mxu1 %v4927_v42  ;;  %2894 = vmatpush.bf16.msrb.mxu0 %v4847_v28  ;;  %v2405_v42 = vperm.slane %v6064_v5, 0  ;;  %v5613_v28 = vld [vmem:[#allocation2 + $0xaf4] sm:$0xf0] }
 0x574   :  { %2869 = vmatpush.bf16.msrb.mxu2 %v4835_v43 }
 0x575   :  { %2881 = vmatpush.bf16.msrb.mxu3 %v4907_v6 }
 0x577   :  { %2906 = vmatpush.bf16.msrb.mxu1 %v4919_v57  ;;  %2895 = vmatpush.bf16.msrb.mxu0 %v4839_v46 }
 0x578   :  { %2870 = vmatpush.bf16.msrb.mxu2 %v4827_v54  ;;  %v5004_v54 = vld [vmem:[#allocation2 + $0xa60] sm:$0xf] }
 0x579   :  { %2882 = vmatpush.bf16.msrb.mxu3 %v4899_v18 }
 0x57b   :  { %2907 = vmatpush.bf16.msrb.mxu1 %v4911_v9  ;;  %2896 = vmatpush.bf16.msrb.mxu0 %v4831_v60  ;;  %v5006_v60 = vld [vmem:[#allocation2 + $0xa68] sm:$0xf0] }
 0x57d   :  { %2883 = vmatpush.bf16.msrb.mxu3 %v4891_v33  ;;  %v5068_v33 = vld [vmem:[#allocation2 + $0xae0] sm:$0xf] }
 0x57f   :  { %2908 = vmatpush.bf16.msrb.mxu1 %v4903_v20 }
 0x583   :  { %2909 = vmatpush.bf16.msrb.mxu1 %v4895_v36  ;;  %v5069_v36 = vor.u32 %v5611_v34, %v5068_v33  ;;  %v4982_v33 = vld [vmem:[#allocation2 + $0xa38] sm:$0xf0] }
 0x5e5   :  { %v2617_v8 = vpop.f32.mrf.mxu1 }
 0x5eb   :  { %v2591_v26 = vpop.f32.mrf.mxu3  ;;  %v2604_v27 = vpop.f32.mrf.mxu0 }
 0x5ec   :  { %v2605_v32 = vadd.f32 %v2604_v27, %v2406_v17  ;;  %v5076_v27 = vld [vmem:[#allocation2 + $0xaf0] sm:$0xf] }
 0x5ed   :  { %v2619_v35 = vpop.f32.mrf.mxu1  ;;  %v5077_v30 = vor.u32 %v5613_v28, %v5076_v27 }
 0x5ee   :  { %v2618_v41 = vadd.f32 %v2617_v8, %v2605_v32  ;;  %v5081_v32 = vor.u32 %v5612_v29, %v5078_v31  ;;  %v5610_v35 = vld [vmem:[#allocation2 + $0xae4] sm:$0xf]  ;;  %v4980_v29 = vld [vmem:[#allocation2 + $0xa30] sm:$0xf]  ;;  %v5588_v31 = vld [vmem:[#allocation2 + $0xa34] sm:$0xf] }
 0x5ef   :  { %3170 = vmatpush.bf16.msra.mxu3 %v5077_v30  ;;  %v5073_v38 = vor.u32 %v5610_v35, %v5070_v37  ;;  %v5589_v30 = vld [vmem:[#allocation2 + $0xa34] sm:$0xf0]  ;;  %v4985_v34 = vor.u32 %v5588_v31, %v4982_v33  ;;  %v5028_v35 = vld [vmem:[#allocation2 + $0xa90] sm:$0xf]  ;;  %v5600_v37 = vld [vmem:[#allocation2 + $0xa94] sm:$0xf] }
 0x5f0   :  { %v4823_v47 = vmul.f32 -1.442695, %v2618_v41  ;;  %3196 = vmatpush.bf16.msra.mxu1 %v5081_v32  ;;  %v4981_v32 = vor.u32 %v5589_v30, %v4980_v29 }
 0x5f1   :  { %v2578_v48 = vpop.f32.mrf.mxu2 }
 0x5f2   :  { %5731 = vpow2.f32 %v4823_v47  ;;  %v2579_v52 = vadd.f32 %v2578_v48, %v2405_v42  ;;  %v5596_v42 = vld [vmem:[#allocation2 + $0xa74] sm:$0xf]  ;;  %v5060_v47 = vld [vmem:[#allocation2 + $0xad0] sm:$0xf]  ;;  %v5609_v48 = vld [vmem:[#allocation2 + $0xad4] sm:$0xf0] }
 0x5f3   :  { %v2593_v57 = vpop.f32.mrf.mxu3  ;;  %v2606_v58 = vpop.f32.mrf.mxu0  ;;  %3171 = vmatpush.bf16.msra.mxu3 %v5069_v36  ;;  %v5017_v46 = vor.u32 %v5596_v42, %v5014_v44  ;;  %v5061_v50 = vor.u32 %v5609_v48, %v5060_v47  ;;  %v5601_v36 = vld [vmem:[#allocation2 + $0xa94] sm:$0xf0]  ;;  %v5587_v44 = vld [vmem:[#allocation2 + $0xa24] sm:$0xf0]  ;;  %v4974_v48 = vld [vmem:[#allocation2 + $0xa28] sm:$0xf0] }
 0x5f4   :  { %v2592_v61 = vadd.f32 %v2591_v26, %v2579_v52  ;;  %3197 = vmatpush.bf16.msra.mxu1 %v5073_v38  ;;  %v5065_v52 = vor.u32 %v5608_v49, %v5062_v51  ;;  %v5594_v57 = vld [vmem:[#allocation2 + $0xa64] sm:$0xf]  ;;  %v5005_v58 = vor.u32 %v5595_v56, %v5004_v54  ;;  %v5599_v54 = vld [vmem:[#allocation2 + $0xa84] sm:$0xf0] }
 0x5f5   :  { %3183 = vmatpush.bf16.msra.mxu0 %v5017_v46  ;;  %v5586_v46 = vld [vmem:[#allocation2 + $0xa24] sm:$0xf] }
 0x5f6   :  { %v4822_v62 = vmul.f32 -1.442695, %v2592_v61  ;;  %v4977_v51 = vor.u32 %v5586_v46, %v4974_v48  ;;  %v5598_v56 = vld [vmem:[#allocation2 + $0xa84] sm:$0xf] }
 0x5f7   :  { %3172 = vmatpush.bf16.msra.mxu3 %v5061_v50 }
 0x5f8   :  { %v5732_v63 = vpop.eup %5731  ;;  %5733 = vpow2.f32 %v4822_v62  ;;  %3198 = vmatpush.bf16.msra.mxu1 %v5065_v52  ;;  %v5052_v62 = vld [vmem:[#allocation2 + $0xac0] sm:$0xf] }
 0x5f9   :  { %v2628_v0 = vadd.f32 1.0, %v5732_v63  ;;  %v2580_v2 = vpop.f32.mrf.mxu2  ;;  %v5607_v63 = vld [vmem:[#allocation2 + $0xac4] sm:$0xf0]  ;;  %v5020_v52 = vld [vmem:[#allocation2 + $0xa80] sm:$0xf] }
 0x5fa   :  { %v5053_v2 = vor.u32 %v5607_v63, %v5052_v62  ;;  %v4964_v63 = vld [vmem:[#allocation2 + $0xa10] sm:$0xf] }
 0x5fb   :  { %5735 = vrcp.f32 %v2628_v0  ;;  %v2655_v8 = vand.u32 2147483648, %v2628_v0  ;;  %v2653_v53 = vand.u32 2147483647, %v2628_v0  ;;  %vm2649_vm11 = vweird.f32 %v2628_v0 }
 0x5fc   :  { %3173 = vmatpush.bf16.msra.mxu3 %v5053_v2  ;;  %v5584_v2 = vld [vmem:[#allocation2 + $0xa14] sm:$0xf] }
 0x5fd   :  { %v2656_v13 = vor.u32 1.1754944e-38, %v2655_v8  ;;  %vm2654_vm13 = vcmp.eq.f32.partialorder %v2653_v53, 8.507059e+37 }
 0x5fe   :  { %v5734_v3 = vpop.eup %5733 }
 0x5ff   :  { %v2627_v4 = vadd.f32 1.0, %v5734_v3  ;;  %v5054_v3 = vld [vmem:[#allocation2 + $0xac8] sm:$0xf0] }
 0x601   :  { %v5736_v5 = vpop.eup %5735  ;;  %5737 = vrcp.f32 %v2627_v4  ;;  %v2640_v16 = vand.u32 2147483648, %v2627_v4  ;;  %v2638_v19 = vand.u32 2147483647, %v2627_v4  ;;  %vm2634_vm15 = vweird.f32 %v2627_v4 }
 0x602   :  { %v2645_v6 = vmul.f32 %v5736_v5, %v2628_v0  ;;  %vm2650_vm10 = vweird.f32 %v5736_v5  ;;  %v5606_v0 = vld [vmem:[#allocation2 + $0xac4] sm:$0xf] }
 0x603   :  { %vm2651_vm12 = vmor %vm2649_vm11, %vm2650_vm10  ;;  %v2641_v22 = vor.u32 1.1754944e-38, %v2640_v16  ;;  %vm2639_vm1 = vcmp.eq.f32.partialorder %v2638_v19, 8.507059e+37  ;;  %v5591_v16 = vld [vmem:[#allocation2 + $0xa44] sm:$0xf0]  ;;  %v4990_v19 = vld [vmem:[#allocation2 + $0xa48] sm:$0xf0] }
 0x604   :  { %v2646_v59 = vsub.f32 1.0, %v2645_v6  ;;  %v5593_v6 = vld [vmem:[#allocation2 + $0xa54] sm:$0xf0] }
 0x606   :  { %v2647_v9 = vmul.f32 %v5736_v5, %v2646_v59  ;;  %v5592_v59 = vld [vmem:[#allocation2 + $0xa54] sm:$0xf] }
 0x607   :  { %v5738_v10 = vpop.eup %5737 }
 0x608   :  { %v2648_v11 = vadd.f32 %v5736_v5, %v2647_v9  ;;  %v2630_v12 = vmul.f32 %v5738_v10, %v2627_v4  ;;  %vm2635_vm14 = vweird.f32 %v5738_v10  ;;  %v5057_v4 = vor.u32 %v5606_v0, %v5054_v3  ;;  %v4998_v9 = vld [vmem:[#allocation2 + $0xa58] sm:$0xf0]  ;;  %v5585_v0 = vld [vmem:[#allocation2 + $0xa14] sm:$0xf0] }
 0x609   :  { %vm2636_vm0 = vmor %vm2634_vm15, %vm2635_vm14  ;;  %v5001_v53 = vor.u32 %v5592_v59, %v4998_v9 }
 0x60a   :  { %v2652_v14 = vsel %vm2651_vm12, %v5736_v5, %v2648_v11  ;;  %v2631_v1 = vsub.f32 1.0, %v2630_v12  ;;  %v4996_v5 = vld [vmem:[#allocation2 + $0xa50] sm:$0xf]  ;;  %3199 = vmatpush.bf16.msra.mxu1 %v5057_v4  ;;  %v5605_v11 = vld [vmem:[#allocation2 + $0xab4] sm:$0xf0] }
 0x60b   :  { %v2657_v15 = vsel %vm2654_vm13, %v2656_v13, %v2652_v14  ;;  %v4997_v8 = vor.u32 %v5593_v6, %v4996_v5  ;;  %v5604_v12 = vld [vmem:[#allocation2 + $0xab4] sm:$0xf]  ;;  %v5046_v14 = vld [vmem:[#allocation2 + $0xab8] sm:$0xf0]  ;;  %v4965_v5 = vor.u32 %v5585_v0, %v4964_v63  ;;  %v5200_v63 = vld [vmem:[#allocation2 + $0x1e8] sm:$0xf0] }
 0x60c   :  { %v2660_v17 = vmul.f32 %v2657_v15, %v2618_v41  ;;  %v2632_v18 = vmul.f32 %v5738_v10, %v2631_v1  ;;  %v5597_v41 = vld [vmem:[#allocation2 + $0xa74] sm:$0xf0]  ;;  %v5049_v1 = vor.u32 %v5604_v12, %v5046_v14  ;;  %v4988_v15 = vld [vmem:[#allocation2 + $0xa40] sm:$0xf]  ;;  %v4966_v6 = vld [vmem:[#allocation2 + $0xa18] sm:$0xf0] }
 0x60d   :  { %v5013_v43 = vor.u32 %v5597_v41, %v5012_v40  ;;  %v5029_v40 = vor.u32 %v5601_v36, %v5028_v35  ;;  %v5030_v41 = vld [vmem:[#allocation2 + $0xa98] sm:$0xf0]  ;;  %v4969_v59 = vor.u32 %v5584_v2, %v4966_v6  ;;  %v4958_v14 = vld [vmem:[#allocation2 + $0xa08] sm:$0xf0]  ;;  %v5142_v2 = vld [vmem:[#allocation2 + $0x170] sm:$0xf] }
 0x60e   :  { %v2695_v20 = vpack.c.bf16 %v2660_v17, %v2660_v17  ;;  %v2633_v21 = vadd.f32 %v5738_v10, %v2632_v18  ;;  %v5590_v17 = vld [vmem:[#allocation2 + $0xa44] sm:$0xf]  ;;  %v4989_v18 = vor.u32 %v5591_v16, %v4988_v15  ;;  %3200 = vmatpush.bf16.msra.mxu1 %v5049_v1  ;;  %v5033_v42 = vor.u32 %v5600_v37, %v5030_v41  ;;  %v5144_v6 = vld [vmem:[#allocation2 + $0x178] sm:$0xf0] }
 0x60f   :  { %3157 = vmatpush.bf16.msra.mxu2 %v5013_v43  ;;  %v4972_v43 = vld [vmem:[#allocation2 + $0xa20] sm:$0xf] }
 0x610   :  { %v2637_v23 = vsel %vm2636_vm0, %v5738_v10, %v2633_v21  ;;  %2884 = vmatmul.bf16.vlgmr.msrb.gmra.mxu3 %v2695_v20  ;;  %2910 = vmatmul.bf16.vlgmr.msrb.gmra.mxu1 %v2695_v20  ;;  %v5044_v10 = vld [vmem:[#allocation2 + $0xab0] sm:$0xf]  ;;  %v4993_v20 = vor.u32 %v5590_v17, %v4990_v19  ;;  %v5036_v21 = vld [vmem:[#allocation2 + $0xaa0] sm:$0xf]  ;;  %v4973_v47 = vor.u32 %v5587_v44, %v4972_v43 }
 0x611   :  { %v2642_v24 = vsel %vm2639_vm1, %v2641_v22, %v2637_v23  ;;  %v5045_v13 = vor.u32 %v5605_v11, %v5044_v10  ;;  %v5603_v22 = vld [vmem:[#allocation2 + $0xaa4] sm:$0xf0]  ;;  %v5602_v23 = vld [vmem:[#allocation2 + $0xaa4] sm:$0xf] }
 0x612   :  { %v2659_v25 = vmul.f32 %v2642_v24, %v2592_v61  ;;  %v5009_v61 = vor.u32 %v5594_v57, %v5006_v60  ;;  %v6068_v24 = vld [vmem:[#allocation4 + $0x12] ss:$8 sm:$0x3]  ;;  %v5022_v60 = vld [vmem:[#allocation2 + $0xa88] sm:$0xf0] }
 0x613   :  { %3158 = vmatpush.bf16.msra.mxu2 %v5005_v58  ;;  %3174 = vmatpush.bf16.msra.mxu3 %v5045_v13  ;;  %v2700_v38 = vperm.slane %v6068_v24, 1  ;;  %v5021_v58 = vor.u32 %v5599_v54, %v5020_v52  ;;  %v5025_v62 = vor.u32 %v5598_v56, %v5022_v60  ;;  %v2699_v4 = vperm.slane %v6068_v24, 0  ;;  %v5583_v10 = vld [vmem:[#allocation2 + $0xa04] sm:$0xf0]  ;;  %v5582_v11 = vld [vmem:[#allocation2 + $0xa04] sm:$0xf] }
 0x614   :  { %v2694_v26 = vpack.c.bf16 %v2659_v25, %v2659_v25  ;;  %3184 = vmatpush.bf16.msra.mxu0 %v5009_v61  ;;  %v5037_v25 = vor.u32 %v5603_v22, %v5036_v21  ;;  %v4961_v16 = vor.u32 %v5582_v11, %v4958_v14  ;;  %v5644_v52 = vld [vmem:[#allocation2 + $0x1f4] sm:$0xf]  ;;  %v5208_v56 = vld [vmem:[#allocation2 + $0x1f8] sm:$0xf0]  ;;  %v5643_v60 = vld [vmem:[#allocation2 + $0x1e4] sm:$0xf0] }
 0x615   :  { %v5192_v11 = vld [vmem:[#allocation2 + $0x1d8] sm:$0xf0]  ;;  %v5627_v14 = vld [vmem:[#allocation2 + $0x164] sm:$0xf0] }
 0x616   :  { %2871 = vmatmul.bf16.vlgmr.msrb.gmra.mxu2 %v2694_v26  ;;  %2897 = vmatmul.bf16.vlgmr.msrb.gmra.mxu0 %v2694_v26  ;;  %v5038_v26 = vld [vmem:[#allocation2 + $0xaa8] sm:$0xf0] }
 0x617   :  { %3159 = vmatpush.bf16.msra.mxu2 %v4997_v8  ;;  %v5041_v28 = vor.u32 %v5602_v23, %v5038_v26  ;;  %3175 = vmatpush.bf16.msra.mxu3 %v5037_v25 }
 0x618   :  { %3185 = vmatpush.bf16.msra.mxu0 %v5001_v53  ;;  %v4956_v53 = vld [vmem:[#allocation2 + $0xa00] sm:$0xf] }
 0x619   :  { %3201 = vmatpush.bf16.msra.mxu1 %v5041_v28  ;;  %v4957_v13 = vor.u32 %v5583_v10, %v4956_v53  ;;  %v5640_v53 = vld [vmem:[#allocation2 + $0x1d4] sm:$0xf] }
 0x61b   :  { %3160 = vmatpush.bf16.msra.mxu2 %v4989_v18  ;;  %3176 = vmatpush.bf16.msra.mxu3 %v5029_v40 }
 0x61c   :  { %3186 = vmatpush.bf16.msra.mxu0 %v4993_v20 }
 0x61d   :  { %3202 = vmatpush.bf16.msra.mxu1 %v5033_v42 }
 0x61f   :  { %3161 = vmatpush.bf16.msra.mxu2 %v4981_v32  ;;  %3177 = vmatpush.bf16.msra.mxu3 %v5021_v58  ;;  %v5198_v58 = vld [vmem:[#allocation2 + $0x1e0] sm:$0xf] }
 0x620   :  { %3187 = vmatpush.bf16.msra.mxu0 %v4985_v34 }
 0x621   :  { %3203 = vmatpush.bf16.msra.mxu1 %v5025_v62  ;;  %v5199_v62 = vor.u32 %v5643_v60, %v5198_v58  ;;  %v5621_v58 = vld [vmem:[#allocation2 + $0x134] sm:$0xf0]  ;;  %v5620_v60 = vld [vmem:[#allocation2 + $0x134] sm:$0xf] }
 0x623   :  { %3162 = vmatpush.bf16.msra.mxu2 %v4973_v47 }
 0x624   :  { %3188 = vmatpush.bf16.msra.mxu0 %v4977_v51  ;;  %v5645_v51 = vld [vmem:[#allocation2 + $0x1f4] sm:$0xf0] }
 0x627   :  { %3163 = vmatpush.bf16.msra.mxu2 %v4965_v5 }
 0x628   :  { %3189 = vmatpush.bf16.msra.mxu0 %v4969_v59 }
 0x62b   :  { %3164 = vmatpush.bf16.msra.mxu2 %v4957_v13  ;;  %v5134_v13 = vld [vmem:[#allocation2 + $0x160] sm:$0xf] }
 0x62c   :  { %3190 = vmatpush.bf16.msra.mxu0 %v4961_v16  ;;  %v5136_v16 = vld [vmem:[#allocation2 + $0x168] sm:$0xf0] }
 0x68d   :  { %v2911_v27 = vpop.f32.mrf.mxu1 }
 0x693   :  { %v2885_v49 = vpop.f32.mrf.mxu3  ;;  %v2898_v50 = vpop.f32.mrf.mxu0 }
 0x694   :  { %v2899_v57 = vadd.f32 %v2898_v50, %v2700_v38  ;;  %v5206_v50 = vld [vmem:[#allocation2 + $0x1f0] sm:$0xf] }
 0x695   :  { %v2913_v61 = vpop.f32.mrf.mxu1  ;;  %v5207_v54 = vor.u32 %v5645_v51, %v5206_v50  ;;  %v5168_v51 = vld [vmem:[#allocation2 + $0x1a8] sm:$0xf0] }
 0x696   :  { %v2912_v3 = vadd.f32 %v2911_v27, %v2899_v57  ;;  %v5211_v57 = vor.u32 %v5644_v52, %v5208_v56  ;;  %v5642_v61 = vld [vmem:[#allocation2 + $0x1e4] sm:$0xf] }
 0x697   :  { %3470 = vmatpush.bf16.msrb.mxu3 %v5207_v54  ;;  %v5203_v0 = vor.u32 %v5642_v61, %v5200_v63  ;;  %v5112_v63 = vld [vmem:[#allocation2 + $0x138] sm:$0xf0] }
 0x698   :  { %v4953_v8 = vmul.f32 -1.442695, %v2912_v3  ;;  %3496 = vmatpush.bf16.msrb.mxu1 %v5211_v57  ;;  %v5110_v57 = vld [vmem:[#allocation2 + $0x130] sm:$0xf] }
 0x699   :  { %v2872_v9 = vpop.f32.mrf.mxu2 }
 0x69a   :  { %5739 = vpow2.f32 %v4953_v8  ;;  %v2873_v12 = vadd.f32 %v2872_v9, %v2699_v4  ;;  %v5628_v4 = vld [vmem:[#allocation2 + $0x174] sm:$0xf]  ;;  %v5190_v8 = vld [vmem:[#allocation2 + $0x1d0] sm:$0xf]  ;;  %v5641_v9 = vld [vmem:[#allocation2 + $0x1d4] sm:$0xf0] }
 0x69b   :  { %v2887_v1 = vpop.f32.mrf.mxu3  ;;  %v2900_v15 = vpop.f32.mrf.mxu0  ;;  %3471 = vmatpush.bf16.msrb.mxu3 %v5199_v62  ;;  %v5147_v59 = vor.u32 %v5628_v4, %v5144_v6  ;;  %v5191_v10 = vor.u32 %v5641_v9, %v5190_v8  ;;  %v5111_v62 = vor.u32 %v5621_v58, %v5110_v57  ;;  %v5633_v4 = vld [vmem:[#allocation2 + $0x194] sm:$0xf0]  ;;  %v5160_v9 = vld [vmem:[#allocation2 + $0x198] sm:$0xf0] }
 0x69c   :  { %v2886_v17 = vadd.f32 %v2885_v49, %v2873_v12  ;;  %3497 = vmatpush.bf16.msrb.mxu1 %v5203_v0  ;;  %v5195_v12 = vor.u32 %v5640_v53, %v5192_v11  ;;  %v5626_v1 = vld [vmem:[#allocation2 + $0x164] sm:$0xf]  ;;  %v5135_v15 = vor.u32 %v5627_v14, %v5134_v13  ;;  %v5619_v11 = vld [vmem:[#allocation2 + $0x124] sm:$0xf0] }
 0x69d   :  { %3483 = vmatpush.bf16.msrb.mxu0 %v5147_v59 }
 0x69e   :  { %v4952_v18 = vmul.f32 -1.442695, %v2886_v17 }
 0x69f   :  { %3472 = vmatpush.bf16.msrb.mxu3 %v5191_v10  ;;  %v5102_v10 = vld [vmem:[#allocation2 + $0x120] sm:$0xf] }
 0x6a0   :  { %v5740_v19 = vpop.eup %5739  ;;  %5741 = vpow2.f32 %v4952_v18  ;;  %3498 = vmatpush.bf16.msrb.mxu1 %v5195_v12  ;;  %v5182_v18 = vld [vmem:[#allocation2 + $0x1c0] sm:$0xf]  ;;  %v5618_v12 = vld [vmem:[#allocation2 + $0x124] sm:$0xf]  ;;  %v5103_v14 = vor.u32 %v5619_v11, %v5102_v10 }
 0x6a1   :  { %v2922_v20 = vadd.f32 1.0, %v5740_v19  ;;  %v2874_v21 = vpop.f32.mrf.mxu2  ;;  %v5639_v19 = vld [vmem:[#allocation2 + $0x1c4] sm:$0xf0] }
 0x6a2   :  { %v5183_v21 = vor.u32 %v5639_v19, %v5182_v18  ;;  %v5631_v18 = vld [vmem:[#allocation2 + $0x184] sm:$0xf0]  ;;  %v5630_v19 = vld [vmem:[#allocation2 + $0x184] sm:$0xf] }
 0x6a3   :  { %5743 = vrcp.f32 %v2922_v20  ;;  %v2949_v27 = vand.u32 2147483648, %v2922_v20  ;;  %v2947_v29 = vand.u32 2147483647, %v2922_v20  ;;  %vm2943_vm3 = vweird.f32 %v2922_v20 }
 0x6a4   :  { %3473 = vmatpush.bf16.msrb.mxu3 %v5183_v21 }
 0x6a5   :  { %v2950_v33 = vor.u32 1.1754944e-38, %v2949_v27  ;;  %vm2948_vm5 = vcmp.eq.f32.partialorder %v2947_v29, 8.507059e+37  ;;  %v6072_v27 = vld [vmem:[#allocation4 + $0x13] ss:$8 sm:$0x3] }
 0x6a6   :  { %v5742_v22 = vpop.eup %5741  ;;  %v5128_v29 = vld [vmem:[#allocation2 + $0x158] sm:$0xf0]  ;;  %v2993_v59 = vperm.slane %v6072_v27, 0 }
 0x6a7   :  { %v2921_v23 = vadd.f32 1.0, %v5742_v22  ;;  %v5184_v22 = vld [vmem:[#allocation2 + $0x1c8] sm:$0xf0] }
 0x6a9   :  { %v5744_v24 = vpop.eup %5743  ;;  %5745 = vrcp.f32 %v2921_v23  ;;  %v2934_v37 = vand.u32 2147483648, %v2921_v23  ;;  %v2932_v41 = vand.u32 2147483647, %v2921_v23  ;;  %vm2928_vm7 = vweird.f32 %v2921_v23 }
 0x6aa   :  { %v2939_v25 = vmul.f32 %v5744_v24, %v2922_v20  ;;  %vm2944_vm2 = vweird.f32 %v5744_v24  ;;  %v5638_v20 = vld [vmem:[#allocation2 + $0x1c4] sm:$0xf] }
 0x6ab   :  { %vm2945_vm4 = vmor %vm2943_vm3, %vm2944_vm2  ;;  %v2935_v44 = vor.u32 1.1754944e-38, %v2934_v37  ;;  %vm2933_vm9 = vcmp.eq.f32.partialorder %v2932_v41, 8.507059e+37  ;;  %v5622_v41 = vld [vmem:[#allocation2 + $0x144] sm:$0xf] }
 0x6ac   :  { %v2940_v26 = vsub.f32 1.0, %v2939_v25  ;;  %v5625_v25 = vld [vmem:[#allocation2 + $0x154] sm:$0xf0] }
 0x6ae   :  { %v2941_v28 = vmul.f32 %v5744_v24, %v2940_v26  ;;  %v5624_v26 = vld [vmem:[#allocation2 + $0x154] sm:$0xf] }
 0x6af   :  { %v5746_v30 = vpop.eup %5745 }
 0x6b0   :  { %v2942_v31 = vadd.f32 %v5744_v24, %v2941_v28  ;;  %v2924_v32 = vmul.f32 %v5746_v30, %v2921_v23  ;;  %vm2929_vm6 = vweird.f32 %v5746_v30  ;;  %v5187_v23 = vor.u32 %v5638_v20, %v5184_v22  ;;  %v5152_v22 = vld [vmem:[#allocation2 + $0x188] sm:$0xf0] }
 0x6b1   :  { %vm2930_vm8 = vmor %vm2928_vm7, %vm2929_vm6 }
 0x6b2   :  { %v2946_v34 = vsel %vm2945_vm4, %v5744_v24, %v2942_v31  ;;  %v2925_v35 = vsub.f32 1.0, %v2924_v32  ;;  %v5126_v24 = vld [vmem:[#allocation2 + $0x150] sm:$0xf]  ;;  %3499 = vmatpush.bf16.msrb.mxu1 %v5187_v23  ;;  %v5131_v31 = vor.u32 %v5624_v26, %v5128_v29 }
 0x6b3   :  { %v2951_v36 = vsel %vm2948_vm5, %v2950_v33, %v2946_v34  ;;  %v5127_v28 = vor.u32 %v5625_v25, %v5126_v24  ;;  %v5174_v32 = vld [vmem:[#allocation2 + $0x1b0] sm:$0xf]  ;;  %v5637_v33 = vld [vmem:[#allocation2 + $0x1b4] sm:$0xf0]  ;;  %v5636_v34 = vld [vmem:[#allocation2 + $0x1b4] sm:$0xf]  ;;  %v5155_v25 = vor.u32 %v5630_v19, %v5152_v22 }
 0x6b4   :  { %v2954_v38 = vmul.f32 %v2951_v36, %v2912_v3  ;;  %v2926_v40 = vmul.f32 %v5746_v30, %v2925_v35  ;;  %v5629_v3 = vld [vmem:[#allocation2 + $0x174] sm:$0xf0]  ;;  %v5175_v35 = vor.u32 %v5637_v33, %v5174_v32  ;;  %v5176_v36 = vld [vmem:[#allocation2 + $0x1b8] sm:$0xf0]  ;;  %v5094_v26 = vld [vmem:[#allocation2 + $0x110] sm:$0xf] }
 0x6b5   :  { %v5143_v5 = vor.u32 %v5629_v3, %v5142_v2  ;;  %v5179_v37 = vor.u32 %v5636_v34, %v5176_v36  ;;  %v5115_v2 = vor.u32 %v5620_v60, %v5112_v63  ;;  %v5158_v3 = vld [vmem:[#allocation2 + $0x190] sm:$0xf]  ;;  %v5086_v34 = vld [vmem:[#allocation2 + $0x100] sm:$0xf] }
 0x6b6   :  { %v2989_v42 = vpack.c.bf16 %v2954_v38, %v2954_v38  ;;  %v2927_v43 = vadd.f32 %v5746_v30, %v2926_v40  ;;  %v5118_v38 = vld [vmem:[#allocation2 + $0x140] sm:$0xf]  ;;  %v5623_v40 = vld [vmem:[#allocation2 + $0x144] sm:$0xf0]  ;;  %3474 = vmatpush.bf16.msrb.mxu3 %v5175_v35  ;;  %v5159_v8 = vor.u32 %v5633_v4, %v5158_v3 }
 0x6b7   :  { %3457 = vmatpush.bf16.msrb.mxu2 %v5143_v5  ;;  %3500 = vmatpush.bf16.msrb.mxu1 %v5179_v37  ;;  %v5632_v5 = vld [vmem:[#allocation2 + $0x194] sm:$0xf]  ;;  %v5615_v35 = vld [vmem:[#allocation2 + $0x104] sm:$0xf0]  ;;  %v5614_v37 = vld [vmem:[#allocation2 + $0x104] sm:$0xf] }
 0x6b8   :  { %v2931_v46 = vsel %vm2930_vm8, %v5746_v30, %v2927_v43  ;;  %3178 = vmatmul.bf16.vlgmr.msra.gmra.mxu3 %v2989_v42  ;;  %3204 = vmatmul.bf16.vlgmr.msra.gmra.mxu1 %v2989_v42  ;;  %v2994_v42 = vperm.slane %v6072_v27, 1  ;;  %v5119_v43 = vor.u32 %v5623_v40, %v5118_v38  ;;  %v5163_v53 = vor.u32 %v5632_v5, %v5160_v9  ;;  %v5617_v27 = vld [vmem:[#allocation2 + $0x114] sm:$0xf0]  ;;  %v5088_v38 = vld [vmem:[#allocation2 + $0x108] sm:$0xf0]  ;;  %v5657_v19 = vld [vmem:[#allocation9 + $0x58] sm:$0xff] }
 0x6b9   :  { %v2936_v47 = vsel %vm2933_vm9, %v2935_v44, %v2931_v46  ;;  %v5120_v44 = vld [vmem:[#allocation2 + $0x148] sm:$0xf0]  ;;  %v5087_v36 = vor.u32 %v5615_v35, %v5086_v34  ;;  %v3291_v22 = vld [vmem:[#allocation4 + $0x14] ss:$8 sm:$0x3] }
 0x6ba   :  { %v2953_v48 = vmul.f32 %v2936_v47, %v2886_v17  ;;  %v5139_v17 = vor.u32 %v5626_v1, %v5136_v16  ;;  %v5123_v46 = vor.u32 %v5622_v41, %v5120_v44  ;;  %v5166_v47 = vld [vmem:[#allocation2 + $0x1a0] sm:$0xf]  ;;  %v5104_v1 = vld [vmem:[#allocation2 + $0x128] sm:$0xf0]  ;;  %v5091_v41 = vor.u32 %v5614_v37, %v5088_v38  ;;  %v5647_v34 = vld [vmem:[#allocation9 + $0x8] sm:$0xff] }
 0x6bb   :  { %3458 = vmatpush.bf16.msrb.mxu2 %v5135_v15  ;;  %v5107_v16 = vor.u32 %v5618_v12, %v5104_v1  ;;  %v5661_v1 = vld [vmem:[#allocation9 + $0x78] sm:$0xff]  ;;  %v5646_v38 = vld [vmem:[#allocation9] sm:$0xff] }
 0x6bc   :  { %v2988_v49 = vpack.c.bf16 %v2953_v48, %v2953_v48  ;;  %3484 = vmatpush.bf16.msrb.mxu0 %v5139_v17  ;;  %v5635_v48 = vld [vmem:[#allocation2 + $0x1a4] sm:$0xf0]  ;;  %v5150_v17 = vld [vmem:[#allocation2 + $0x180] sm:$0xf] }
 0x6bd   :  { %v5167_v50 = vor.u32 %v5635_v48, %v5166_v47  ;;  %v5151_v21 = vor.u32 %v5631_v18, %v5150_v17  ;;  %v5659_v17 = vld [vmem:[#allocation9 + $0x68] sm:$0xff] }
 0x6be   :  { %3165 = vmatmul.bf16.vlgmr.msra.gmra.mxu2 %v2988_v49  ;;  %3191 = vmatmul.bf16.vlgmr.msra.gmra.mxu0 %v2988_v49  ;;  %v5634_v49 = vld [vmem:[#allocation2 + $0x1a4] sm:$0xf]  ;;  %v5651_v18 = vld [vmem:[#allocation9 + $0x28] sm:$0xff] }
 0x6bf   :  { %3459 = vmatpush.bf16.msrb.mxu2 %v5127_v28  ;;  %v5171_v56 = vor.u32 %v5634_v49, %v5168_v51  ;;  %3475 = vmatpush.bf16.msrb.mxu3 %v5167_v50  ;;  %v5616_v28 = vld [vmem:[#allocation2 + $0x114] sm:$0xf] }
 0x6c0   :  { %3485 = vmatpush.bf16.msrb.mxu0 %v5131_v31  ;;  %v5096_v31 = vld [vmem:[#allocation2 + $0x118] sm:$0xf0] }
 0x6c1   :  { %3501 = vmatpush.bf16.msrb.mxu1 %v5171_v56  ;;  %v5099_v32 = vor.u32 %v5616_v28, %v5096_v31 }
 0x6c3   :  { %3460 = vmatpush.bf16.msrb.mxu2 %v5119_v43  ;;  %3476 = vmatpush.bf16.msrb.mxu3 %v5159_v8 }
 0x6c4   :  { %3486 = vmatpush.bf16.msrb.mxu0 %v5123_v46 }
 0x6c5   :  { %3502 = vmatpush.bf16.msrb.mxu1 %v5163_v53 }
 0x6c7   :  { %3461 = vmatpush.bf16.msrb.mxu2 %v5111_v62  ;;  %3477 = vmatpush.bf16.msrb.mxu3 %v5151_v21 }
 0x6c8   :  { %3487 = vmatpush.bf16.msrb.mxu0 %v5115_v2 }
 0x6c9   :  { %3503 = vmatpush.bf16.msrb.mxu1 %v5155_v25  ;;  %v5655_v25 = vld [vmem:[#allocation9 + $0x48] sm:$0xff] }
 0x6cb   :  { %3462 = vmatpush.bf16.msrb.mxu2 %v5103_v14  ;;  %3696 = vmatpush.bf16.msra.mxu3 %v5661_v1 }
 0x6cc   :  { %3488 = vmatpush.bf16.msrb.mxu0 %v5107_v16  ;;  %v5653_v16 = vld [vmem:[#allocation9 + $0x38] sm:$0xff] }
 0x6d0   :  { %3489 = vmatpush.bf16.msrb.mxu0 %v5099_v32 }
 0x6d4   :  { %3490 = vmatpush.bf16.msrb.mxu0 %v5091_v41 }
 0x735   :  { %v3205_v30 = vpop.f32.mrf.mxu1 }
 0x73b   :  { %v3179_v52 = vpop.f32.mrf.mxu3  ;;  %v3192_v54 = vpop.f32.mrf.mxu0 }
 0x73c   :  { %v3193_v61 = vadd.f32 %v3192_v54, %v2994_v42 }
 0x73d   :  { %v3207_v0 = vpop.f32.mrf.mxu1 }
 0x73e   :  { %v6075_v6 = vadd.f32 %v3205_v30, %v3193_v61  ;;  %v5095_v30 = vor.u32 %v5617_v27, %v5094_v26  ;;  %v5648_v26 = vld [vmem:[#allocation9 + $0x10] sm:$0xff] }
 0x740   :  { %v5083_v13 = vmul.f32 -1.442695, %v6075_v6  ;;  %3463 = vmatpush.bf16.msrb.mxu2 %v5095_v30  ;;  %v5654_v30 = vld [vmem:[#allocation9 + $0x40] sm:$0xff] }
 0x741   :  { %v3166_v15 = vpop.f32.mrf.mxu2 }
 0x742   :  { %5747 = vpow2.f32 %v5083_v13  ;;  %v3167_v20 = vadd.f32 %v3166_v15, %v2993_v59  ;;  %v5660_v15 = vld [vmem:[#allocation9 + $0x70] sm:$0xff] }
 0x743   :  { %v3181_v23 = vpop.f32.mrf.mxu3  ;;  %v3194_v24 = vpop.f32.mrf.mxu0  ;;  %3697 = vmatpush.bf16.msra.mxu3 %v5660_v15 }
 0x744   :  { %v3180_v29 = vadd.f32 %v3179_v52, %v3167_v20  ;;  %3464 = vmatpush.bf16.msrb.mxu2 %v5087_v36  ;;  %v5656_v20 = vld [vmem:[#allocation9 + $0x50] sm:$0xff]  ;;  %v5649_v23 = vld [vmem:[#allocation9 + $0x18] sm:$0xff]  ;;  %v3294_v24 = vperm.slane %v3291_v22, 1 }
 0x746   :  { %v5082_v33 = vmul.f32 -1.442695, %v3180_v29 }
 0x747   :  { %3698 = vmatpush.bf16.msra.mxu3 %v5659_v17 }
 0x748   :  { %v5748_v40 = vpop.eup %5747  ;;  %5749 = vpow2.f32 %v5082_v33  ;;  %3683 = vmatpush.bf16.msra.mxu2 %v5653_v16  ;;  %v3293_v33 = vperm.slane %v3291_v22, 0 }
 0x749   :  { %v3216_v42 = vadd.f32 1.0, %v5748_v40  ;;  %v3168_v43 = vpop.f32.mrf.mxu2 }
 0x74b   :  { %5751 = vrcp.f32 %v3216_v42  ;;  %v3243_v50 = vand.u32 2147483648, %v3216_v42  ;;  %v3241_v52 = vand.u32 2147483647, %v3216_v42  ;;  %vm3237_vm11 = vweird.f32 %v3216_v42 }
 0x74d   :  { %v3244_v58 = vor.u32 1.1754944e-38, %v3243_v50  ;;  %vm3242_vm13 = vcmp.eq.f32.partialorder %v3241_v52, 8.507059e+37 }
 0x74e   :  { %v5750_v44 = vpop.eup %5749 }
 0x74f   :  { %v3215_v46 = vadd.f32 1.0, %v5750_v44 }
 0x751   :  { %v5752_v47 = vpop.eup %5751  ;;  %5753 = vrcp.f32 %v3215_v46  ;;  %v3228_v63 = vand.u32 2147483648, %v3215_v46  ;;  %v3226_v3 = vand.u32 2147483647, %v3215_v46  ;;  %vm3222_vm15 = vweird.f32 %v3215_v46 }
 0x752   :  { %v3233_v48 = vmul.f32 %v5752_v47, %v3216_v42  ;;  %vm3238_vm10 = vweird.f32 %v5752_v47 }
 0x753   :  { %vm3239_vm12 = vmor %vm3237_vm11, %vm3238_vm10  ;;  %v3229_v59 = vor.u32 1.1754944e-38, %v3228_v63  ;;  %vm3227_vm1 = vcmp.eq.f32.partialorder %v3226_v3, 8.507059e+37 }
 0x754   :  { %v3234_v49 = vsub.f32 1.0, %v3233_v48 }
 0x756   :  { %v3235_v51 = vmul.f32 %v5752_v47, %v3234_v49 }
 0x757   :  { %v5754_v54 = vpop.eup %5753 }
 0x758   :  { %v3236_v56 = vadd.f32 %v5752_v47, %v3235_v51  ;;  %v3218_v57 = vmul.f32 %v5754_v54, %v3215_v46  ;;  %vm3223_vm14 = vweird.f32 %v5754_v54 }
 0x759   :  { %vm3224_vm0 = vmor %vm3222_vm15, %vm3223_vm14 }
 0x75a   :  { %v3240_v60 = vsel %vm3239_vm12, %v5752_v47, %v3236_v56  ;;  %v3219_v61 = vsub.f32 1.0, %v3218_v57 }
 0x75b   :  { %v3245_v62 = vsel %vm3242_vm13, %v3244_v58, %v3240_v60 }
 0x75c   :  { %v3248_v0 = vmul.f32 %v3245_v62, %v6075_v6  ;;  %v3220_v2 = vmul.f32 %v5754_v54, %v3219_v61 }
 0x75e   :  { %v3250_v4 = vadd.f32 %v3248_v0, %v6055_v55  ;;  %v3221_v5 = vadd.f32 %v5754_v54, %v3220_v2 }
 0x760   :  { %v3252_v8 = vmul.f32 0.70710677, %v3250_v4  ;;  %v3225_v9 = vsel %vm3224_vm0, %v5754_v54, %v3221_v5 }
 0x761   :  { %v3230_v53 = vsel %vm3227_vm1, %v3229_v59, %v3225_v9 }
 0x762   :  { %v3247_v10 = vmul.f32 %v3230_v53, %v3180_v29  ;;  %v3254_v11 = vadd.f32 %v3252_v8, %v6004_v39  ;;  %v5652_v39 = vld [vmem:[#allocation9 + $0x30] sm:$0xff] }
 0x763   :  { %3684 = vmatpush.bf16.msra.mxu2 %v5652_v39 }
 0x764   :  { %v3249_v12 = vadd.f32 %v3247_v10, %v6060_v7  ;;  %v3289_v13 = vpack.c.bf16 %v3254_v11, %v3254_v11  ;;  %v5658_v7 = vld [vmem:[#allocation9 + $0x60] sm:$0xff] }
 0x765   :  { %3699 = vmatpush.bf16.msra.mxu3 %v5658_v7 }
 0x766   :  { %v3251_v6 = vmul.f32 0.70710677, %v3249_v12  ;;  %3478 = vmatmul.bf16.vlgmr.msrb.gmra.mxu3 %v3289_v13  ;;  %3504 = vmatmul.bf16.vlgmr.msrb.gmra.mxu1 %v3289_v13 }
 0x767   :  { %3685 = vmatpush.bf16.msra.mxu2 %v5651_v18 }
 0x768   :  { %v3253_v14 = vadd.f32 %v3251_v6, %v6006_v45  ;;  %v5650_v45 = vld [vmem:[#allocation9 + $0x20] sm:$0xff] }
 0x769   :  { %3700 = vmatpush.bf16.msra.mxu3 %v5657_v19 }
 0x76a   :  { %v3288_v55 = vpack.c.bf16 %v3253_v14, %v3253_v14  ;;  %v5674_v14 = vld [vmem:[#allocation10] ss:$0 sm:$0xff] }
 0x76b   :  { %3686 = vmatpush.bf16.msra.mxu2 %v5650_v45 }
 0x76c   :  { %3465 = vmatmul.bf16.vlgmr.msrb.gmra.mxu2 %v3288_v55  ;;  %3491 = vmatmul.bf16.vlgmr.msrb.gmra.mxu0 %v3288_v55 }
 0x76d   :  { %3701 = vmatpush.bf16.msra.mxu3 %v5656_v20 }
 0x76f   :  { %3687 = vmatpush.bf16.msra.mxu2 %v5649_v23 }
 0x771   :  { %3702 = vmatpush.bf16.msra.mxu3 %v5655_v25 }
 0x773   :  { %3688 = vmatpush.bf16.msra.mxu2 %v5648_v26 }
 0x775   :  { %3703 = vmatpush.bf16.msra.mxu3 %v5654_v30 }
 0x777   :  { %3689 = vmatpush.bf16.msra.mxu2 %v5647_v34 }
 0x77b   :  { %3690 = vmatpush.bf16.msra.mxu2 %v5646_v38 }
 0x7e3   :  { %v3505_v21 = vpop.f32.mrf.mxu1 }
 0x7e9   :  { %v3479_v27 = vpop.f32.mrf.mxu3  ;;  %v3492_v28 = vpop.f32.mrf.mxu0 }
 0x7ea   :  { %v3493_v29 = vadd.f32 %v3492_v28, %v3294_v24 }
 0x7eb   :  { %v3507_v31 = vpop.f32.mrf.mxu1 }
 0x7ec   :  { %v3506_v32 = vadd.f32 %v3505_v21, %v3493_v29 }
 0x7ee   :  { %v5213_v35 = vmul.f32 -1.442695, %v3506_v32 }
 0x7ef   :  { %v3466_v36 = vpop.f32.mrf.mxu2 }
 0x7f0   :  { %5755 = vpow2.f32 %v5213_v35  ;;  %v3467_v37 = vadd.f32 %v3466_v36, %v3293_v33 }
 0x7f1   :  { %v3481_v40 = vpop.f32.mrf.mxu3  ;;  %v3494_v41 = vpop.f32.mrf.mxu0 }
 0x7f2   :  { %v3480_v42 = vadd.f32 %v3479_v27, %v3467_v37 }
 0x7f4   :  { %v5212_v43 = vmul.f32 -1.442695, %v3480_v42 }
 0x7f6   :  { %v5756_v44 = vpop.eup %5755  ;;  %5757 = vpow2.f32 %v5212_v43 }
 0x7f7   :  { %v3516_v46 = vadd.f32 1.0, %v5756_v44  ;;  %v3468_v47 = vpop.f32.mrf.mxu2 }
 0x7f9   :  { %5759 = vrcp.f32 %v3516_v46  ;;  %v3543_v54 = vand.u32 2147483648, %v3516_v46  ;;  %v3541_v57 = vand.u32 2147483647, %v3516_v46  ;;  %vm3537_vm3 = vweird.f32 %v3516_v46 }
 0x7fb   :  { %v3544_v62 = vor.u32 1.1754944e-38, %v3543_v54  ;;  %vm3542_vm5 = vcmp.eq.f32.partialorder %v3541_v57, 8.507059e+37 }
 0x7fc   :  { %v5758_v48 = vpop.eup %5757 }
 0x7fd   :  { %v3515_v49 = vadd.f32 1.0, %v5758_v48 }
 0x7ff   :  { %v5760_v50 = vpop.eup %5759  ;;  %5761 = vrcp.f32 %v3515_v49  ;;  %v3528_v3 = vand.u32 2147483648, %v3515_v49  ;;  %v3526_v59 = vand.u32 2147483647, %v3515_v49  ;;  %vm3522_vm7 = vweird.f32 %v3515_v49 }
 0x800   :  { %v3533_v51 = vmul.f32 %v5760_v50, %v3516_v46  ;;  %vm3538_vm2 = vweird.f32 %v5760_v50 }
 0x801   :  { %vm3539_vm4 = vmor %vm3537_vm3, %vm3538_vm2  ;;  %v3529_v53 = vor.u32 1.1754944e-38, %v3528_v3  ;;  %vm3527_vm9 = vcmp.eq.f32.partialorder %v3526_v59, 8.507059e+37 }
 0x802   :  { %v3534_v52 = vsub.f32 1.0, %v3533_v51 }
 0x804   :  { %v3535_v56 = vmul.f32 %v5760_v50, %v3534_v52 }
 0x805   :  { %v5762_v58 = vpop.eup %5761 }
 0x806   :  { %v3536_v60 = vadd.f32 %v5760_v50, %v3535_v56  ;;  %v3518_v61 = vmul.f32 %v5762_v58, %v3515_v49  ;;  %vm3523_vm6 = vweird.f32 %v5762_v58 }
 0x807   :  { %vm3524_vm8 = vmor %vm3522_vm7, %vm3523_vm6 }
 0x808   :  { %v3540_v63 = vsel %vm3539_vm4, %v5760_v50, %v3536_v60  ;;  %v3519_v0 = vsub.f32 1.0, %v3518_v61 }
 0x809   :  { %v3545_v2 = vsel %vm3542_vm5, %v3544_v62, %v3540_v63 }
 0x80a   :  { %v3548_v4 = vmul.f32 %v3545_v2, %v3506_v32  ;;  %v3520_v5 = vmul.f32 %v5762_v58, %v3519_v0 }
 0x80c   :  { %v3582_v8 = vpack.c.bf16 %v3548_v4, %v3548_v4  ;;  %v3521_v9 = vadd.f32 %v5762_v58, %v3520_v5 }
 0x80e   :  { %v3525_v10 = vsel %vm3524_vm8, %v5762_v58, %v3521_v9  ;;  %3704 = vmatmul.bf16.vlgmr.msra.gmra.mxu3 %v3582_v8 }
 0x80f   :  { %v3530_v11 = vsel %vm3527_vm9, %v3529_v53, %v3525_v10 }
 0x810   :  { %v3547_v12 = vmul.f32 %v3530_v11, %v3480_v42 }
 0x812   :  { %v3581_v13 = vpack.c.bf16 %v3547_v12, %v3547_v12 }
 0x814   :  { %3691 = vmatmul.bf16.vlgmr.msra.gmra.mxu2 %v3581_v13 }
 0x891   :  { %v3705_v6 = vpop.f32.mrf.mxu3 }
 0x897   :  { %v3692_v55 = vpop.f32.mrf.mxu2 }
 0x898   :  { %v3693_v1 = vadd.f32 %v5674_v14, %v3692_v55 }
 0x899   :  { %v3707_v15 = vpop.f32.mrf.mxu3 }
 0x89a   :  { %v3706_v16 = vadd.f32 %v3705_v6, %v3693_v1 }
 0x89c   :  { %3709 = vst [vmem:[%s6095_s8] sm:$0xff] %v3706_v16 }
 0x89f   :  { %v3694_v17 = vpop.f32.mrf.mxu2 }
 0x8a0   :  { %3714 = vsyncpa [#allocation3], 1 }
 0x8a1   :  { %3715 = vsyncpa [#allocation5], 1 }
 0x8a2   :  { %3716 = vsyncpa [#allocation8], 1 }
 0x8a3   :  { %3717 = vsyncpa [#allocation11], 1 }

</bundles_post_ra>
